<compile_context>
chip_gen: v5e
topology: v5e:2x2
jax: 0.10.0
libtpu: 0.0.40
codegen_flags: <defaults>
</compile_context>

<pallas_src>
import functools

import jax
import jax.numpy as jnp
from jax.experimental import pallas as pl
from jax.experimental.pallas import tpu as pltpu


# Raised above the default scoped VMEM (16 MiB v5e / 32 MiB v6e,v7x) so TM=256
# row tiles keep double-buffering; kept below v7x's 64 MiB physical VMEM.
_VMEM_LIMIT_BYTES = 48 * 1024 * 1024

_SQRT_2_OVER_PI = 0.7978845608028654


# ---------------- elementwise helpers (kernel-safe) ---------------------------

def _gelu_tanh(x):
    # tanh-form GELU: tanh lowers to the EUP (otherwise idle slot) instead of a
    # ~14-op VALU erf polynomial.  |gelu_tanh - gelu_exact| ~ 1e-3, well inside
    # the bf16-MXU tolerance used below.
    return 0.5 * x * (1.0 + jnp.tanh(_SQRT_2_OVER_PI * (x + 0.044715 * x * x * x)))


def _sigmoid(x):
    return 1.0 / (1.0 + jnp.exp(-x))


def _layernorm(x, g, b, eps=1e-5):
    mu = jnp.mean(x, axis=-1, keepdims=True)
    xc = x - mu
    var = jnp.mean(xc * xc, axis=-1, keepdims=True)
    return xc * jax.lax.rsqrt(var + eps) * g + b


# ---------------------------------- kernels -----------------------------------

def _ln_linear_kernel(x_ref, g_ref, bln_ref, w_ref, b_ref, o_ref, *, act):
    # LayerNorm fused into the matmul prologue (saves an HBM round trip).
    # NOTE: when M % TM != 0 the padded tail rows run LN/matmul on garbage and
    # are discarded on store (rsqrt(var+eps) cannot NaN) — do not read them.
    xn = _layernorm(x_ref[...], g_ref[...], bln_ref[...])
    y = jnp.dot(xn.astype(w_ref.dtype), w_ref[...],
                preferred_element_type=jnp.float32)
    y = y + b_ref[...]
    if act == "gelu":
        y = _gelu_tanh(y)
    o_ref[...] = y.astype(o_ref.dtype)


def _linear_res_kernel(x_ref, w_ref, b_ref, *rest, n_res):
    # rest = (*residual_refs, o_ref); residual adds fused into the epilogue (f32).
    o_ref = rest[n_res]
    y = jnp.dot(x_ref[...].astype(w_ref.dtype), w_ref[...],
                preferred_element_type=jnp.float32)
    y = y + b_ref[...]
    for r_ref in rest[:n_res]:
        y = y + r_ref[...].astype(jnp.float32)
    o_ref[...] = y.astype(o_ref.dtype)


def _attn_kernel(qkv_ref, rh_ref, rw_ref, selh_ref, selw_ref, o_ref, o_scr, *,
                 num_heads, head_dim, H, W, scale):
    # qkv_ref: (1, N, 3*C) bf16 with torch column order [q|k|v][head][channel].
    #   (We keep the lane-packed (N, 3C) layout: an explicit host-side transpose
    #    to a head-major leading axis would add a full HBM pass over qkv, which
    #    outweighs the per-head lane-slice relayouts at windowed-attention sizes.)
    # rh_ref: (H, H, hd) bf16, rw_ref: (W, W, hd) bf16 (decomposed tables)
    # selh/selw: (H, N)/(W, N) bf16 0/1 matrices broadcasting the bias to (N, N)
    # o_scr: (N, C) bf16 scratch — per-head writes keep live ranges short while
    #        the final output store stays lane-dense.
    N = H * W
    C = num_heads * head_dim
    rh = rh_ref[...]
    rw = rw_ref[...]
    selh = selh_ref[...]
    selw = selw_ref[...]

    for h in range(num_heads):
        off = h * head_dim
        qh = qkv_ref[0, :, off:off + head_dim]                       # (N, hd) bf16
        kh = qkv_ref[0, :, C + off:C + off + head_dim]
        vh = qkv_ref[0, :, 2 * C + off:2 * C + off + head_dim]

        # scale is factored out: scale*(q k^T + bias(q)) == (scale*q) k^T + bias(scale*q)
        logits = jax.lax.dot_general(qh, kh, (((1,), (1,)), ((), ())),
                                     preferred_element_type=jnp.float32)  # (N, N)

        # Decomposed relative-position bias — never builds (N, N, hd):
        #   bh[nq, kh] = sum_c q[nq, c] * Rh[ih(nq), kh, c]   (tiny MXU matmuls)
        q4 = qh.reshape(H, W, head_dim)
        bh = jnp.einsum("hwc,hkc->hwk", q4, rh,
                        preferred_element_type=jnp.float32).reshape(N, H)
        bw = jnp.einsum("hwc,wkc->hwk", q4, rw,
                        preferred_element_type=jnp.float32).reshape(N, W)
        # broadcast to (N, N) on the MXU via bf16 0/1 selection matrices
        logits = logits + jnp.dot(bh.astype(jnp.bfloat16), selh,
                                  preferred_element_type=jnp.float32)
        logits = logits + jnp.dot(bw.astype(jnp.bfloat16), selw,
                                  preferred_element_type=jnp.float32)
        logits = logits * scale

        # softmax in f32; reciprocal goes to the (otherwise idle) EUP slot
        logits = logits - jnp.max(logits, axis=-1, keepdims=True)
        e = jnp.exp(logits)
        p = e * pl.reciprocal(jnp.sum(e, axis=-1, keepdims=True), approx=True)
        out_h = jnp.dot(p.astype(jnp.bfloat16), vh,
                        preferred_element_type=jnp.float32)
        o_scr[:, off:off + head_dim] = out_h.astype(o_scr.dtype)

    o_ref[0] = o_scr[...]        # single lane-dense (N, C) store


def _pcm_kernel(x_ref, w1_ref, b1_ref, s1_ref, t1_ref, w2_ref, b2_ref, o_ref,
                pad1, pad2, *, H, W, K):
    # Fused PCM branch. Grid = (B, Jout):
    #   j == 0 : conv1 (im2col matmul) + folded eval-BN + SiLU -> bf16 pad2 scratch
    #   every j: conv2 im2col matmul against the j-th output-channel tile of w2.
    # Scratches persist across grid steps; only the halo ring is zeroed (once per
    # batch step — safe under megacore sharding of the batch axis), the interior
    # is fully overwritten each batch.
    N = H * W
    Cin = x_ref.shape[-1]
    Cmid = w1_ref.shape[-1]
    P = K // 2
    j = pl.program_id(1)

    def im2col(pad_ref, c):
        taps = []
        for dh in range(K):
            for dw in range(K):
                taps.append(pad_ref[dh:dh + H, dw:dw + W, :].reshape(N, c))
        return jnp.concatenate(taps, axis=-1)          # (N, K*K*c) bf16

    def zero_ring(pad):
        Hp, Wp, c = pad.shape
        pad[0:P, :, :] = jnp.zeros((P, Wp, c), pad.dtype)
        pad[P + H:Hp, :, :] = jnp.zeros((Hp - H - P, Wp, c), pad.dtype)
        pad[:, 0:P, :] = jnp.zeros((Hp, P, c), pad.dtype)
        pad[:, P + W:Wp, :] = jnp.zeros((Hp, Wp - W - P, c), pad.dtype)

    @pl.when(j == 0)
    def _conv1():
        zero_ring(pad1)
        zero_ring(pad2)
        pad1[P:P + H, P:P + W, :] = x_ref[0].reshape(H, W, Cin).astype(pad1.dtype)
        y = jnp.dot(im2col(pad1, Cin), w1_ref[...],
                    preferred_element_type=jnp.float32)            # (N, Cmid)
        y = (y + b1_ref[...]) * s1_ref[...] + t1_ref[...]          # bias + eval-BN
        y = y * _sigmoid(y)                                        # SiLU
        pad2[P:P + H, P:P + W, :] = y.reshape(H, W, Cmid).astype(pad2.dtype)

    o_ref[0] = (jnp.dot(im2col(pad2, Cmid), w2_ref[...],
                        preferred_element_type=jnp.float32) + b2_ref[...])


# --------------------------------- wrappers -----------------------------------

def _pick_row_tile(M, block_rows=256):
    # Row tiles: big enough to pipeline well, >=2 blocks so the grid can shard
    # across v7x's two TensorCores.  256 is the v7x-safe default; on v5e/v6e
    # (128 MiB VMEM) sweeping block_rows up to 512 is worthwhile.
    TM = min(block_rows, M)
    if M > 8 and pl.cdiv(M, TM) < 2:
        TM = max(8, ((M // 2) + 7) // 8 * 8)
    return TM


def pallas_ln_linear(x, gamma, beta, w_t, bias, act=None,
                     out_dtype=jnp.float32, block_rows=256):
    # w_t is (K, Nout) and already bf16 (torch Linear weight transposed, prepped).
    M, C = x.shape
    Nout = w_t.shape[1]
    TM = _pick_row_tile(M, block_rows)
    kern = functools.partial(_ln_linear_kernel, act=act)
    return pl.pallas_call(
        kern,
        out_shape=jax.ShapeDtypeStruct((M, Nout), out_dtype),
        grid=(pl.cdiv(M, TM),),
        in_specs=[pl.BlockSpec((TM, C), lambda i: (i, 0)),
                  pl.BlockSpec((1, C), lambda i: (0, 0)),
                  pl.BlockSpec((1, C), lambda i: (0, 0)),
                  pl.BlockSpec((C, Nout), lambda i: (0, 0)),
                  pl.BlockSpec((1, Nout), lambda i: (0, 0))],
        out_specs=pl.BlockSpec((TM, Nout), lambda i: (i, 0)),
        compiler_params=pltpu.CompilerParams(
            dimension_semantics=("parallel",),
            vmem_limit_bytes=_VMEM_LIMIT_BYTES),
    )(x, gamma.reshape(1, C), beta.reshape(1, C), w_t, bias.reshape(1, Nout))


def pallas_linear_res(x, w_t, bias, residuals, block_rows=256):
    M, K = x.shape
    Nout = w_t.shape[1]
    TM = _pick_row_tile(M, block_rows)
    n_res = len(residuals)
    kern = functools.partial(_linear_res_kernel, n_res=n_res)
    return pl.pallas_call(
        kern,
        out_shape=jax.ShapeDtypeStruct((M, Nout), jnp.float32),
        grid=(pl.cdiv(M, TM),),
        in_specs=[pl.BlockSpec((TM, K), lambda i: (i, 0)),
                  pl.BlockSpec((K, Nout), lambda i: (0, 0)),
                  pl.BlockSpec((1, Nout), lambda i: (0, 0))]
                 + [pl.BlockSpec((TM, Nout), lambda i: (i, 0))] * n_res,
        out_specs=pl.BlockSpec((TM, Nout), lambda i: (i, 0)),
        compiler_params=pltpu.CompilerParams(
            dimension_semantics=("parallel",),
            vmem_limit_bytes=_VMEM_LIMIT_BYTES),
    )(x, w_t, bias.reshape(1, Nout), *residuals)


def pallas_attention(qkv, rel_h, rel_w, sel_h, sel_w, *, num_heads, H, W, scale):
    B, N, C3 = qkv.shape
    C = C3 // 3
    hd = C // num_heads
    kern = functools.partial(_attn_kernel, num_heads=num_heads, head_dim=hd,
                             H=H, W=W, scale=scale)
    return pl.pallas_call(
        kern,
        out_shape=jax.ShapeDtypeStruct((B, N, C), jnp.bfloat16),
        grid=(B,),
        in_specs=[pl.BlockSpec((1, N, C3), lambda b: (b, 0, 0)),
                  pl.BlockSpec((H, H, hd), lambda b: (0, 0, 0)),
                  pl.BlockSpec((W, W, hd), lambda b: (0, 0, 0)),
                  pl.BlockSpec((H, N), lambda b: (0, 0)),
                  pl.BlockSpec((W, N), lambda b: (0, 0))],
        out_specs=pl.BlockSpec((1, N, C), lambda b: (b, 0, 0)),
        scratch_shapes=[pltpu.VMEM((N, C), jnp.bfloat16)],
        compiler_params=pltpu.CompilerParams(
            dimension_semantics=("parallel",),
            vmem_limit_bytes=_VMEM_LIMIT_BYTES),
    )(qkv, rel_h, rel_w, sel_h, sel_w)


def pallas_pcm(x_tokens, w1_flat, b1, s1, t1, w2_flat, b2, *, H, W):
    # x_tokens: (B, N, Cin) f32; w1_flat (K*K*Cin, Cmid), w2_flat (K*K*Cmid, Cout)
    # are bf16, pre-flattened host-side in im2col (dh, dw, cin) order.
    B, N, Cin = x_tokens.shape
    Cmid = w1_flat.shape[1]
    Cout = w2_flat.shape[1]
    KK = w1_flat.shape[0] // Cin
    K = int(round(KK ** 0.5))
    # Output-channel tiling of conv2 keeps per-step w2 blocks small (VMEM /
    # double-buffering headroom, esp. v7x 64 MiB).  Pick an exact divisor.
    if Cout <= 512:
        TCout = Cout
    elif Cout % 256 == 0:
        TCout = 256
    elif Cout % 128 == 0:
        TCout = 128
    else:
        TCout = Cout
    Jc = Cout // TCout
    kern = functools.partial(_pcm_kernel, H=H, W=W, K=K)
    return pl.pallas_call(
        kern,
        out_shape=jax.ShapeDtypeStruct((B, N, Cout), jnp.float32),
        grid=(B, Jc),
        in_specs=[pl.BlockSpec((1, N, Cin), lambda b, j: (b, 0, 0)),
                  pl.BlockSpec((K * K * Cin, Cmid), lambda b, j: (0, 0)),
                  pl.BlockSpec((1, Cmid), lambda b, j: (0, 0)),
                  pl.BlockSpec((1, Cmid), lambda b, j: (0, 0)),
                  pl.BlockSpec((1, Cmid), lambda b, j: (0, 0)),
                  pl.BlockSpec((K * K * Cmid, TCout), lambda b, j: (0, j)),
                  pl.BlockSpec((1, TCout), lambda b, j: (0, j))],
        out_specs=pl.BlockSpec((1, N, TCout), lambda b, j: (b, 0, j)),
        scratch_shapes=[pltpu.VMEM((H + K - 1, W + K - 1, Cin), jnp.bfloat16),
                        pltpu.VMEM((H + K - 1, W + K - 1, Cmid), jnp.bfloat16)],
        compiler_params=pltpu.CompilerParams(
            dimension_semantics=("parallel", "arbitrary"),
            vmem_limit_bytes=_VMEM_LIMIT_BYTES),
    )(x_tokens, w1_flat, b1.reshape(1, Cmid), s1.reshape(1, Cmid),
      t1.reshape(1, Cmid), w2_flat, b2.reshape(1, Cout))


# --------------------------- one-time parameter prep ---------------------------

def prepare_params(p, H, W):
    # Hoists per-call weight transposes/casts, BN folding, rel-pos gathers and
    # the 0/1 selection matrices out of the steady-state forward path.
    bf16 = jnp.bfloat16
    f32 = jnp.float32
    C = p["ln1_w"].shape[0]
    K = p["w1"].shape[0]
    Cmid = p["w1"].shape[-1]
    N = H * W
    s1 = p["bn_gamma"] / jnp.sqrt(p["bn_var"] + 1e-5)
    t1 = p["bn_beta"] - p["bn_mean"] * s1
    dist_h = jnp.arange(H)[:, None] - jnp.arange(H)[None, :] + (H - 1)
    dist_w = jnp.arange(W)[:, None] - jnp.arange(W)[None, :] + (W - 1)
    return dict(
        ln1_w=p["ln1_w"], ln1_b=p["ln1_b"],
        ln2_w=p["ln2_w"], ln2_b=p["ln2_b"],
        w_qkv_t=p["w_qkv"].T.astype(bf16),
        qkv_zero_bias=jnp.zeros((3 * C,), f32),          # qkv_bias=False
        w_proj_t=p["w_proj"].T.astype(bf16), b_proj=p["b_proj"],
        w_fc1_t=p["w_fc1"].T.astype(bf16), b_fc1=p["b_fc1"],
        w_fc2_t=p["w_fc2"].T.astype(bf16), b_fc2=p["b_fc2"],
        w1_flat=p["w1"].astype(bf16).reshape(K * K * C, Cmid),
        b1=p["b1"], s1=s1, t1=t1,
        w2_flat=p["w2"].astype(bf16).reshape(K * K * Cmid, C),
        b2=p["b2"],
        rel_h=p["rel_pos_h"][dist_h].astype(bf16),       # (H, H, hd)
        rel_w=p["rel_pos_w"][dist_w].astype(bf16),       # (W, W, hd)
        sel_h=(jnp.arange(H)[:, None] == (jnp.arange(N) // W)[None, :]).astype(bf16),
        sel_w=(jnp.arange(W)[:, None] == (jnp.arange(N) % W)[None, :]).astype(bf16),
    )


# ------------------------------ NormalCell forward ----------------------------

def normal_cell_forward(x, pp, H, W, num_heads):
    B, N, C = x.shape
    hd = C // num_heads
    scale = hd ** -0.5
    x2d = x.reshape(B * N, C)

    # ----- PCM branch: conv3x3 -> BN(eval, folded) -> SiLU -> conv3x3 (fused)
    convX = pallas_pcm(x, pp["w1_flat"], pp["b1"], pp["s1"], pp["t1"],
                       pp["w2_flat"], pp["b2"], H=H, W=W)              # (B,N,C) f32

    # ----- attention branch: LN1 fused into the qkv matmul (qkv_bias=False);
    #       qkv emitted bf16 (intermediate-only tensor)
    qkv = pallas_ln_linear(x2d, pp["ln1_w"], pp["ln1_b"], pp["w_qkv_t"],
                           pp["qkv_zero_bias"],
                           out_dtype=jnp.bfloat16).reshape(B, N, 3 * C)

    ao = pallas_attention(qkv, pp["rel_h"], pp["rel_w"], pp["sel_h"], pp["sel_w"],
                          num_heads=num_heads, H=H, W=W, scale=scale)  # (B,N,C) bf16

    # ----- proj with both residual adds fused into the epilogue:
    #       x2 = (x + attn) + convX     (f32 residual carrier)
    x2 = pallas_linear_res(ao.reshape(B * N, C), pp["w_proj_t"], pp["b_proj"],
                           [x2d, convX.reshape(B * N, C)])

    # ----- MLP: LN2 fused into fc1(+GELU, bf16 out); residual fused into fc2
    h = pallas_ln_linear(x2, pp["ln2_w"], pp["ln2_b"], pp["w_fc1_t"], pp["b_fc1"],
                         act="gelu", out_dtype=jnp.bfloat16)
    out = pallas_linear_res(h, pp["w_fc2_t"], pp["b_fc2"], [x2])
    return out.reshape(B, N, C)


# ---------------------------- pure-JAX reference ------------------------------

def reference_forward(x, p, H, W, num_heads):
    B, N, C = x.shape
    hd = C // num_heads
    scale = hd ** -0.5

    x2d = x.reshape(B, H, W, C)

    def conv3(inp, w, b):
        return jax.lax.conv_general_dilated(
            inp, w, (1, 1), ((1, 1), (1, 1)),
            dimension_numbers=("NHWC", "HWIO", "NHWC")) + b

    y = conv3(x2d, p["w1"], p["b1"])
    y = (y - p["bn_mean"]) / jnp.sqrt(p["bn_var"] + 1e-5) * p["bn_gamma"] + p["bn_beta"]
    y = y * jax.nn.sigmoid(y)
    convX = conv3(y, p["w2"], p["b2"]).reshape(B, N, C)

    def ln(z, w, b):
        mu = z.mean(-1, keepdims=True)
        var = ((z - mu) ** 2).mean(-1, keepdims=True)
        return (z - mu) / jnp.sqrt(var + 1e-5) * w + b

    xn = ln(x, p["ln1_w"], p["ln1_b"])
    qkv = xn @ p["w_qkv"].T
    qkv = qkv.reshape(B, N, 3, num_heads, hd).transpose(2, 0, 3, 1, 4)
    q, k, v = qkv[0] * scale, qkv[1], qkv[2]
    attn = jnp.einsum("bhnd,bhmd->bhnm", q, k)
    dist_h = jnp.arange(H)[:, None] - jnp.arange(H)[None, :] + (H - 1)
    dist_w = jnp.arange(W)[:, None] - jnp.arange(W)[None, :] + (W - 1)
    Rh = p["rel_pos_h"][dist_h]
    Rw = p["rel_pos_w"][dist_w]
    r_q = q.reshape(B, num_heads, H, W, hd)
    rel_h = jnp.einsum("byhwc,hkc->byhwk", r_q, Rh)
    rel_w = jnp.einsum("byhwc,wkc->byhwk", r_q, Rw)
    attn = (attn.reshape(B, num_heads, H, W, H, W)
            + rel_h[:, :, :, :, :, None]
            + rel_w[:, :, :, :, None, :]).reshape(B, num_heads, N, N)
    attn = jax.nn.softmax(attn, axis=-1)
    o = jnp.einsum("bhnm,bhmd->bhnd", attn, v).transpose(0, 2, 1, 3).reshape(B, N, C)
    o = o @ p["w_proj"].T + p["b_proj"]
    x = x + o
    x = x + convX
    xn2 = ln(x, p["ln2_w"], p["ln2_b"])
    h = jax.nn.gelu(xn2 @ p["w_fc1"].T + p["b_fc1"], approximate=False)
    return x + (h @ p["w_fc2"].T + p["b_fc2"])


# -------------------------------- parameters ----------------------------------

def init_params(key, dim, num_heads, H, W, mlp_ratio=4.0, kernel=3):
    hd = dim // num_heads
    hidden = int(dim * mlp_ratio)
    pcm = int(dim * mlp_ratio)
    ks = jax.random.split(key, 21)

    def nrm(k, shape, s=0.05):
        return jax.random.normal(k, shape, jnp.float32) * s

    return dict(
        ln1_w=1.0 + nrm(ks[0], (dim,)), ln1_b=nrm(ks[1], (dim,)),
        w_qkv=nrm(ks[2], (3 * dim, dim)),                  # torch Linear layout
        rel_pos_h=nrm(ks[3], (2 * H - 1, hd), 0.5),
        rel_pos_w=nrm(ks[4], (2 * W - 1, hd), 0.5),
        w_proj=nrm(ks[5], (dim, dim)), b_proj=nrm(ks[6], (dim,)),
        ln2_w=1.0 + nrm(ks[7], (dim,)), ln2_b=nrm(ks[8], (dim,)),
        w_fc1=nrm(ks[9], (hidden, dim)), b_fc1=nrm(ks[10], (hidden,)),
        w_fc2=nrm(ks[11], (dim, hidden)), b_fc2=nrm(ks[12], (dim,)),
        w1=nrm(ks[13], (kernel, kernel, dim, pcm)), b1=nrm(ks[14], (pcm,)),
        bn_gamma=1.0 + nrm(ks[15], (pcm,)), bn_beta=nrm(ks[16], (pcm,)),
        bn_mean=nrm(ks[17], (pcm,)),
        bn_var=jax.random.uniform(ks[18], (pcm,), jnp.float32, 0.5, 1.5),
        w2=nrm(ks[19], (kernel, kernel, pcm, dim)), b2=nrm(ks[20], (dim,)),
    )


# ------------------------------------ main -------------------------------------

if __name__ == "__main__":
    B, H, W, C = 2, 4, 4, 32
    num_heads = 4          # head_dim = 8 ; window_size = (H, W) = (4, 4)
    N = H * W

    key = jax.random.PRNGKey(0)
    kx, kp = jax.random.split(key)
    x = jax.random.normal(kx, (B, N, C), jnp.float32)
    params = init_params(kp, C, num_heads, H, W)

    # one-time parameter preparation (weight transpose/cast, BN fold, rel-pos
    # gather, selection matrices) — outside the steady-state forward path
    prepped = prepare_params(params, H, W)

    fwd = jax.jit(functools.partial(normal_cell_forward,
                                    H=H, W=W, num_heads=num_heads))
    out = jax.block_until_ready(fwd(x, prepped))

    ref = reference_forward(x, params, H, W, num_heads)
    err = float(jnp.max(jnp.abs(out - ref)))
    # bf16 MXU operands/intermediates (f32 accumulation), tanh-form GELU and the
    # approx-reciprocal softmax bound the error well within atol/rtol = 2e-2.
    assert bool(jnp.allclose(out, ref, atol=2e-2, rtol=2e-2)), \
        f"max abs err too large: {err}"
    print("KERNEL_OK")
</pallas_src>

<mosaic_0001>
module attributes {stable_mosaic.version = 11 : i64} {
  func.func @_ln_linear_kernel(%arg0: i32, %arg1: memref<16x32xf32, #tpu.memory_space<vmem>>, %arg2: memref<1x32xf32, #tpu.memory_space<vmem>>, %arg3: memref<1x32xf32, #tpu.memory_space<vmem>>, %arg4: memref<32x96xbf16, #tpu.memory_space<vmem>>, %arg5: memref<1x96xf32, #tpu.memory_space<vmem>>, %arg6: memref<16x96xbf16, #tpu.memory_space<vmem>>) attributes {dimension_semantics = [#tpu.dimension_semantics<parallel>], iteration_bounds = array<i64: 2>, scalar_prefetch = 0 : i64, scratch_operands = 0 : i64, tpu.core_type = #tpu.core_type<tc>, window_params = [{transform_indices = @transform_0, window_bounds = array<i64: 16, 32>}, {pipeline_mode = #tpu.pipeline_mode<synchronous>, transform_indices = @transform_1, window_bounds = array<i64: 1, 32>}, {pipeline_mode = #tpu.pipeline_mode<synchronous>, transform_indices = @transform_2, window_bounds = array<i64: 1, 32>}, {pipeline_mode = #tpu.pipeline_mode<synchronous>, transform_indices = @transform_3, window_bounds = array<i64: 32, 96>}, {pipeline_mode = #tpu.pipeline_mode<synchronous>, transform_indices = @transform_4, window_bounds = array<i64: 1, 96>}, {transform_indices = @transform_5, window_bounds = array<i64: 16, 96>}]} {
    %c0 = arith.constant 0 : index
    %c0_0 = arith.constant 0 : index
    %0 = vector.load %arg1[%c0, %c0_0] : memref<16x32xf32, #tpu.memory_space<vmem>>, vector<16x32xf32>
    %c0_1 = arith.constant 0 : index
    %c0_2 = arith.constant 0 : index
    %1 = vector.load %arg2[%c0_1, %c0_2] : memref<1x32xf32, #tpu.memory_space<vmem>>, vector<1x32xf32>
    %c0_3 = arith.constant 0 : index
    %c0_4 = arith.constant 0 : index
    %2 = vector.load %arg3[%c0_3, %c0_4] : memref<1x32xf32, #tpu.memory_space<vmem>>, vector<1x32xf32>
    %cst = arith.constant dense<0.000000e+00> : vector<16xf32>
    %3 = vector.multi_reduction <add>, %0, %cst [1] : vector<16x32xf32> to vector<16xf32>
    %4 = vector.shape_cast %3 : vector<16xf32> to vector<16x1xf32>
    %cst_5 = arith.constant 3.200000e+01 : f32
    %5 = vector.broadcast %cst_5 : f32 to vector<16x1xf32>
    %6 = arith.divf %4, %5 : vector<16x1xf32>
    %7 = vector.broadcast %6 : vector<16x1xf32> to vector<16x32xf32>
    %8 = arith.subf %0, %7 : vector<16x32xf32>
    %9 = arith.mulf %8, %8 : vector<16x32xf32>
    %cst_6 = arith.constant dense<0.000000e+00> : vector<16xf32>
    %10 = vector.multi_reduction <add>, %9, %cst_6 [1] : vector<16x32xf32> to vector<16xf32>
    %11 = vector.shape_cast %10 : vector<16xf32> to vector<16x1xf32>
    %cst_7 = arith.constant 3.200000e+01 : f32
    %12 = vector.broadcast %cst_7 : f32 to vector<16x1xf32>
    %13 = arith.divf %11, %12 : vector<16x1xf32>
    %cst_8 = arith.constant 9.99999974E-6 : f32
    %14 = vector.broadcast %cst_8 : f32 to vector<16x1xf32>
    %15 = arith.addf %13, %14 : vector<16x1xf32>
    %16 = math.rsqrt %15 : vector<16x1xf32>
    %17 = vector.broadcast %16 : vector<16x1xf32> to vector<16x32xf32>
    %18 = arith.mulf %8, %17 : vector<16x32xf32>
    %19 = vector.broadcast %1 : vector<1x32xf32> to vector<16x32xf32>
    %20 = arith.mulf %18, %19 : vector<16x32xf32>
    %21 = vector.broadcast %2 : vector<1x32xf32> to vector<16x32xf32>
    %22 = arith.addf %20, %21 : vector<16x32xf32>
    %23 = arith.truncf %22 : vector<16x32xf32> to vector<16x32xbf16>
    %c0_9 = arith.constant 0 : index
    %c0_10 = arith.constant 0 : index
    %24 = vector.load %arg4[%c0_9, %c0_10] : memref<32x96xbf16, #tpu.memory_space<vmem>>, vector<32x96xbf16>
    %cst_11 = arith.constant dense<0.000000e+00> : vector<16x96xf32>
    %25 = tpu.matmul %23, %24, %cst_11 {dimension_numbers = #tpu.dot_dimension_numbers<[1], [0], [0], [1], [0, 0, 1, 1], [], []>} : vector<16x32xbf16>, vector<32x96xbf16>, vector<16x96xf32> -> vector<16x96xf32>
    %c0_12 = arith.constant 0 : index
    %c0_13 = arith.constant 0 : index
    %26 = vector.load %arg5[%c0_12, %c0_13] : memref<1x96xf32, #tpu.memory_space<vmem>>, vector<1x96xf32>
    %27 = vector.broadcast %26 : vector<1x96xf32> to vector<16x96xf32>
    %28 = arith.addf %25, %27 : vector<16x96xf32>
    %29 = arith.truncf %28 : vector<16x96xf32> to vector<16x96xbf16>
    %c0_14 = arith.constant 0 : index
    %c0_15 = arith.constant 0 : index
    %30 = vector.load %arg6[%c0_14, %c0_15] : memref<16x96xbf16, #tpu.memory_space<vmem>>, vector<16x96xbf16>
    tpu.vector_store %arg6[%c0_14, %c0_15], %29 {strides = array<i32>} : memref<16x96xbf16, #tpu.memory_space<vmem>>, vector<16x96xbf16>,
    return
  }
  func.func @transform_0(%arg0: i32) -> (i32, i32) {
    %c0_i32 = arith.constant 0 : i32
    %c0_i32_0 = arith.constant 0 : i32
    return %arg0, %c0_i32 : i32, i32
  }
  func.func @transform_1(%arg0: i32) -> (i32, i32) {
    %c0_i32 = arith.constant 0 : i32
    %c0_i32_0 = arith.constant 0 : i32
    %c0_i32_1 = arith.constant 0 : i32
    return %c0_i32, %c0_i32_0 : i32, i32
  }
  func.func @transform_2(%arg0: i32) -> (i32, i32) {
    %c0_i32 = arith.constant 0 : i32
    %c0_i32_0 = arith.constant 0 : i32
    %c0_i32_1 = arith.constant 0 : i32
    return %c0_i32, %c0_i32_0 : i32, i32
  }
  func.func @transform_3(%arg0: i32) -> (i32, i32) {
    %c0_i32 = arith.constant 0 : i32
    %c0_i32_0 = arith.constant 0 : i32
    %c0_i32_1 = arith.constant 0 : i32
    return %c0_i32, %c0_i32_0 : i32, i32
  }
  func.func @transform_4(%arg0: i32) -> (i32, i32) {
    %c0_i32 = arith.constant 0 : i32
    %c0_i32_0 = arith.constant 0 : i32
    %c0_i32_1 = arith.constant 0 : i32
    return %c0_i32, %c0_i32_0 : i32, i32
  }
  func.func @transform_5(%arg0: i32) -> (i32, i32) {
    %c0_i32 = arith.constant 0 : i32
    %c0_i32_0 = arith.constant 0 : i32
    return %arg0, %c0_i32 : i32, i32
  }
}

module attributes {stable_mosaic.version = 11 : i64} {
  func.func @_attn_kernel(%arg0: i32, %arg1: memref<1x16x96xbf16, #tpu.memory_space<vmem>>, %arg2: memref<4x4x8xbf16, #tpu.memory_space<vmem>>, %arg3: memref<4x4x8xbf16, #tpu.memory_space<vmem>>, %arg4: memref<4x16xbf16, #tpu.memory_space<vmem>>, %arg5: memref<4x16xbf16, #tpu.memory_space<vmem>>, %arg6: memref<1x16x32xbf16, #tpu.memory_space<vmem>>, %arg7: memref<16x32xbf16, #tpu.memory_space<vmem>>) attributes {dimension_semantics = [#tpu.dimension_semantics<parallel>], iteration_bounds = array<i64: 2>, scalar_prefetch = 0 : i64, scratch_operands = 1 : i64, tpu.core_type = #tpu.core_type<tc>, window_params = [{transform_indices = @transform_0, window_bounds = array<i64: 1, 16, 96>}, {pipeline_mode = #tpu.pipeline_mode<synchronous>, transform_indices = @transform_1, window_bounds = array<i64: 4, 4, 8>}, {pipeline_mode = #tpu.pipeline_mode<synchronous>, transform_indices = @transform_2, window_bounds = array<i64: 4, 4, 8>}, {pipeline_mode = #tpu.pipeline_mode<synchronous>, transform_indices = @transform_3, window_bounds = array<i64: 4, 16>}, {pipeline_mode = #tpu.pipeline_mode<synchronous>, transform_indices = @transform_4, window_bounds = array<i64: 4, 16>}, {transform_indices = @transform_5, window_bounds = array<i64: 1, 16, 32>}]} {
    %c0 = arith.constant 0 : index
    %c0_0 = arith.constant 0 : index
    %c0_1 = arith.constant 0 : index
    %0 = vector.load %arg2[%c0, %c0_0, %c0_1] : memref<4x4x8xbf16, #tpu.memory_space<vmem>>, vector<4x4x8xbf16>
    %c0_2 = arith.constant 0 : index
    %c0_3 = arith.constant 0 : index
    %c0_4 = arith.constant 0 : index
    %1 = vector.load %arg3[%c0_2, %c0_3, %c0_4] : memref<4x4x8xbf16, #tpu.memory_space<vmem>>, vector<4x4x8xbf16>
    %c0_5 = arith.constant 0 : index
    %c0_6 = arith.constant 0 : index
    %2 = vector.load %arg4[%c0_5, %c0_6] : memref<4x16xbf16, #tpu.memory_space<vmem>>, vector<4x16xbf16>
    %c0_7 = arith.constant 0 : index
    %c0_8 = arith.constant 0 : index
    %3 = vector.load %arg5[%c0_7, %c0_8] : memref<4x16xbf16, #tpu.memory_space<vmem>>, vector<4x16xbf16>
    %c0_9 = arith.constant 0 : index
    %c0_10 = arith.constant 0 : index
    %c0_11 = arith.constant 0 : index
    %4 = vector.load %arg1[%c0_9, %c0_10, %c0_11] : memref<1x16x96xbf16, #tpu.memory_space<vmem>>, vector<1x16x8xbf16>
    %5 = vector.shape_cast %4 : vector<1x16x8xbf16> to vector<16x8xbf16>
    %c0_12 = arith.constant 0 : index
    %c0_13 = arith.constant 0 : index
    %c32 = arith.constant 32 : index
    %6 = vector.load %arg1[%c0_12, %c0_13, %c32] : memref<1x16x96xbf16, #tpu.memory_space<vmem>>, vector<1x16x8xbf16>
    %7 = vector.shape_cast %6 : vector<1x16x8xbf16> to vector<16x8xbf16>
    %c0_14 = arith.constant 0 : index
    %c0_15 = arith.constant 0 : index
    %c64 = arith.constant 64 : index
    %8 = vector.load %arg1[%c0_14, %c0_15, %c64] : memref<1x16x96xbf16, #tpu.memory_space<vmem>>, vector<1x16x8xbf16>
    %9 = vector.shape_cast %8 : vector<1x16x8xbf16> to vector<16x8xbf16>
    %cst = arith.constant dense<0.000000e+00> : vector<16x16xf32>
    %10 = tpu.matmul %5, %7, %cst {dimension_numbers = #tpu.dot_dimension_numbers<[1], [1], [0], [0], [0, 0, 1, 0], [], []>} : vector<16x8xbf16>, vector<16x8xbf16>, vector<16x16xf32> -> vector<16x16xf32>
    %11 = vector.shape_cast %5 : vector<16x8xbf16> to vector<4x4x8xbf16>
    "tpu.trace_start"() <{level = 10 : i32, message = "hwc,hkc->hwk"}> : () -> ()
    %cst_16 = arith.constant dense<0.000000e+00> : vector<4x4x4xf32>
    %12 = tpu.matmul %11, %0, %cst_16 {dimension_numbers = #tpu.dot_dimension_numbers<[2], [2], [1], [1], [0, 0, 0, 1, 1, 1], [0], [0]>} : vector<4x4x8xbf16>, vector<4x4x8xbf16>, vector<4x4x4xf32> -> vector<4x4x4xf32>
    "tpu.trace_stop"() : () -> ()
    %13 = vector.shape_cast %12 : vector<4x4x4xf32> to vector<16x4xf32>
    "tpu.trace_start"() <{level = 10 : i32, message = "hwc,wkc->hwk"}> : () -> ()
    %cst_17 = arith.constant dense<0.000000e+00> : vector<4x4x4xf32>
    %14 = tpu.matmul %1, %11, %cst_17 {dimension_numbers = #tpu.dot_dimension_numbers<[2], [2], [1], [0], [0, 0, 0, 1, 1, 0], [0], [1]>} : vector<4x4x8xbf16>, vector<4x4x8xbf16>, vector<4x4x4xf32> -> vector<4x4x4xf32>
    %15 = tpu.transpose %14, [2, 0, 1] : vector<4x4x4xf32> -> vector<4x4x4xf32>
    "tpu.trace_stop"() : () -> ()
    %16 = vector.shape_cast %15 : vector<4x4x4xf32> to vector<16x4xf32>
    %17 = arith.truncf %13 : vector<16x4xf32> to vector<16x4xbf16>
    %cst_18 = arith.constant dense<0.000000e+00> : vector<16x16xf32>
    %18 = tpu.matmul %17, %2, %cst_18 {dimension_numbers = #tpu.dot_dimension_numbers<[1], [0], [0], [1], [0, 0, 1, 1], [], []>} : vector<16x4xbf16>, vector<4x16xbf16>, vector<16x16xf32> -> vector<16x16xf32>
    %19 = arith.addf %10, %18 : vector<16x16xf32>
    %20 = arith.truncf %16 : vector<16x4xf32> to vector<16x4xbf16>
    %cst_19 = arith.constant dense<0.000000e+00> : vector<16x16xf32>
    %21 = tpu.matmul %20, %3, %cst_19 {dimension_numbers = #tpu.dot_dimension_numbers<[1], [0], [0], [1], [0, 0, 1, 1], [], []>} : vector<16x4xbf16>, vector<4x16xbf16>, vector<16x16xf32> -> vector<16x16xf32>
    %22 = arith.addf %19, %21 : vector<16x16xf32>
    %cst_20 = arith.constant 0.353553385 : f32
    %23 = vector.broadcast %cst_20 : f32 to vector<16x16xf32>
    %24 = arith.mulf %22, %23 : vector<16x16xf32>
    %cst_21 = arith.constant dense<0xFF800000> : vector<16xf32>
    %25 = vector.multi_reduction <maximumf>, %24, %cst_21 [1] : vector<16x16xf32> to vector<16xf32>
    %26 = vector.shape_cast %25 : vector<16xf32> to vector<16x1xf32>
    %27 = vector.broadcast %26 : vector<16x1xf32> to vector<16x16xf32>
    %28 = arith.subf %24, %27 : vector<16x16xf32>
    %29 = math.exp %28 : vector<16x16xf32>
    %cst_22 = arith.constant dense<0.000000e+00> : vector<16xf32>
    %30 = vector.multi_reduction <add>, %29, %cst_22 [1] : vector<16x16xf32> to vector<16xf32>
    %31 = vector.shape_cast %30 : vector<16xf32> to vector<16x1xf32>
    %32 = tpu.reciprocal %31 {approx = true} : vector<16x1xf32> -> vector<16x1xf32>
    %33 = vector.broadcast %32 : vector<16x1xf32> to vector<16x16xf32>
    %34 = arith.mulf %29, %33 : vector<16x16xf32>
    %35 = arith.truncf %34 : vector<16x16xf32> to vector<16x16xbf16>
    %cst_23 = arith.constant dense<0.000000e+00> : vector<16x8xf32>
    %36 = tpu.matmul %35, %9, %cst_23 {dimension_numbers = #tpu.dot_dimension_numbers<[1], [0], [0], [1], [0, 0, 1, 1], [], []>} : vector<16x16xbf16>, vector<16x8xbf16>, vector<16x8xf32> -> vector<16x8xf32>
    %37 = arith.truncf %36 : vector<16x8xf32> to vector<16x8xbf16>
    %c0_24 = arith.constant 0 : index
    %c0_25 = arith.constant 0 : index
    %38 = vector.load %arg7[%c0_24, %c0_25] : memref<16x32xbf16, #tpu.memory_space<vmem>>, vector<16x8xbf16>
    tpu.vector_store %arg7[%c0_24, %c0_25], %37 {strides = array<i32>} : memref<16x32xbf16, #tpu.memory_space<vmem>>, vector<16x8xbf16>,
    %c0_26 = arith.constant 0 : index
    %c0_27 = arith.constant 0 : index
    %c8 = arith.constant 8 : index
    %39 = vector.load %arg1[%c0_26, %c0_27, %c8] : memref<1x16x96xbf16, #tpu.memory_space<vmem>>, vector<1x16x8xbf16>
    %40 = vector.shape_cast %39 : vector<1x16x8xbf16> to vector<16x8xbf16>
    %c0_28 = arith.constant 0 : index
    %c0_29 = arith.constant 0 : index
    %c40 = arith.constant 40 : index
    %41 = vector.load %arg1[%c0_28, %c0_29, %c40] : memref<1x16x96xbf16, #tpu.memory_space<vmem>>, vector<1x16x8xbf16>
    %42 = vector.shape_cast %41 : vector<1x16x8xbf16> to vector<16x8xbf16>
    %c0_30 = arith.constant 0 : index
    %c0_31 = arith.constant 0 : index
    %c72 = arith.constant 72 : index
    %43 = vector.load %arg1[%c0_30, %c0_31, %c72] : memref<1x16x96xbf16, #tpu.memory_space<vmem>>, vector<1x16x8xbf16>
    %44 = vector.shape_cast %43 : vector<1x16x8xbf16> to vector<16x8xbf16>
    %cst_32 = arith.constant dense<0.000000e+00> : vector<16x16xf32>
    %45 = tpu.matmul %40, %42, %cst_32 {dimension_numbers = #tpu.dot_dimension_numbers<[1], [1], [0], [0], [0, 0, 1, 0], [], []>} : vector<16x8xbf16>, vector<16x8xbf16>, vector<16x16xf32> -> vector<16x16xf32>
    %46 = vector.shape_cast %40 : vector<16x8xbf16> to vector<4x4x8xbf16>
    "tpu.trace_start"() <{level = 10 : i32, message = "hwc,hkc->hwk"}> : () -> ()
    %cst_33 = arith.constant dense<0.000000e+00> : vector<4x4x4xf32>
    %47 = tpu.matmul %46, %0, %cst_33 {dimension_numbers = #tpu.dot_dimension_numbers<[2], [2], [1], [1], [0, 0, 0, 1, 1, 1], [0], [0]>} : vector<4x4x8xbf16>, vector<4x4x8xbf16>, vector<4x4x4xf32> -> vector<4x4x4xf32>
    "tpu.trace_stop"() : () -> ()
    %48 = vector.shape_cast %47 : vector<4x4x4xf32> to vector<16x4xf32>
    "tpu.trace_start"() <{level = 10 : i32, message = "hwc,wkc->hwk"}> : () -> ()
    %cst_34 = arith.constant dense<0.000000e+00> : vector<4x4x4xf32>
    %49 = tpu.matmul %1, %46, %cst_34 {dimension_numbers = #tpu.dot_dimension_numbers<[2], [2], [1], [0], [0, 0, 0, 1, 1, 0], [0], [1]>} : vector<4x4x8xbf16>, vector<4x4x8xbf16>, vector<4x4x4xf32> -> vector<4x4x4xf32>
    %50 = tpu.transpose %49, [2, 0, 1] : vector<4x4x4xf32> -> vector<4x4x4xf32>
    "tpu.trace_stop"() : () -> ()
    %51 = vector.shape_cast %50 : vector<4x4x4xf32> to vector<16x4xf32>
    %52 = arith.truncf %48 : vector<16x4xf32> to vector<16x4xbf16>
    %cst_35 = arith.constant dense<0.000000e+00> : vector<16x16xf32>
    %53 = tpu.matmul %52, %2, %cst_35 {dimension_numbers = #tpu.dot_dimension_numbers<[1], [0], [0], [1], [0, 0, 1, 1], [], []>} : vector<16x4xbf16>, vector<4x16xbf16>, vector<16x16xf32> -> vector<16x16xf32>
    %54 = arith.addf %45, %53 : vector<16x16xf32>
    %55 = arith.truncf %51 : vector<16x4xf32> to vector<16x4xbf16>
    %cst_36 = arith.constant dense<0.000000e+00> : vector<16x16xf32>
    %56 = tpu.matmul %55, %3, %cst_36 {dimension_numbers = #tpu.dot_dimension_numbers<[1], [0], [0], [1], [0, 0, 1, 1], [], []>} : vector<16x4xbf16>, vector<4x16xbf16>, vector<16x16xf32> -> vector<16x16xf32>
    %57 = arith.addf %54, %56 : vector<16x16xf32>
    %cst_37 = arith.constant 0.353553385 : f32
    %58 = vector.broadcast %cst_37 : f32 to vector<16x16xf32>
    %59 = arith.mulf %57, %58 : vector<16x16xf32>
    %cst_38 = arith.constant dense<0xFF800000> : vector<16xf32>
    %60 = vector.multi_reduction <maximumf>, %59, %cst_38 [1] : vector<16x16xf32> to vector<16xf32>
    %61 = vector.shape_cast %60 : vector<16xf32> to vector<16x1xf32>
    %62 = vector.broadcast %61 : vector<16x1xf32> to vector<16x16xf32>
    %63 = arith.subf %59, %62 : vector<16x16xf32>
    %64 = math.exp %63 : vector<16x16xf32>
    %cst_39 = arith.constant dense<0.000000e+00> : vector<16xf32>
    %65 = vector.multi_reduction <add>, %64, %cst_39 [1] : vector<16x16xf32> to vector<16xf32>
    %66 = vector.shape_cast %65 : vector<16xf32> to vector<16x1xf32>
    %67 = tpu.reciprocal %66 {approx = true} : vector<16x1xf32> -> vector<16x1xf32>
    %68 = vector.broadcast %67 : vector<16x1xf32> to vector<16x16xf32>
    %69 = arith.mulf %64, %68 : vector<16x16xf32>
    %70 = arith.truncf %69 : vector<16x16xf32> to vector<16x16xbf16>
    %cst_40 = arith.constant dense<0.000000e+00> : vector<16x8xf32>
    %71 = tpu.matmul %70, %44, %cst_40 {dimension_numbers = #tpu.dot_dimension_numbers<[1], [0], [0], [1], [0, 0, 1, 1], [], []>} : vector<16x16xbf16>, vector<16x8xbf16>, vector<16x8xf32> -> vector<16x8xf32>
    %72 = arith.truncf %71 : vector<16x8xf32> to vector<16x8xbf16>
    %c0_41 = arith.constant 0 : index
    %c8_42 = arith.constant 8 : index
    %73 = vector.load %arg7[%c0_41, %c8_42] : memref<16x32xbf16, #tpu.memory_space<vmem>>, vector<16x8xbf16>
    tpu.vector_store %arg7[%c0_41, %c8_42], %72 {strides = array<i32>} : memref<16x32xbf16, #tpu.memory_space<vmem>>, vector<16x8xbf16>,
    %c0_43 = arith.constant 0 : index
    %c0_44 = arith.constant 0 : index
    %c16 = arith.constant 16 : index
    %74 = vector.load %arg1[%c0_43, %c0_44, %c16] : memref<1x16x96xbf16, #tpu.memory_space<vmem>>, vector<1x16x8xbf16>
    %75 = vector.shape_cast %74 : vector<1x16x8xbf16> to vector<16x8xbf16>
    %c0_45 = arith.constant 0 : index
    %c0_46 = arith.constant 0 : index
    %c48 = arith.constant 48 : index
    %76 = vector.load %arg1[%c0_45, %c0_46, %c48] : memref<1x16x96xbf16, #tpu.memory_space<vmem>>, vector<1x16x8xbf16>
    %77 = vector.shape_cast %76 : vector<1x16x8xbf16> to vector<16x8xbf16>
    %c0_47 = arith.constant 0 : index
    %c0_48 = arith.constant 0 : index
    %c80 = arith.constant 80 : index
    %78 = vector.load %arg1[%c0_47, %c0_48, %c80] : memref<1x16x96xbf16, #tpu.memory_space<vmem>>, vector<1x16x8xbf16>
    %79 = vector.shape_cast %78 : vector<1x16x8xbf16> to vector<16x8xbf16>
    %cst_49 = arith.constant dense<0.000000e+00> : vector<16x16xf32>
    %80 = tpu.matmul %75, %77, %cst_49 {dimension_numbers = #tpu.dot_dimension_numbers<[1], [1], [0], [0], [0, 0, 1, 0], [], []>} : vector<16x8xbf16>, vector<16x8xbf16>, vector<16x16xf32> -> vector<16x16xf32>
    %81 = vector.shape_cast %75 : vector<16x8xbf16> to vector<4x4x8xbf16>
    "tpu.trace_start"() <{level = 10 : i32, message = "hwc,hkc->hwk"}> : () -> ()
    %cst_50 = arith.constant dense<0.000000e+00> : vector<4x4x4xf32>
    %82 = tpu.matmul %81, %0, %cst_50 {dimension_numbers = #tpu.dot_dimension_numbers<[2], [2], [1], [1], [0, 0, 0, 1, 1, 1], [0], [0]>} : vector<4x4x8xbf16>, vector<4x4x8xbf16>, vector<4x4x4xf32> -> vector<4x4x4xf32>
    "tpu.trace_stop"() : () -> ()
    %83 = vector.shape_cast %82 : vector<4x4x4xf32> to vector<16x4xf32>
    "tpu.trace_start"() <{level = 10 : i32, message = "hwc,wkc->hwk"}> : () -> ()
    %cst_51 = arith.constant dense<0.000000e+00> : vector<4x4x4xf32>
    %84 = tpu.matmul %1, %81, %cst_51 {dimension_numbers = #tpu.dot_dimension_numbers<[2], [2], [1], [0], [0, 0, 0, 1, 1, 0], [0], [1]>} : vector<4x4x8xbf16>, vector<4x4x8xbf16>, vector<4x4x4xf32> -> vector<4x4x4xf32>
    %85 = tpu.transpose %84, [2, 0, 1] : vector<4x4x4xf32> -> vector<4x4x4xf32>
    "tpu.trace_stop"() : () -> ()
    %86 = vector.shape_cast %85 : vector<4x4x4xf32> to vector<16x4xf32>
    %87 = arith.truncf %83 : vector<16x4xf32> to vector<16x4xbf16>
    %cst_52 = arith.constant dense<0.000000e+00> : vector<16x16xf32>
    %88 = tpu.matmul %87, %2, %cst_52 {dimension_numbers = #tpu.dot_dimension_numbers<[1], [0], [0], [1], [0, 0, 1, 1], [], []>} : vector<16x4xbf16>, vector<4x16xbf16>, vector<16x16xf32> -> vector<16x16xf32>
    %89 = arith.addf %80, %88 : vector<16x16xf32>
    %90 = arith.truncf %86 : vector<16x4xf32> to vector<16x4xbf16>
    %cst_53 = arith.constant dense<0.000000e+00> : vector<16x16xf32>
    %91 = tpu.matmul %90, %3, %cst_53 {dimension_numbers = #tpu.dot_dimension_numbers<[1], [0], [0], [1], [0, 0, 1, 1], [], []>} : vector<16x4xbf16>, vector<4x16xbf16>, vector<16x16xf32> -> vector<16x16xf32>
    %92 = arith.addf %89, %91 : vector<16x16xf32>
    %cst_54 = arith.constant 0.353553385 : f32
    %93 = vector.broadcast %cst_54 : f32 to vector<16x16xf32>
    %94 = arith.mulf %92, %93 : vector<16x16xf32>
    %cst_55 = arith.constant dense<0xFF800000> : vector<16xf32>
    %95 = vector.multi_reduction <maximumf>, %94, %cst_55 [1] : vector<16x16xf32> to vector<16xf32>
    %96 = vector.shape_cast %95 : vector<16xf32> to vector<16x1xf32>
    %97 = vector.broadcast %96 : vector<16x1xf32> to vector<16x16xf32>
    %98 = arith.subf %94, %97 : vector<16x16xf32>
    %99 = math.exp %98 : vector<16x16xf32>
    %cst_56 = arith.constant dense<0.000000e+00> : vector<16xf32>
    %100 = vector.multi_reduction <add>, %99, %cst_56 [1] : vector<16x16xf32> to vector<16xf32>
    %101 = vector.shape_cast %100 : vector<16xf32> to vector<16x1xf32>
    %102 = tpu.reciprocal %101 {approx = true} : vector<16x1xf32> -> vector<16x1xf32>
    %103 = vector.broadcast %102 : vector<16x1xf32> to vector<16x16xf32>
    %104 = arith.mulf %99, %103 : vector<16x16xf32>
    %105 = arith.truncf %104 : vector<16x16xf32> to vector<16x16xbf16>
    %cst_57 = arith.constant dense<0.000000e+00> : vector<16x8xf32>
    %106 = tpu.matmul %105, %79, %cst_57 {dimension_numbers = #tpu.dot_dimension_numbers<[1], [0], [0], [1], [0, 0, 1, 1], [], []>} : vector<16x16xbf16>, vector<16x8xbf16>, vector<16x8xf32> -> vector<16x8xf32>
    %107 = arith.truncf %106 : vector<16x8xf32> to vector<16x8xbf16>
    %c0_58 = arith.constant 0 : index
    %c16_59 = arith.constant 16 : index
    %108 = vector.load %arg7[%c0_58, %c16_59] : memref<16x32xbf16, #tpu.memory_space<vmem>>, vector<16x8xbf16>
    tpu.vector_store %arg7[%c0_58, %c16_59], %107 {strides = array<i32>} : memref<16x32xbf16, #tpu.memory_space<vmem>>, vector<16x8xbf16>,
    %c0_60 = arith.constant 0 : index
    %c0_61 = arith.constant 0 : index
    %c24 = arith.constant 24 : index
    %109 = vector.load %arg1[%c0_60, %c0_61, %c24] : memref<1x16x96xbf16, #tpu.memory_space<vmem>>, vector<1x16x8xbf16>
    %110 = vector.shape_cast %109 : vector<1x16x8xbf16> to vector<16x8xbf16>
    %c0_62 = arith.constant 0 : index
    %c0_63 = arith.constant 0 : index
    %c56 = arith.constant 56 : index
    %111 = vector.load %arg1[%c0_62, %c0_63, %c56] : memref<1x16x96xbf16, #tpu.memory_space<vmem>>, vector<1x16x8xbf16>
    %112 = vector.shape_cast %111 : vector<1x16x8xbf16> to vector<16x8xbf16>
    %c0_64 = arith.constant 0 : index
    %c0_65 = arith.constant 0 : index
    %c88 = arith.constant 88 : index
    %113 = vector.load %arg1[%c0_64, %c0_65, %c88] : memref<1x16x96xbf16, #tpu.memory_space<vmem>>, vector<1x16x8xbf16>
    %114 = vector.shape_cast %113 : vector<1x16x8xbf16> to vector<16x8xbf16>
    %cst_66 = arith.constant dense<0.000000e+00> : vector<16x16xf32>
    %115 = tpu.matmul %110, %112, %cst_66 {dimension_numbers = #tpu.dot_dimension_numbers<[1], [1], [0], [0], [0, 0, 1, 0], [], []>} : vector<16x8xbf16>, vector<16x8xbf16>, vector<16x16xf32> -> vector<16x16xf32>
    %116 = vector.shape_cast %110 : vector<16x8xbf16> to vector<4x4x8xbf16>
    "tpu.trace_start"() <{level = 10 : i32, message = "hwc,hkc->hwk"}> : () -> ()
    %cst_67 = arith.constant dense<0.000000e+00> : vector<4x4x4xf32>
    %117 = tpu.matmul %116, %0, %cst_67 {dimension_numbers = #tpu.dot_dimension_numbers<[2], [2], [1], [1], [0, 0, 0, 1, 1, 1], [0], [0]>} : vector<4x4x8xbf16>, vector<4x4x8xbf16>, vector<4x4x4xf32> -> vector<4x4x4xf32>
    "tpu.trace_stop"() : () -> ()
    %118 = vector.shape_cast %117 : vector<4x4x4xf32> to vector<16x4xf32>
    "tpu.trace_start"() <{level = 10 : i32, message = "hwc,wkc->hwk"}> : () -> ()
    %cst_68 = arith.constant dense<0.000000e+00> : vector<4x4x4xf32>
    %119 = tpu.matmul %1, %116, %cst_68 {dimension_numbers = #tpu.dot_dimension_numbers<[2], [2], [1], [0], [0, 0, 0, 1, 1, 0], [0], [1]>} : vector<4x4x8xbf16>, vector<4x4x8xbf16>, vector<4x4x4xf32> -> vector<4x4x4xf32>
    %120 = tpu.transpose %119, [2, 0, 1] : vector<4x4x4xf32> -> vector<4x4x4xf32>
    "tpu.trace_stop"() : () -> ()
    %121 = vector.shape_cast %120 : vector<4x4x4xf32> to vector<16x4xf32>
    %122 = arith.truncf %118 : vector<16x4xf32> to vector<16x4xbf16>
    %cst_69 = arith.constant dense<0.000000e+00> : vector<16x16xf32>
    %123 = tpu.matmul %122, %2, %cst_69 {dimension_numbers = #tpu.dot_dimension_numbers<[1], [0], [0], [1], [0, 0, 1, 1], [], []>} : vector<16x4xbf16>, vector<4x16xbf16>, vector<16x16xf32> -> vector<16x16xf32>
    %124 = arith.addf %115, %123 : vector<16x16xf32>
    %125 = arith.truncf %121 : vector<16x4xf32> to vector<16x4xbf16>
    %cst_70 = arith.constant dense<0.000000e+00> : vector<16x16xf32>
    %126 = tpu.matmul %125, %3, %cst_70 {dimension_numbers = #tpu.dot_dimension_numbers<[1], [0], [0], [1], [0, 0, 1, 1], [], []>} : vector<16x4xbf16>, vector<4x16xbf16>, vector<16x16xf32> -> vector<16x16xf32>
    %127 = arith.addf %124, %126 : vector<16x16xf32>
    %cst_71 = arith.constant 0.353553385 : f32
    %128 = vector.broadcast %cst_71 : f32 to vector<16x16xf32>
    %129 = arith.mulf %127, %128 : vector<16x16xf32>
    %cst_72 = arith.constant dense<0xFF800000> : vector<16xf32>
    %130 = vector.multi_reduction <maximumf>, %129, %cst_72 [1] : vector<16x16xf32> to vector<16xf32>
    %131 = vector.shape_cast %130 : vector<16xf32> to vector<16x1xf32>
    %132 = vector.broadcast %131 : vector<16x1xf32> to vector<16x16xf32>
    %133 = arith.subf %129, %132 : vector<16x16xf32>
    %134 = math.exp %133 : vector<16x16xf32>
    %cst_73 = arith.constant dense<0.000000e+00> : vector<16xf32>
    %135 = vector.multi_reduction <add>, %134, %cst_73 [1] : vector<16x16xf32> to vector<16xf32>
    %136 = vector.shape_cast %135 : vector<16xf32> to vector<16x1xf32>
    %137 = tpu.reciprocal %136 {approx = true} : vector<16x1xf32> -> vector<16x1xf32>
    %138 = vector.broadcast %137 : vector<16x1xf32> to vector<16x16xf32>
    %139 = arith.mulf %134, %138 : vector<16x16xf32>
    %140 = arith.truncf %139 : vector<16x16xf32> to vector<16x16xbf16>
    %cst_74 = arith.constant dense<0.000000e+00> : vector<16x8xf32>
    %141 = tpu.matmul %140, %114, %cst_74 {dimension_numbers = #tpu.dot_dimension_numbers<[1], [0], [0], [1], [0, 0, 1, 1], [], []>} : vector<16x16xbf16>, vector<16x8xbf16>, vector<16x8xf32> -> vector<16x8xf32>
    %142 = arith.truncf %141 : vector<16x8xf32> to vector<16x8xbf16>
    %c0_75 = arith.constant 0 : index
    %c24_76 = arith.constant 24 : index
    %143 = vector.load %arg7[%c0_75, %c24_76] : memref<16x32xbf16, #tpu.memory_space<vmem>>, vector<16x8xbf16>
    tpu.vector_store %arg7[%c0_75, %c24_76], %142 {strides = array<i32>} : memref<16x32xbf16, #tpu.memory_space<vmem>>, vector<16x8xbf16>,
    %c0_77 = arith.constant 0 : index
    %c0_78 = arith.constant 0 : index
    %144 = vector.load %arg7[%c0_77, %c0_78] : memref<16x32xbf16, #tpu.memory_space<vmem>>, vector<16x32xbf16>
    %c0_79 = arith.constant 0 : index
    %c0_80 = arith.constant 0 : index
    %c0_81 = arith.constant 0 : index
    %145 = vector.load %arg6[%c0_79, %c0_80, %c0_81] : memref<1x16x32xbf16, #tpu.memory_space<vmem>>, vector<1x16x32xbf16>
    %146 = vector.shape_cast %145 : vector<1x16x32xbf16> to vector<16x32xbf16>
    %147 = vector.shape_cast %144 : vector<16x32xbf16> to vector<1x16x32xbf16>
    tpu.vector_store %arg6[%c0_79, %c0_80, %c0_81], %147 {strides = array<i32>} : memref<1x16x32xbf16, #tpu.memory_space<vmem>>, vector<1x16x32xbf16>,
    return
  }
  func.func @transform_0(%arg0: i32) -> (i32, i32, i32) {
    %c0_i32 = arith.constant 0 : i32
    %c0_i32_0 = arith.constant 0 : i32
    %c0_i32_1 = arith.constant 0 : i32
    return %arg0, %c0_i32, %c0_i32_0 : i32, i32, i32
  }
  func.func @transform_1(%arg0: i32) -> (i32, i32, i32) {
    %c0_i32 = arith.constant 0 : i32
    %c0_i32_0 = arith.constant 0 : i32
    %c0_i32_1 = arith.constant 0 : i32
    %c0_i32_2 = arith.constant 0 : i32
    return %c0_i32, %c0_i32_0, %c0_i32_1 : i32, i32, i32
  }
  func.func @transform_2(%arg0: i32) -> (i32, i32, i32) {
    %c0_i32 = arith.constant 0 : i32
    %c0_i32_0 = arith.constant 0 : i32
    %c0_i32_1 = arith.constant 0 : i32
    %c0_i32_2 = arith.constant 0 : i32
    return %c0_i32, %c0_i32_0, %c0_i32_1 : i32, i32, i32
  }
  func.func @transform_3(%arg0: i32) -> (i32, i32) {
    %c0_i32 = arith.constant 0 : i32
    %c0_i32_0 = arith.constant 0 : i32
    %c0_i32_1 = arith.constant 0 : i32
    return %c0_i32, %c0_i32_0 : i32, i32
  }
  func.func @transform_4(%arg0: i32) -> (i32, i32) {
    %c0_i32 = arith.constant 0 : i32
    %c0_i32_0 = arith.constant 0 : i32
    %c0_i32_1 = arith.constant 0 : i32
    return %c0_i32, %c0_i32_0 : i32, i32
  }
  func.func @transform_5(%arg0: i32) -> (i32, i32, i32) {
    %c0_i32 = arith.constant 0 : i32
    %c0_i32_0 = arith.constant 0 : i32
    %c0_i32_1 = arith.constant 0 : i32
    return %arg0, %c0_i32, %c0_i32_0 : i32, i32, i32
  }
}

module attributes {stable_mosaic.version = 11 : i64} {
  func.func @_pcm_kernel(%arg0: i32, %arg1: i32, %arg2: memref<1x16x32xf32, #tpu.memory_space<vmem>>, %arg3: memref<288x128xbf16, #tpu.memory_space<vmem>>, %arg4: memref<1x128xf32, #tpu.memory_space<vmem>>, %arg5: memref<1x128xf32, #tpu.memory_space<vmem>>, %arg6: memref<1x128xf32, #tpu.memory_space<vmem>>, %arg7: memref<1152x32xbf16, #tpu.memory_space<vmem>>, %arg8: memref<1x32xf32, #tpu.memory_space<vmem>>, %arg9: memref<1x16x32xf32, #tpu.memory_space<vmem>>, %arg10: memref<6x6x32xbf16, #tpu.memory_space<vmem>>, %arg11: memref<6x6x128xbf16, #tpu.memory_space<vmem>>) attributes {dimension_semantics = [#tpu.dimension_semantics<parallel>, #tpu.dimension_semantics<arbitrary>], iteration_bounds = array<i64: 2, 1>, scalar_prefetch = 0 : i64, scratch_operands = 2 : i64, tpu.core_type = #tpu.core_type<tc>, window_params = [{transform_indices = @transform_0, window_bounds = array<i64: 1, 16, 32>}, {pipeline_mode = #tpu.pipeline_mode<synchronous>, transform_indices = @transform_1, window_bounds = array<i64: 288, 128>}, {pipeline_mode = #tpu.pipeline_mode<synchronous>, transform_indices = @transform_2, window_bounds = array<i64: 1, 128>}, {pipeline_mode = #tpu.pipeline_mode<synchronous>, transform_indices = @transform_3, window_bounds = array<i64: 1, 128>}, {pipeline_mode = #tpu.pipeline_mode<synchronous>, transform_indices = @transform_4, window_bounds = array<i64: 1, 128>}, {transform_indices = @transform_5, window_bounds = array<i64: 1152, 32>}, {transform_indices = @transform_6, window_bounds = array<i64: 1, 32>}, {transform_indices = @transform_7, window_bounds = array<i64: 1, 16, 32>}]} {
    %c0_i32 = arith.constant 0 : i32
    %0 = arith.cmpi eq, %arg1, %c0_i32 : i32
    %1 = arith.extui %0 : i1 to i32
    %c0_i32_0 = arith.constant 0 : i32
    %2 = arith.cmpi ne, %1, %c0_i32_0 : i32
    scf.if %2 {
      %cst_32 = arith.constant 0.000000e+00 : bf16
      %30 = vector.broadcast %cst_32 : bf16 to vector<1x6x32xbf16>
      %c0_33 = arith.constant 0 : index
      %c0_34 = arith.constant 0 : index
      %c0_35 = arith.constant 0 : index
      %31 = vector.load %arg10[%c0_33, %c0_34, %c0_35] : memref<6x6x32xbf16, #tpu.memory_space<vmem>>, vector<1x6x32xbf16>
      tpu.vector_store %arg10[%c0_33, %c0_34, %c0_35], %30 {strides = array<i32>} : memref<6x6x32xbf16, #tpu.memory_space<vmem>>, vector<1x6x32xbf16>,
      %cst_36 = arith.constant 0.000000e+00 : bf16
      %32 = vector.broadcast %cst_36 : bf16 to vector<1x6x32xbf16>
      %c5 = arith.constant 5 : index
      %c0_37 = arith.constant 0 : index
      %c0_38 = arith.constant 0 : index
      %33 = vector.load %arg10[%c5, %c0_37, %c0_38] : memref<6x6x32xbf16, #tpu.memory_space<vmem>>, vector<1x6x32xbf16>
      tpu.vector_store %arg10[%c5, %c0_37, %c0_38], %32 {strides = array<i32>} : memref<6x6x32xbf16, #tpu.memory_space<vmem>>, vector<1x6x32xbf16>,
      %cst_39 = arith.constant 0.000000e+00 : bf16
      %34 = vector.broadcast %cst_39 : bf16 to vector<6x1x32xbf16>
      %c0_40 = arith.constant 0 : index
      %c0_41 = arith.constant 0 : index
      %c0_42 = arith.constant 0 : index
      %35 = vector.load %arg10[%c0_40, %c0_41, %c0_42] : memref<6x6x32xbf16, #tpu.memory_space<vmem>>, vector<6x1x32xbf16>
      tpu.vector_store %arg10[%c0_40, %c0_41, %c0_42], %34 {strides = array<i32>} : memref<6x6x32xbf16, #tpu.memory_space<vmem>>, vector<6x1x32xbf16>,
      %cst_43 = arith.constant 0.000000e+00 : bf16
      %36 = vector.broadcast %cst_43 : bf16 to vector<6x1x32xbf16>
      %c0_44 = arith.constant 0 : index
      %c5_45 = arith.constant 5 : index
      %c0_46 = arith.constant 0 : index
      %37 = vector.load %arg10[%c0_44, %c5_45, %c0_46] : memref<6x6x32xbf16, #tpu.memory_space<vmem>>, vector<6x1x32xbf16>
      tpu.vector_store %arg10[%c0_44, %c5_45, %c0_46], %36 {strides = array<i32>} : memref<6x6x32xbf16, #tpu.memory_space<vmem>>, vector<6x1x32xbf16>,
      %cst_47 = arith.constant 0.000000e+00 : bf16
      %38 = vector.broadcast %cst_47 : bf16 to vector<1x6x128xbf16>
      %c0_48 = arith.constant 0 : index
      %c0_49 = arith.constant 0 : index
      %c0_50 = arith.constant 0 : index
      %39 = vector.load %arg11[%c0_48, %c0_49, %c0_50] : memref<6x6x128xbf16, #tpu.memory_space<vmem>>, vector<1x6x128xbf16>
      tpu.vector_store %arg11[%c0_48, %c0_49, %c0_50], %38 {strides = array<i32>} : memref<6x6x128xbf16, #tpu.memory_space<vmem>>, vector<1x6x128xbf16>,
      %cst_51 = arith.constant 0.000000e+00 : bf16
      %40 = vector.broadcast %cst_51 : bf16 to vector<1x6x128xbf16>
      %c5_52 = arith.constant 5 : index
      %c0_53 = arith.constant 0 : index
      %c0_54 = arith.constant 0 : index
      %41 = vector.load %arg11[%c5_52, %c0_53, %c0_54] : memref<6x6x128xbf16, #tpu.memory_space<vmem>>, vector<1x6x128xbf16>
      tpu.vector_store %arg11[%c5_52, %c0_53, %c0_54], %40 {strides = array<i32>} : memref<6x6x128xbf16, #tpu.memory_space<vmem>>, vector<1x6x128xbf16>,
      %cst_55 = arith.constant 0.000000e+00 : bf16
      %42 = vector.broadcast %cst_55 : bf16 to vector<6x1x128xbf16>
      %c0_56 = arith.constant 0 : index
      %c0_57 = arith.constant 0 : index
      %c0_58 = arith.constant 0 : index
      %43 = vector.load %arg11[%c0_56, %c0_57, %c0_58] : memref<6x6x128xbf16, #tpu.memory_space<vmem>>, vector<6x1x128xbf16>
      tpu.vector_store %arg11[%c0_56, %c0_57, %c0_58], %42 {strides = array<i32>} : memref<6x6x128xbf16, #tpu.memory_space<vmem>>, vector<6x1x128xbf16>,
      %cst_59 = arith.constant 0.000000e+00 : bf16
      %44 = vector.broadcast %cst_59 : bf16 to vector<6x1x128xbf16>
      %c0_60 = arith.constant 0 : index
      %c5_61 = arith.constant 5 : index
      %c0_62 = arith.constant 0 : index
      %45 = vector.load %arg11[%c0_60, %c5_61, %c0_62] : memref<6x6x128xbf16, #tpu.memory_space<vmem>>, vector<6x1x128xbf16>
      tpu.vector_store %arg11[%c0_60, %c5_61, %c0_62], %44 {strides = array<i32>} : memref<6x6x128xbf16, #tpu.memory_space<vmem>>, vector<6x1x128xbf16>,
      %c0_63 = arith.constant 0 : index
      %c0_64 = arith.constant 0 : index
      %c0_65 = arith.constant 0 : index
      %46 = vector.load %arg2[%c0_63, %c0_64, %c0_65] : memref<1x16x32xf32, #tpu.memory_space<vmem>>, vector<1x16x32xf32>
      %47 = vector.shape_cast %46 : vector<1x16x32xf32> to vector<16x32xf32>
      %48 = vector.shape_cast %47 : vector<16x32xf32> to vector<4x4x32xf32>
      %49 = arith.truncf %48 : vector<4x4x32xf32> to vector<4x4x32xbf16>
      %c1_66 = arith.constant 1 : index
      %c1_67 = arith.constant 1 : index
      %c0_68 = arith.constant 0 : index
      %50 = vector.load %arg10[%c1_66, %c1_67, %c0_68] : memref<6x6x32xbf16, #tpu.memory_space<vmem>>, vector<4x4x32xbf16>
      tpu.vector_store %arg10[%c1_66, %c1_67, %c0_68], %49 {strides = array<i32>} : memref<6x6x32xbf16, #tpu.memory_space<vmem>>, vector<4x4x32xbf16>,
      %c0_69 = arith.constant 0 : index
      %c0_70 = arith.constant 0 : index
      %c0_71 = arith.constant 0 : index
      %51 = vector.load %arg10[%c0_69, %c0_70, %c0_71] : memref<6x6x32xbf16, #tpu.memory_space<vmem>>, vector<4x4x32xbf16>
      %52 = vector.shape_cast %51 : vector<4x4x32xbf16> to vector<16x32xbf16>
      %c0_72 = arith.constant 0 : index
      %c1_73 = arith.constant 1 : index
      %c0_74 = arith.constant 0 : index
      %53 = vector.load %arg10[%c0_72, %c1_73, %c0_74] : memref<6x6x32xbf16, #tpu.memory_space<vmem>>, vector<4x4x32xbf16>
      %54 = vector.shape_cast %53 : vector<4x4x32xbf16> to vector<16x32xbf16>
      %c0_75 = arith.constant 0 : index
      %c2_76 = arith.constant 2 : index
      %c0_77 = arith.constant 0 : index
      %55 = vector.load %arg10[%c0_75, %c2_76, %c0_77] : memref<6x6x32xbf16, #tpu.memory_space<vmem>>, vector<4x4x32xbf16>
      %56 = vector.shape_cast %55 : vector<4x4x32xbf16> to vector<16x32xbf16>
      %c1_78 = arith.constant 1 : index
      %c0_79 = arith.constant 0 : index
      %c0_80 = arith.constant 0 : index
      %57 = vector.load %arg10[%c1_78, %c0_79, %c0_80] : memref<6x6x32xbf16, #tpu.memory_space<vmem>>, vector<4x4x32xbf16>
      %58 = vector.shape_cast %57 : vector<4x4x32xbf16> to vector<16x32xbf16>
      %c1_81 = arith.constant 1 : index
      %c1_82 = arith.constant 1 : index
      %c0_83 = arith.constant 0 : index
      %59 = vector.load %arg10[%c1_81, %c1_82, %c0_83] : memref<6x6x32xbf16, #tpu.memory_space<vmem>>, vector<4x4x32xbf16>
      %60 = vector.shape_cast %59 : vector<4x4x32xbf16> to vector<16x32xbf16>
      %c1_84 = arith.constant 1 : index
      %c2_85 = arith.constant 2 : index
      %c0_86 = arith.constant 0 : index
      %61 = vector.load %arg10[%c1_84, %c2_85, %c0_86] : memref<6x6x32xbf16, #tpu.memory_space<vmem>>, vector<4x4x32xbf16>
      %62 = vector.shape_cast %61 : vector<4x4x32xbf16> to vector<16x32xbf16>
      %c2_87 = arith.constant 2 : index
      %c0_88 = arith.constant 0 : index
      %c0_89 = arith.constant 0 : index
      %63 = vector.load %arg10[%c2_87, %c0_88, %c0_89] : memref<6x6x32xbf16, #tpu.memory_space<vmem>>, vector<4x4x32xbf16>
      %64 = vector.shape_cast %63 : vector<4x4x32xbf16> to vector<16x32xbf16>
      %c2_90 = arith.constant 2 : index
      %c1_91 = arith.constant 1 : index
      %c0_92 = arith.constant 0 : index
      %65 = vector.load %arg10[%c2_90, %c1_91, %c0_92] : memref<6x6x32xbf16, #tpu.memory_space<vmem>>, vector<4x4x32xbf16>
      %66 = vector.shape_cast %65 : vector<4x4x32xbf16> to vector<16x32xbf16>
      %c2_93 = arith.constant 2 : index
      %c2_94 = arith.constant 2 : index
      %c0_95 = arith.constant 0 : index
      %67 = vector.load %arg10[%c2_93, %c2_94, %c0_95] : memref<6x6x32xbf16, #tpu.memory_space<vmem>>, vector<4x4x32xbf16>
      %68 = vector.shape_cast %67 : vector<4x4x32xbf16> to vector<16x32xbf16>
      %69 = tpu.concatenate %52, %54, %56, %58, %60, %62, %64, %66, %68 in 1 : vector<16x32xbf16>, vector<16x32xbf16>, vector<16x32xbf16>, vector<16x32xbf16>, vector<16x32xbf16>, vector<16x32xbf16>, vector<16x32xbf16>, vector<16x32xbf16>, vector<16x32xbf16> -> vector<16x288xbf16>
      %c0_96 = arith.constant 0 : index
      %c0_97 = arith.constant 0 : index
      %70 = vector.load %arg3[%c0_96, %c0_97] : memref<288x128xbf16, #tpu.memory_space<vmem>>, vector<288x128xbf16>
      %cst_98 = arith.constant dense<0.000000e+00> : vector<16x128xf32>
      %71 = tpu.matmul %69, %70, %cst_98 {dimension_numbers = #tpu.dot_dimension_numbers<[1], [0], [0], [1], [0, 0, 1, 1], [], []>} : vector<16x288xbf16>, vector<288x128xbf16>, vector<16x128xf32> -> vector<16x128xf32>
      %c0_99 = arith.constant 0 : index
      %c0_100 = arith.constant 0 : index
      %72 = vector.load %arg4[%c0_99, %c0_100] : memref<1x128xf32, #tpu.memory_space<vmem>>, vector<1x128xf32>
      %73 = vector.broadcast %72 : vector<1x128xf32> to vector<16x128xf32>
      %74 = arith.addf %71, %73 : vector<16x128xf32>
      %c0_101 = arith.constant 0 : index
      %c0_102 = arith.constant 0 : index
      %75 = vector.load %arg5[%c0_101, %c0_102] : memref<1x128xf32, #tpu.memory_space<vmem>>, vector<1x128xf32>
      %76 = vector.broadcast %75 : vector<1x128xf32> to vector<16x128xf32>
      %77 = arith.mulf %74, %76 : vector<16x128xf32>
      %c0_103 = arith.constant 0 : index
      %c0_104 = arith.constant 0 : index
      %78 = vector.load %arg6[%c0_103, %c0_104] : memref<1x128xf32, #tpu.memory_space<vmem>>, vector<1x128xf32>
      %79 = vector.broadcast %78 : vector<1x128xf32> to vector<16x128xf32>
      %80 = arith.addf %77, %79 : vector<16x128xf32>
      %cst_105 = arith.constant 0.000000e+00 : f32
      %81 = vector.broadcast %cst_105 : f32 to vector<16x128xf32>
      %82 = arith.subf %81, %80 : vector<16x128xf32>
      %83 = math.exp %82 : vector<16x128xf32>
      %cst_106 = arith.constant 1.000000e+00 : f32
      %84 = vector.broadcast %cst_106 : f32 to vector<16x128xf32>
      %85 = arith.addf %84, %83 : vector<16x128xf32>
      %cst_107 = arith.constant 1.000000e+00 : f32
      %86 = vector.broadcast %cst_107 : f32 to vector<16x128xf32>
      %87 = arith.divf %86, %85 : vector<16x128xf32>
      %88 = arith.mulf %80, %87 : vector<16x128xf32>
      %89 = vector.shape_cast %88 : vector<16x128xf32> to vector<4x4x128xf32>
      %90 = arith.truncf %89 : vector<4x4x128xf32> to vector<4x4x128xbf16>
      %c1_108 = arith.constant 1 : index
      %c1_109 = arith.constant 1 : index
      %c0_110 = arith.constant 0 : index
      %91 = vector.load %arg11[%c1_108, %c1_109, %c0_110] : memref<6x6x128xbf16, #tpu.memory_space<vmem>>, vector<4x4x128xbf16>
      tpu.vector_store %arg11[%c1_108, %c1_109, %c0_110], %90 {strides = array<i32>} : memref<6x6x128xbf16, #tpu.memory_space<vmem>>, vector<4x4x128xbf16>,
    } else {
    }
    %c0 = arith.constant 0 : index
    %c0_1 = arith.constant 0 : index
    %c0_2 = arith.constant 0 : index
    %3 = vector.load %arg11[%c0, %c0_1, %c0_2] : memref<6x6x128xbf16, #tpu.memory_space<vmem>>, vector<4x4x128xbf16>
    %4 = vector.shape_cast %3 : vector<4x4x128xbf16> to vector<16x128xbf16>
    %c0_3 = arith.constant 0 : index
    %c1 = arith.constant 1 : index
    %c0_4 = arith.constant 0 : index
    %5 = vector.load %arg11[%c0_3, %c1, %c0_4] : memref<6x6x128xbf16, #tpu.memory_space<vmem>>, vector<4x4x128xbf16>
    %6 = vector.shape_cast %5 : vector<4x4x128xbf16> to vector<16x128xbf16>
    %c0_5 = arith.constant 0 : index
    %c2 = arith.constant 2 : index
    %c0_6 = arith.constant 0 : index
    %7 = vector.load %arg11[%c0_5, %c2, %c0_6] : memref<6x6x128xbf16, #tpu.memory_space<vmem>>, vector<4x4x128xbf16>
    %8 = vector.shape_cast %7 : vector<4x4x128xbf16> to vector<16x128xbf16>
    %c1_7 = arith.constant 1 : index
    %c0_8 = arith.constant 0 : index
    %c0_9 = arith.constant 0 : index
    %9 = vector.load %arg11[%c1_7, %c0_8, %c0_9] : memref<6x6x128xbf16, #tpu.memory_space<vmem>>, vector<4x4x128xbf16>
    %10 = vector.shape_cast %9 : vector<4x4x128xbf16> to vector<16x128xbf16>
    %c1_10 = arith.constant 1 : index
    %c1_11 = arith.constant 1 : index
    %c0_12 = arith.constant 0 : index
    %11 = vector.load %arg11[%c1_10, %c1_11, %c0_12] : memref<6x6x128xbf16, #tpu.memory_space<vmem>>, vector<4x4x128xbf16>
    %12 = vector.shape_cast %11 : vector<4x4x128xbf16> to vector<16x128xbf16>
    %c1_13 = arith.constant 1 : index
    %c2_14 = arith.constant 2 : index
    %c0_15 = arith.constant 0 : index
    %13 = vector.load %arg11[%c1_13, %c2_14, %c0_15] : memref<6x6x128xbf16, #tpu.memory_space<vmem>>, vector<4x4x128xbf16>
    %14 = vector.shape_cast %13 : vector<4x4x128xbf16> to vector<16x128xbf16>
    %c2_16 = arith.constant 2 : index
    %c0_17 = arith.constant 0 : index
    %c0_18 = arith.constant 0 : index
    %15 = vector.load %arg11[%c2_16, %c0_17, %c0_18] : memref<6x6x128xbf16, #tpu.memory_space<vmem>>, vector<4x4x128xbf16>
    %16 = vector.shape_cast %15 : vector<4x4x128xbf16> to vector<16x128xbf16>
    %c2_19 = arith.constant 2 : index
    %c1_20 = arith.constant 1 : index
    %c0_21 = arith.constant 0 : index
    %17 = vector.load %arg11[%c2_19, %c1_20, %c0_21] : memref<6x6x128xbf16, #tpu.memory_space<vmem>>, vector<4x4x128xbf16>
    %18 = vector.shape_cast %17 : vector<4x4x128xbf16> to vector<16x128xbf16>
    %c2_22 = arith.constant 2 : index
    %c2_23 = arith.constant 2 : index
    %c0_24 = arith.constant 0 : index
    %19 = vector.load %arg11[%c2_22, %c2_23, %c0_24] : memref<6x6x128xbf16, #tpu.memory_space<vmem>>, vector<4x4x128xbf16>
    %20 = vector.shape_cast %19 : vector<4x4x128xbf16> to vector<16x128xbf16>
    %21 = tpu.concatenate %4, %6, %8, %10, %12, %14, %16, %18, %20 in 1 : vector<16x128xbf16>, vector<16x128xbf16>, vector<16x128xbf16>, vector<16x128xbf16>, vector<16x128xbf16>, vector<16x128xbf16>, vector<16x128xbf16>, vector<16x128xbf16>, vector<16x128xbf16> -> vector<16x1152xbf16>
    %c0_25 = arith.constant 0 : index
    %c0_26 = arith.constant 0 : index
    %22 = vector.load %arg7[%c0_25, %c0_26] : memref<1152x32xbf16, #tpu.memory_space<vmem>>, vector<1152x32xbf16>
    %cst = arith.constant dense<0.000000e+00> : vector<16x32xf32>
    %23 = tpu.matmul %21, %22, %cst {dimension_numbers = #tpu.dot_dimension_numbers<[1], [0], [0], [1], [0, 0, 1, 1], [], []>} : vector<16x1152xbf16>, vector<1152x32xbf16>, vector<16x32xf32> -> vector<16x32xf32>
    %c0_27 = arith.constant 0 : index
    %c0_28 = arith.constant 0 : index
    %24 = vector.load %arg8[%c0_27, %c0_28] : memref<1x32xf32, #tpu.memory_space<vmem>>, vector<1x32xf32>
    %25 = vector.broadcast %24 : vector<1x32xf32> to vector<16x32xf32>
    %26 = arith.addf %23, %25 : vector<16x32xf32>
    %c0_29 = arith.constant 0 : index
    %c0_30 = arith.constant 0 : index
    %c0_31 = arith.constant 0 : index
    %27 = vector.load %arg9[%c0_29, %c0_30, %c0_31] : memref<1x16x32xf32, #tpu.memory_space<vmem>>, vector<1x16x32xf32>
    %28 = vector.shape_cast %27 : vector<1x16x32xf32> to vector<16x32xf32>
    %29 = vector.shape_cast %26 : vector<16x32xf32> to vector<1x16x32xf32>
    tpu.vector_store %arg9[%c0_29, %c0_30, %c0_31], %29 {strides = array<i32>} : memref<1x16x32xf32, #tpu.memory_space<vmem>>, vector<1x16x32xf32>,
    return
  }
  func.func @transform_0(%arg0: i32, %arg1: i32) -> (i32, i32, i32) {
    %c0_i32 = arith.constant 0 : i32
    %c0_i32_0 = arith.constant 0 : i32
    %c0_i32_1 = arith.constant 0 : i32
    return %arg0, %c0_i32, %c0_i32_0 : i32, i32, i32
  }
  func.func @transform_1(%arg0: i32, %arg1: i32) -> (i32, i32) {
    %c0_i32 = arith.constant 0 : i32
    %c0_i32_0 = arith.constant 0 : i32
    %c0_i32_1 = arith.constant 0 : i32
    return %c0_i32, %c0_i32_0 : i32, i32
  }
  func.func @transform_2(%arg0: i32, %arg1: i32) -> (i32, i32) {
    %c0_i32 = arith.constant 0 : i32
    %c0_i32_0 = arith.constant 0 : i32
    %c0_i32_1 = arith.constant 0 : i32
    return %c0_i32, %c0_i32_0 : i32, i32
  }
  func.func @transform_3(%arg0: i32, %arg1: i32) -> (i32, i32) {
    %c0_i32 = arith.constant 0 : i32
    %c0_i32_0 = arith.constant 0 : i32
    %c0_i32_1 = arith.constant 0 : i32
    return %c0_i32, %c0_i32_0 : i32, i32
  }
  func.func @transform_4(%arg0: i32, %arg1: i32) -> (i32, i32) {
    %c0_i32 = arith.constant 0 : i32
    %c0_i32_0 = arith.constant 0 : i32
    %c0_i32_1 = arith.constant 0 : i32
    return %c0_i32, %c0_i32_0 : i32, i32
  }
  func.func @transform_5(%arg0: i32, %arg1: i32) -> (i32, i32) {
    %c0_i32 = arith.constant 0 : i32
    %c0_i32_0 = arith.constant 0 : i32
    return %c0_i32, %arg1 : i32, i32
  }
  func.func @transform_6(%arg0: i32, %arg1: i32) -> (i32, i32) {
    %c0_i32 = arith.constant 0 : i32
    %c0_i32_0 = arith.constant 0 : i32
    return %c0_i32, %arg1 : i32, i32
  }
  func.func @transform_7(%arg0: i32, %arg1: i32) -> (i32, i32, i32) {
    %c0_i32 = arith.constant 0 : i32
    %c0_i32_0 = arith.constant 0 : i32
    return %arg0, %c0_i32, %arg1 : i32, i32, i32
  }
}

module attributes {stable_mosaic.version = 11 : i64} {
  func.func @_linear_res_kernel(%arg0: i32, %arg1: memref<16x32xbf16, #tpu.memory_space<vmem>>, %arg2: memref<32x32xbf16, #tpu.memory_space<vmem>>, %arg3: memref<1x32xf32, #tpu.memory_space<vmem>>, %arg4: memref<16x32xf32, #tpu.memory_space<vmem>>, %arg5: memref<16x32xf32, #tpu.memory_space<vmem>>, %arg6: memref<16x32xf32, #tpu.memory_space<vmem>>) attributes {dimension_semantics = [#tpu.dimension_semantics<parallel>], iteration_bounds = array<i64: 2>, scalar_prefetch = 0 : i64, scratch_operands = 0 : i64, tpu.core_type = #tpu.core_type<tc>, window_params = [{transform_indices = @transform_0, window_bounds = array<i64: 16, 32>}, {pipeline_mode = #tpu.pipeline_mode<synchronous>, transform_indices = @transform_1, window_bounds = array<i64: 32, 32>}, {pipeline_mode = #tpu.pipeline_mode<synchronous>, transform_indices = @transform_2, window_bounds = array<i64: 1, 32>}, {transform_indices = @transform_3, window_bounds = array<i64: 16, 32>}, {transform_indices = @transform_4, window_bounds = array<i64: 16, 32>}, {transform_indices = @transform_5, window_bounds = array<i64: 16, 32>}]} {
    %c0 = arith.constant 0 : index
    %c0_0 = arith.constant 0 : index
    %0 = vector.load %arg1[%c0, %c0_0] : memref<16x32xbf16, #tpu.memory_space<vmem>>, vector<16x32xbf16>
    %c0_1 = arith.constant 0 : index
    %c0_2 = arith.constant 0 : index
    %1 = vector.load %arg2[%c0_1, %c0_2] : memref<32x32xbf16, #tpu.memory_space<vmem>>, vector<32x32xbf16>
    %cst = arith.constant dense<0.000000e+00> : vector<16x32xf32>
    %2 = tpu.matmul %0, %1, %cst {dimension_numbers = #tpu.dot_dimension_numbers<[1], [0], [0], [1], [0, 0, 1, 1], [], []>} : vector<16x32xbf16>, vector<32x32xbf16>, vector<16x32xf32> -> vector<16x32xf32>
    %c0_3 = arith.constant 0 : index
    %c0_4 = arith.constant 0 : index
    %3 = vector.load %arg3[%c0_3, %c0_4] : memref<1x32xf32, #tpu.memory_space<vmem>>, vector<1x32xf32>
    %4 = vector.broadcast %3 : vector<1x32xf32> to vector<16x32xf32>
    %5 = arith.addf %2, %4 : vector<16x32xf32>
    %c0_5 = arith.constant 0 : index
    %c0_6 = arith.constant 0 : index
    %6 = vector.load %arg4[%c0_5, %c0_6] : memref<16x32xf32, #tpu.memory_space<vmem>>, vector<16x32xf32>
    %7 = arith.addf %5, %6 : vector<16x32xf32>
    %c0_7 = arith.constant 0 : index
    %c0_8 = arith.constant 0 : index
    %8 = vector.load %arg5[%c0_7, %c0_8] : memref<16x32xf32, #tpu.memory_space<vmem>>, vector<16x32xf32>
    %9 = arith.addf %7, %8 : vector<16x32xf32>
    %c0_9 = arith.constant 0 : index
    %c0_10 = arith.constant 0 : index
    %10 = vector.load %arg6[%c0_9, %c0_10] : memref<16x32xf32, #tpu.memory_space<vmem>>, vector<16x32xf32>
    tpu.vector_store %arg6[%c0_9, %c0_10], %9 {strides = array<i32>} : memref<16x32xf32, #tpu.memory_space<vmem>>, vector<16x32xf32>,
    return
  }
  func.func @transform_0(%arg0: i32) -> (i32, i32) {
    %c0_i32 = arith.constant 0 : i32
    %c0_i32_0 = arith.constant 0 : i32
    return %arg0, %c0_i32 : i32, i32
  }
  func.func @transform_1(%arg0: i32) -> (i32, i32) {
    %c0_i32 = arith.constant 0 : i32
    %c0_i32_0 = arith.constant 0 : i32
    %c0_i32_1 = arith.constant 0 : i32
    return %c0_i32, %c0_i32_0 : i32, i32
  }
  func.func @transform_2(%arg0: i32) -> (i32, i32) {
    %c0_i32 = arith.constant 0 : i32
    %c0_i32_0 = arith.constant 0 : i32
    %c0_i32_1 = arith.constant 0 : i32
    return %c0_i32, %c0_i32_0 : i32, i32
  }
  func.func @transform_3(%arg0: i32) -> (i32, i32) {
    %c0_i32 = arith.constant 0 : i32
    %c0_i32_0 = arith.constant 0 : i32
    return %arg0, %c0_i32 : i32, i32
  }
  func.func @transform_4(%arg0: i32) -> (i32, i32) {
    %c0_i32 = arith.constant 0 : i32
    %c0_i32_0 = arith.constant 0 : i32
    return %arg0, %c0_i32 : i32, i32
  }
  func.func @transform_5(%arg0: i32) -> (i32, i32) {
    %c0_i32 = arith.constant 0 : i32
    %c0_i32_0 = arith.constant 0 : i32
    return %arg0, %c0_i32 : i32, i32
  }
}

module attributes {stable_mosaic.version = 11 : i64} {
  func.func @_ln_linear_kernel(%arg0: i32, %arg1: memref<16x32xf32, #tpu.memory_space<vmem>>, %arg2: memref<1x32xf32, #tpu.memory_space<vmem>>, %arg3: memref<1x32xf32, #tpu.memory_space<vmem>>, %arg4: memref<32x128xbf16, #tpu.memory_space<vmem>>, %arg5: memref<1x128xf32, #tpu.memory_space<vmem>>, %arg6: memref<16x128xbf16, #tpu.memory_space<vmem>>) attributes {dimension_semantics = [#tpu.dimension_semantics<parallel>], iteration_bounds = array<i64: 2>, scalar_prefetch = 0 : i64, scratch_operands = 0 : i64, tpu.core_type = #tpu.core_type<tc>, window_params = [{transform_indices = @transform_0, window_bounds = array<i64: 16, 32>}, {pipeline_mode = #tpu.pipeline_mode<synchronous>, transform_indices = @transform_1, window_bounds = array<i64: 1, 32>}, {pipeline_mode = #tpu.pipeline_mode<synchronous>, transform_indices = @transform_2, window_bounds = array<i64: 1, 32>}, {pipeline_mode = #tpu.pipeline_mode<synchronous>, transform_indices = @transform_3, window_bounds = array<i64: 32, 128>}, {pipeline_mode = #tpu.pipeline_mode<synchronous>, transform_indices = @transform_4, window_bounds = array<i64: 1, 128>}, {transform_indices = @transform_5, window_bounds = array<i64: 16, 128>}]} {
    %c0 = arith.constant 0 : index
    %c0_0 = arith.constant 0 : index
    %0 = vector.load %arg1[%c0, %c0_0] : memref<16x32xf32, #tpu.memory_space<vmem>>, vector<16x32xf32>
    %c0_1 = arith.constant 0 : index
    %c0_2 = arith.constant 0 : index
    %1 = vector.load %arg2[%c0_1, %c0_2] : memref<1x32xf32, #tpu.memory_space<vmem>>, vector<1x32xf32>
    %c0_3 = arith.constant 0 : index
    %c0_4 = arith.constant 0 : index
    %2 = vector.load %arg3[%c0_3, %c0_4] : memref<1x32xf32, #tpu.memory_space<vmem>>, vector<1x32xf32>
    %cst = arith.constant dense<0.000000e+00> : vector<16xf32>
    %3 = vector.multi_reduction <add>, %0, %cst [1] : vector<16x32xf32> to vector<16xf32>
    %4 = vector.shape_cast %3 : vector<16xf32> to vector<16x1xf32>
    %cst_5 = arith.constant 3.200000e+01 : f32
    %5 = vector.broadcast %cst_5 : f32 to vector<16x1xf32>
    %6 = arith.divf %4, %5 : vector<16x1xf32>
    %7 = vector.broadcast %6 : vector<16x1xf32> to vector<16x32xf32>
    %8 = arith.subf %0, %7 : vector<16x32xf32>
    %9 = arith.mulf %8, %8 : vector<16x32xf32>
    %cst_6 = arith.constant dense<0.000000e+00> : vector<16xf32>
    %10 = vector.multi_reduction <add>, %9, %cst_6 [1] : vector<16x32xf32> to vector<16xf32>
    %11 = vector.shape_cast %10 : vector<16xf32> to vector<16x1xf32>
    %cst_7 = arith.constant 3.200000e+01 : f32
    %12 = vector.broadcast %cst_7 : f32 to vector<16x1xf32>
    %13 = arith.divf %11, %12 : vector<16x1xf32>
    %cst_8 = arith.constant 9.99999974E-6 : f32
    %14 = vector.broadcast %cst_8 : f32 to vector<16x1xf32>
    %15 = arith.addf %13, %14 : vector<16x1xf32>
    %16 = math.rsqrt %15 : vector<16x1xf32>
    %17 = vector.broadcast %16 : vector<16x1xf32> to vector<16x32xf32>
    %18 = arith.mulf %8, %17 : vector<16x32xf32>
    %19 = vector.broadcast %1 : vector<1x32xf32> to vector<16x32xf32>
    %20 = arith.mulf %18, %19 : vector<16x32xf32>
    %21 = vector.broadcast %2 : vector<1x32xf32> to vector<16x32xf32>
    %22 = arith.addf %20, %21 : vector<16x32xf32>
    %23 = arith.truncf %22 : vector<16x32xf32> to vector<16x32xbf16>
    %c0_9 = arith.constant 0 : index
    %c0_10 = arith.constant 0 : index
    %24 = vector.load %arg4[%c0_9, %c0_10] : memref<32x128xbf16, #tpu.memory_space<vmem>>, vector<32x128xbf16>
    %cst_11 = arith.constant dense<0.000000e+00> : vector<16x128xf32>
    %25 = tpu.matmul %23, %24, %cst_11 {dimension_numbers = #tpu.dot_dimension_numbers<[1], [0], [0], [1], [0, 0, 1, 1], [], []>} : vector<16x32xbf16>, vector<32x128xbf16>, vector<16x128xf32> -> vector<16x128xf32>
    %c0_12 = arith.constant 0 : index
    %c0_13 = arith.constant 0 : index
    %26 = vector.load %arg5[%c0_12, %c0_13] : memref<1x128xf32, #tpu.memory_space<vmem>>, vector<1x128xf32>
    %27 = vector.broadcast %26 : vector<1x128xf32> to vector<16x128xf32>
    %28 = arith.addf %25, %27 : vector<16x128xf32>
    %cst_14 = arith.constant 5.000000e-01 : f32
    %29 = vector.broadcast %cst_14 : f32 to vector<16x128xf32>
    %30 = arith.mulf %29, %28 : vector<16x128xf32>
    %cst_15 = arith.constant 4.471500e-02 : f32
    %31 = vector.broadcast %cst_15 : f32 to vector<16x128xf32>
    %32 = arith.mulf %31, %28 : vector<16x128xf32>
    %33 = arith.mulf %32, %28 : vector<16x128xf32>
    %34 = arith.mulf %33, %28 : vector<16x128xf32>
    %35 = arith.addf %28, %34 : vector<16x128xf32>
    %cst_16 = arith.constant 0.797884583 : f32
    %36 = vector.broadcast %cst_16 : f32 to vector<16x128xf32>
    %37 = arith.mulf %36, %35 : vector<16x128xf32>
    %38 = math.tanh %37 : vector<16x128xf32>
    %cst_17 = arith.constant 1.000000e+00 : f32
    %39 = vector.broadcast %cst_17 : f32 to vector<16x128xf32>
    %40 = arith.addf %39, %38 : vector<16x128xf32>
    %41 = arith.mulf %30, %40 : vector<16x128xf32>
    %42 = arith.truncf %41 : vector<16x128xf32> to vector<16x128xbf16>
    %c0_18 = arith.constant 0 : index
    %c0_19 = arith.constant 0 : index
    %43 = vector.load %arg6[%c0_18, %c0_19] : memref<16x128xbf16, #tpu.memory_space<vmem>>, vector<16x128xbf16>
    tpu.vector_store %arg6[%c0_18, %c0_19], %42 {strides = array<i32>} : memref<16x128xbf16, #tpu.memory_space<vmem>>, vector<16x128xbf16>,
    return
  }
  func.func @transform_0(%arg0: i32) -> (i32, i32) {
    %c0_i32 = arith.constant 0 : i32
    %c0_i32_0 = arith.constant 0 : i32
    return %arg0, %c0_i32 : i32, i32
  }
  func.func @transform_1(%arg0: i32) -> (i32, i32) {
    %c0_i32 = arith.constant 0 : i32
    %c0_i32_0 = arith.constant 0 : i32
    %c0_i32_1 = arith.constant 0 : i32
    return %c0_i32, %c0_i32_0 : i32, i32
  }
  func.func @transform_2(%arg0: i32) -> (i32, i32) {
    %c0_i32 = arith.constant 0 : i32
    %c0_i32_0 = arith.constant 0 : i32
    %c0_i32_1 = arith.constant 0 : i32
    return %c0_i32, %c0_i32_0 : i32, i32
  }
  func.func @transform_3(%arg0: i32) -> (i32, i32) {
    %c0_i32 = arith.constant 0 : i32
    %c0_i32_0 = arith.constant 0 : i32
    %c0_i32_1 = arith.constant 0 : i32
    return %c0_i32, %c0_i32_0 : i32, i32
  }
  func.func @transform_4(%arg0: i32) -> (i32, i32) {
    %c0_i32 = arith.constant 0 : i32
    %c0_i32_0 = arith.constant 0 : i32
    %c0_i32_1 = arith.constant 0 : i32
    return %c0_i32, %c0_i32_0 : i32, i32
  }
  func.func @transform_5(%arg0: i32) -> (i32, i32) {
    %c0_i32 = arith.constant 0 : i32
    %c0_i32_0 = arith.constant 0 : i32
    return %arg0, %c0_i32 : i32, i32
  }
}

module attributes {stable_mosaic.version = 11 : i64} {
  func.func @_linear_res_kernel(%arg0: i32, %arg1: memref<16x128xbf16, #tpu.memory_space<vmem>>, %arg2: memref<128x32xbf16, #tpu.memory_space<vmem>>, %arg3: memref<1x32xf32, #tpu.memory_space<vmem>>, %arg4: memref<16x32xf32, #tpu.memory_space<vmem>>, %arg5: memref<16x32xf32, #tpu.memory_space<vmem>>) attributes {dimension_semantics = [#tpu.dimension_semantics<parallel>], iteration_bounds = array<i64: 2>, scalar_prefetch = 0 : i64, scratch_operands = 0 : i64, tpu.core_type = #tpu.core_type<tc>, window_params = [{transform_indices = @transform_0, window_bounds = array<i64: 16, 128>}, {pipeline_mode = #tpu.pipeline_mode<synchronous>, transform_indices = @transform_1, window_bounds = array<i64: 128, 32>}, {pipeline_mode = #tpu.pipeline_mode<synchronous>, transform_indices = @transform_2, window_bounds = array<i64: 1, 32>}, {transform_indices = @transform_3, window_bounds = array<i64: 16, 32>}, {transform_indices = @transform_4, window_bounds = array<i64: 16, 32>}]} {
    %c0 = arith.constant 0 : index
    %c0_0 = arith.constant 0 : index
    %0 = vector.load %arg1[%c0, %c0_0] : memref<16x128xbf16, #tpu.memory_space<vmem>>, vector<16x128xbf16>
    %c0_1 = arith.constant 0 : index
    %c0_2 = arith.constant 0 : index
    %1 = vector.load %arg2[%c0_1, %c0_2] : memref<128x32xbf16, #tpu.memory_space<vmem>>, vector<128x32xbf16>
    %cst = arith.constant dense<0.000000e+00> : vector<16x32xf32>
    %2 = tpu.matmul %0, %1, %cst {dimension_numbers = #tpu.dot_dimension_numbers<[1], [0], [0], [1], [0, 0, 1, 1], [], []>} : vector<16x128xbf16>, vector<128x32xbf16>, vector<16x32xf32> -> vector<16x32xf32>
    %c0_3 = arith.constant 0 : index
    %c0_4 = arith.constant 0 : index
    %3 = vector.load %arg3[%c0_3, %c0_4] : memref<1x32xf32, #tpu.memory_space<vmem>>, vector<1x32xf32>
    %4 = vector.broadcast %3 : vector<1x32xf32> to vector<16x32xf32>
    %5 = arith.addf %2, %4 : vector<16x32xf32>
    %c0_5 = arith.constant 0 : index
    %c0_6 = arith.constant 0 : index
    %6 = vector.load %arg4[%c0_5, %c0_6] : memref<16x32xf32, #tpu.memory_space<vmem>>, vector<16x32xf32>
    %7 = arith.addf %5, %6 : vector<16x32xf32>
    %c0_7 = arith.constant 0 : index
    %c0_8 = arith.constant 0 : index
    %8 = vector.load %arg5[%c0_7, %c0_8] : memref<16x32xf32, #tpu.memory_space<vmem>>, vector<16x32xf32>
    tpu.vector_store %arg5[%c0_7, %c0_8], %7 {strides = array<i32>} : memref<16x32xf32, #tpu.memory_space<vmem>>, vector<16x32xf32>,
    return
  }
  func.func @transform_0(%arg0: i32) -> (i32, i32) {
    %c0_i32 = arith.constant 0 : i32
    %c0_i32_0 = arith.constant 0 : i32
    return %arg0, %c0_i32 : i32, i32
  }
  func.func @transform_1(%arg0: i32) -> (i32, i32) {
    %c0_i32 = arith.constant 0 : i32
    %c0_i32_0 = arith.constant 0 : i32
    %c0_i32_1 = arith.constant 0 : i32
    return %c0_i32, %c0_i32_0 : i32, i32
  }
  func.func @transform_2(%arg0: i32) -> (i32, i32) {
    %c0_i32 = arith.constant 0 : i32
    %c0_i32_0 = arith.constant 0 : i32
    %c0_i32_1 = arith.constant 0 : i32
    return %c0_i32, %c0_i32_0 : i32, i32
  }
  func.func @transform_3(%arg0: i32) -> (i32, i32) {
    %c0_i32 = arith.constant 0 : i32
    %c0_i32_0 = arith.constant 0 : i32
    return %arg0, %c0_i32 : i32, i32
  }
  func.func @transform_4(%arg0: i32) -> (i32, i32) {
    %c0_i32 = arith.constant 0 : i32
    %c0_i32_0 = arith.constant 0 : i32
    return %arg0, %c0_i32 : i32, i32
  }
}

</mosaic_0001>

<bundles_post_ra>
// kernel: normal_cell_forward.7
= control target key start
LH: loop header
LB: loop body
LE: loop exit
PB: predicated region body
PF: predicated region fallthrough
CT: control target
= control target key end

     0   :  { %10 = vsyncpa [#allocation3], 0  ;;  %s712_s0 = inlined_call_operand.hbm [shape: f32[32,32], index: 0, kind: input, shape index: {}]   ;;  %s713_s1 = inlined_call_operand.vmem [shape: f32[1,32], index: 1, kind: input, shape index: {}]   ;;  %s714_s2 = inlined_call_operand.vmem [shape: f32[1,32], index: 2, kind: input, shape index: {}]   ;;  %s715_s3 = inlined_call_operand.vmem [shape: bf16[32,96], index: 3, kind: input, shape index: {}]   ;;  %s716_s4 = inlined_call_operand.vmem [shape: f32[1,96], index: 4, kind: input, shape index: {}]   ;;  %s717_s5 = inlined_call_operand.vmem [shape: bf16[32,96], index: 5, kind: output, shape index: {}]  }
   0x1   :  { %12 = vsyncpa [#allocation3 + $0x1], 0  ;;  %s601_s18 = smov 0   ;;  %s603_s19 = smov 0  }
   0x2   :  { %s605_s20 = smov 0   ;;  %s607_s21 = smov 0  }
   0x3 LB: > { %s426_s22 = sadd.s32 4294967295, %s566_s21   ;;  %s621_s23 = sadd.s32 1, %s566_s21   ;;  %s566_s21 = sphi %s607_s21, %s724_s21   ;;  %s562_s20 = sphi %s605_s20, %s723_s20   ;;  %s558_s19 = sphi %s603_s19, %s722_s19   ;;  %s554_s18 = sphi %s601_s18, %s721_s18  }
   0x4   : > { %s22_s24 = ssub.s32 %s566_s21, %s621_s23  ;;  %s25_s25 = sadd.s32 1, %s562_s20 }
   0x5   : > { %p23_p0 = scmp.eq.s32.totalorder %s22_s24, 0  ;;  %p32_p1 = scmp.ne.s32.totalorder %s562_s20, %s558_s19 }
   0x6   : > { %p33_p2 = scmp.eq.s32.totalorder %s566_s21, 0  ;;  %p38_p3 = scmp.ne.s32.totalorder %s558_s19, %s554_s18 }
   0x7   : > { %s631_s26 = scalar_select %p23_p0, %s562_s20, %s25_s25  }
   0x8   : > { %p633_p4 = por %p33_p2, %p32_p1  ;;  %p39_p5 = scmp.eq.s32.totalorder %s426_s22, 0 }
   0x9   : > { %p457_p6 = scmp.lt.s32.totalorder %s566_s21, 2  ;;  %s184_s29 = sand.u32 1, %s562_s20  }
   0xa   : > { %p640_p7 = por %p39_p5, %p38_p3  ;;  %s430_s30 = sshll.u32 %s184_s29, 4 }
   0xb   : > { %s448_s6 = sshll.u32 %s566_s21, 4  ;;  %s188_s10 = scalar_lea.vmem [#allocation2], %s430_s30 }
   0xc   : > { %s193_s9 = scalar_lea.hbm %s712_s0, %s448_s6  ;;  %s196_s11 = sshll.u32 %s188_s10, 4  ;;  %s197_s11 = int_to_ptr.vmem [resolvable:$true] %s196_s11 }
   0xd   : > { %s194_s12 = sshll.u32 %s193_s9, 4  ;;  %p651_p8 = pnand %p457_p6, %p633_p4  ;;  %s195_s12 = int_to_ptr.hbm [resolvable:$true] %s194_s12 }
   0xe   : > { %p433_p9 = scmp.ge.s32.totalorder %s566_s21, 1  ;;  %s185_s14 = scalar_lea.sflag [#allocation3], %s184_s29 }
   0xf   : > { %s502_s15 = sshra.s32 %s195_s12, 4  ;;  %p506_p11 = pneg %p651_p8  ;;  %s503_s15 = int_to_ptr.hbm [resolvable:$true] %s502_s15 }
  0x10   : > { %s504_s16 = scalar_lea.hbm %s503_s15, 16  ;;  %s509_s24 = scalar_lea.hbm %s712_s0, 32 }
  0x11   : > { %p505_p10 = scmp.ne.s32.totalorder %s503_s15, %s504_s16  ;;  %p510_p0 = scmp.lt.s32.totalorder %s503_s15, %s712_s0 }
  0x12   : > { %p511_p1 = scmp.lt.s32.totalorder %s509_s24, %s504_s16 }
  0x13   : > { %p507_p12 = pnand %p506_p11, %p505_p10 }
  0x14   : > { %p512_p2 = por %p511_p1, %p510_p0 }
  0x15   : > { %p508_p13 = pneg %p507_p12 }
  0x17   : > { %p513_p3 = pnand %p512_p2, %p508_p13 }
  0x19   : > { %516 = shalt.err (!%p513_p3)
}
  0x1a   : > { %s568_s29 = smov 128   ;;  %s569_s30 = smov 8  }
  0x1b   : > { %456 = dma.hbm_to_vmem [thread:$0]  (!%p651_p8), %s195_s12, 256, %s197_s11, %s185_s14, %s568_s29, %s568_s29, %s569_s30  }
  0x1c   : > { %p204_p4 = scmp.lt.s32.totalorder %s566_s21, 3 }
  0x1e   : > { %p205_p5 = pnand %p433_p9, %p204_p4 }
  0x1f   : > { %s210_s6 = sand.u32 (!%p205_p5), 1, %s558_s19  }
  0x20   : > { %208 = sbr.rel (%p205_p5) target bundleno = 456 (0x1c8), region = 40  ;;  %s434_s7 = sshll.u32 (!%p205_p5), %s210_s6, 4 }
  0x21   : > { %s211_s8 = scalar_lea.sflag (!%p205_p5), [#allocation3], %s210_s6  ;;  %s214_s9 = scalar_lea.vmem (!%p205_p5), [#allocation2], %s434_s7 }
  0x25   : > { %549 = dma.done.wait (%p640_p7), %s211_s8, 256  }
  0x26   : > { %551 = vsyncadd (%p640_p7), %s211_s8, 4294967040  ;;  %vm254_vm0 = vcmask 261120   ;;  %v250_v0 = vld [vmem:[%s214_s9] sm:$0xff]  ;;  %v251_v2 = vld [vmem:[%s214_s9 + $0x8] sm:$0xff]  ;;  %v570_v4 = vmov 32.0   ;;  %s435_s17 = sshll.u32 %s426_s22, 1 }
  0x27   : > { %v255_v1 = vsel %vm254_vm0, %v250_v0, 0.0  ;;  %v258_v3 = vsel %vm254_vm0, %v251_v2, 0.0  ;;  %496 = vrcp.f32 %v570_v4  ;;  %v450_v21 = vld [vmem:[%s715_s3 + $0x8] sm:$0xff]  ;;  %v449_v23 = vld [vmem:[%s715_s3] sm:$0xff]  ;;  %p244_p6 = scmp.lt.s32.totalorder %s435_s17, 3  ;;  %vm356_vm8 = vcmask 781312  }
  0x28   : > { %256 = vadd.xlane.f32.xlu0 %v255_v1  ;;  %346 = vmatpush.bf16.msra.mxu0 %v450_v21  ;;  %v493_v42 = vld [vmem:[%s713_s1] ss:$0 sm:$0xff] }
  0x29   : > { %v494_v47 = vld [vmem:[%s714_s2] ss:$0 sm:$0xff]  ;;  %s726_s17 = smov (!%p244_p6, %s435_s17), 3 }
  0x2a   : > { %v495_v52 = vld [vmem:[%s716_s4] ss:$0 sm:$0xff]  ;;  %s436_s25 = sshll.u32 %s726_s17, 2 }
  0x2b   : > { %s247_s30 = scalar_lea.vmem %s717_s5, %s436_s25 }
  0x2c   : > { %347 = vmatpush.bf16.msra.mxu0 %v449_v23 }
  0x2d   : > { %v497_v5 = vpop.eup %496 }
  0x2e   : > { %v262_v6 = vmul.f32 32.0, %v497_v5  ;;  %vm266_vm1 = vweird.f32 %v497_v5 }
  0x30   : > { %259 = vadd.xlane.f32.xlu0 %v258_v3  ;;  %v263_v7 = vsub.f32 1.0, %v262_v6 }
  0x32   : > { %v264_v8 = vmul.f32 %v497_v5, %v263_v7 }
  0x34   : > { %v265_v9 = vadd.f32 %v497_v5, %v264_v8 }
  0x36   : > { %v267_v10 = vsel %vm266_vm1, %v497_v5, %v265_v9 }
  0x9b   : > { %v257_v11 = vpop.xlane.xlu0 %256 }
  0x9c   : > { %v268_v12 = vmul.f32 %v267_v10, %v257_v11 }
  0x9e   : > { %v270_v13 = vsub.f32 %v250_v0, %v268_v12 }
  0xa0   : > { %v272_v14 = vmul.f32 %v270_v13, %v270_v13 }
  0xa2   : > { %v274_v15 = vsel %vm254_vm0, %v272_v14, 0.0 }
  0xa3   : > { %275 = vadd.xlane.f32.xlu1 %v274_v15  ;;  %v260_v16 = vpop.xlane.xlu0 %259 }
  0xa4   : > { %v269_v17 = vmul.f32 %v267_v10, %v260_v16 }
  0xa6   : > { %v271_v18 = vsub.f32 %v251_v2, %v269_v17 }
  0xa8   : > { %v273_v19 = vmul.f32 %v271_v18, %v271_v18 }
  0xaa   : > { %v277_v20 = vsel %vm254_vm0, %v273_v19, 0.0 }
  0xab   : > { %278 = vadd.xlane.f32.xlu1 %v277_v20 }
 0x116   : > { %v276_v22 = vpop.xlane.xlu1 %275 }
 0x117   : > { %v280_v24 = vmul.f32 %v276_v22, %v267_v10 }
 0x119   : > { %v282_v25 = vadd.f32 1e-05, %v280_v24 }
 0x11b   : > { %498 = vrsqrt.f32 %v282_v25  ;;  %vm290_vm3 = vweird.f32 %v282_v25 }
 0x11e   : > { %v279_v26 = vpop.xlane.xlu1 %278 }
 0x11f   : > { %v281_v27 = vmul.f32 %v279_v26, %v267_v10 }
 0x121   : > { %v499_v28 = vpop.eup %498  ;;  %v283_v29 = vadd.f32 1e-05, %v281_v27 }
 0x122   : > { %v285_v30 = vmul.f32 %v499_v28, %v282_v25  ;;  %vm291_vm2 = vweird.f32 %v499_v28 }
 0x123   : > { %500 = vrsqrt.f32 %v283_v29  ;;  %vm292_vm4 = vmor %vm290_vm3, %vm291_vm2  ;;  %vm300_vm6 = vweird.f32 %v283_v29 }
 0x124   : > { %v286_v31 = vmul.f32 %v499_v28, %v285_v30 }
 0x126   : > { %v287_v32 = vmul.f32 0.5, %v286_v31 }
 0x128   : > { %v288_v33 = vsub.f32 1.5, %v287_v32 }
 0x129   : > { %v501_v34 = vpop.eup %500 }
 0x12a   : > { %v289_v35 = vmul.f32 %v499_v28, %v288_v33  ;;  %v295_v36 = vmul.f32 %v501_v34, %v283_v29  ;;  %vm301_vm5 = vweird.f32 %v501_v34 }
 0x12b   : > { %vm302_vm7 = vmor %vm300_vm6, %vm301_vm5 }
 0x12c   : > { %v296_v37 = vmul.f32 %v501_v34, %v295_v36  ;;  %v293_v38 = vsel %vm292_vm4, %v499_v28, %v289_v35 }
 0x12d   : > { %v304_v41 = vmul.f32 %v293_v38, %v270_v13 }
 0x12e   : > { %v297_v39 = vmul.f32 0.5, %v296_v37 }
 0x12f   : > { %v309_v46 = vmul.f32 %v493_v42, %v304_v41 }
 0x130   : > { %v298_v40 = vsub.f32 1.5, %v297_v39 }
 0x131   : > { %v314_v49 = vadd.f32 %v494_v47, %v309_v46 }
 0x132   : > { %v299_v43 = vmul.f32 %v501_v34, %v298_v40 }
 0x134   : > { %v303_v44 = vsel %vm302_vm7, %v501_v34, %v299_v43 }
 0x135   : > { %v305_v45 = vmul.f32 %v303_v44, %v271_v18 }
 0x137   : > { %v310_v48 = vmul.f32 %v493_v42, %v305_v45 }
 0x139   : > { %v315_v50 = vadd.f32 %v494_v47, %v310_v48 }
 0x13b   : > { %v316_v51 = vpack.c.bf16 %v315_v50, %v314_v49 }
 0x13d   : > { %445 = vmatmul.msk.bf16.vlgmr.msra.gmra.mxu0 %vm254_vm0, %v316_v51 }
 0x1ba   : > { %v349_v53 = vpop.f32.mrf.mxu0 }
 0x1bb   : > { %v350_v54 = vadd.f32 %v495_v52, %v349_v53 }
 0x1bd   : > { %v354_v55 = vpack.c.bf16 %v350_v54, %v350_v54 }
 0x1bf   : > { %357 = vst.msk [vmem:[%s247_s30] sm:$0xf] %vm356_vm8, %v354_v55 }
 0x1c2   : > { %v351_v56 = vpop.f32.mrf.mxu0 }
 0x1c3   : > { %v352_v57 = vadd.f32 %v495_v52, %v351_v56 }
 0x1c5   : > { %v355_v58 = vpack.c.bf16 %v352_v57, %v352_v57 }
 0x1c7   : > { %358 = vst.msk [vmem:[%s247_s30 + $0x4] sm:$0xf] %vm356_vm8, %v355_v58 }
 0x1c8 PF: > { %p15_p7 = scmp.ge.s32.totalorder %s621_s23, 4   ;;  %s721_s18 = smov %s558_s19 }
 0x1c9   : > { %s722_s19 = smov %s562_s20  ;;  %s723_s20 = smov %s631_s26 }
 0x1ca   : > { %s724_s21 = smov %s621_s23  ;;  %17 = sbr.rel (!%p15_p7) target bundleno = 3 (0x3), region = 80 }
 0x1cf   :  { %381 = vsyncpa [#allocation3], 1 }
 0x1d0   :  { %383 = vsyncpa [#allocation3 + $0x1], 1 }

// kernel: normal_cell_forward.9
= control target key start
LH: loop header
LB: loop body
LE: loop exit
PB: predicated region body
PF: predicated region fallthrough
CT: control target
= control target key end

     0   :  { %s486_s18 = smov 0   ;;  %s521_s0 = inlined_call_operand.vmem [shape: bf16[32,32], index: 0, kind: input, shape index: {}]   ;;  %s522_s1 = inlined_call_operand.vmem [shape: bf16[32,32], index: 1, kind: input, shape index: {}]   ;;  %s523_s2 = inlined_call_operand.vmem [shape: f32[1,32], index: 2, kind: input, shape index: {}]   ;;  %s524_s3 = inlined_call_operand.vmem [shape: f32[32,32], index: 3, kind: input, shape index: {}]   ;;  %s525_s4 = inlined_call_operand.vmem [shape: f32[32,32], index: 4, kind: input, shape index: {}]   ;;  %s526_s5 = inlined_call_operand.vmem [shape: f32[32,32], index: 5, kind: output, shape index: {}]  }
   0x1 LB: > { %s408_s19 = sadd.s32 4294967295, %s454_s18   ;;  %p412_p0 = scmp.ge.s32.totalorder %s454_s18, 1  ;;  %s454_s18 = sphi %s486_s18, %s15_s18  }
   0x2   : > { %p210_p1 = scmp.lt.s32.totalorder %s454_s18, 3 }
   0x4   : > { %p211_p2 = pnand %p412_p0, %p210_p1 }
   0x5   : > { %s413_s22 = sshll.u32 (!%p211_p2), %s408_s19, 1 }
   0x6   : > { %214 = sbr.rel (%p211_p2) target bundleno = 160 (0xa0), region = 40  ;;  %p249_p3 = scmp.lt.s32.totalorder (!%p211_p2), %s413_s22, 3 }
   0xb   : > { %v438_v0 = vld [vmem:[%s522_s1 + $0x8] sm:$0xff]  ;;  %v437_v1 = vld [vmem:[%s522_s1] sm:$0xff]  ;;  %s528_s22 = smov (!%p249_p3, %s413_s22), 3  ;;  %vm300_vm0 = vcmask 261120  }
   0xc   : > { %310 = vmatpush.bf16.msra.mxu0 %v438_v0  ;;  %s414_s25 = sshll.u32 %s528_s22, 2  ;;  %s416_s29 = sshll.u32 %s528_s22, 3  ;;  %v447_v3 = vld [vmem:[%s523_s2] ss:$0 sm:$0xff] }
   0xd   : > { %s252_s28 = scalar_lea.vmem %s521_s0, %s414_s25  ;;  %s258_s7 = scalar_lea.vmem %s524_s3, %s416_s29 }
   0xe   : > { %v436_v2 = vld [vmem:[%s252_s28] sm:$0xff]  ;;  %s264_s12 = scalar_lea.vmem %s525_s4, %s416_s29  ;;  %s270_s15 = scalar_lea.vmem %s526_s5, %s416_s29  ;;  %v319_v11 = vld [vmem:[%s258_s7 + $0x8] sm:$0xff] }
   0xf   : > { %v318_v5 = vld [vmem:[%s258_s7] sm:$0xff]  ;;  %v323_v13 = vld [vmem:[%s264_s12 + $0x8] sm:$0xff] }
  0x10   : > { %311 = vmatpush.bf16.msra.mxu0 %v437_v1  ;;  %v322_v7 = vld [vmem:[%s264_s12] sm:$0xff] }
  0x13   : > { %433 = vmatmul.msk.bf16.vlgmr.msra.gmra.mxu0 %vm300_vm0, %v436_v2 }
  0x90   : > { %v313_v4 = vpop.f32.mrf.mxu0 }
  0x91   : > { %v314_v6 = vadd.f32 %v447_v3, %v313_v4 }
  0x93   : > { %v320_v8 = vadd.f32 %v318_v5, %v314_v6 }
  0x95   : > { %v324_v9 = vadd.f32 %v322_v7, %v320_v8 }
  0x97   : > { %326 = vst.msk [vmem:[%s270_s15] sm:$0xff] %vm300_vm0, %v324_v9 }
  0x98   : > { %v315_v10 = vpop.f32.mrf.mxu0 }
  0x99   : > { %v316_v12 = vadd.f32 %v447_v3, %v315_v10 }
  0x9b   : > { %v321_v14 = vadd.f32 %v319_v11, %v316_v12 }
  0x9d   : > { %v325_v15 = vadd.f32 %v323_v13, %v321_v14 }
  0x9f   : > { %327 = vst.msk [vmem:[%s270_s15 + $0x8] sm:$0xff] %vm300_vm0, %v325_v15 }
  0xa0 PF: > { %s15_s18 = sadd.s32 1, %s454_s18  }
  0xa1   : > { %p12_p4 = scmp.ge.s32.totalorder %s15_s18, 4  }
  0xa3   :  { %14 = sbr.rel (!%p12_p4) target bundleno = 1 (0x1), region = 76 }

// kernel: normal_cell_forward.10
= control target key start
LH: loop header
LB: loop body
LE: loop exit
PB: predicated region body
PF: predicated region fallthrough
CT: control target
= control target key end

     0   :  { %s499_s18 = smov 0   ;;  %s540_s0 = inlined_call_operand.vmem [shape: f32[32,32], index: 0, kind: input, shape index: {}]   ;;  %s541_s1 = inlined_call_operand.vmem [shape: f32[1,32], index: 1, kind: input, shape index: {}]   ;;  %s542_s2 = inlined_call_operand.vmem [shape: f32[1,32], index: 2, kind: input, shape index: {}]   ;;  %s543_s3 = inlined_call_operand.vmem [shape: bf16[32,128], index: 3, kind: input, shape index: {}]   ;;  %s544_s4 = inlined_call_operand.vmem [shape: f32[1,128], index: 4, kind: input, shape index: {}]   ;;  %s545_s5 = inlined_call_operand.vmem [shape: bf16[32,128], index: 5, kind: output, shape index: {}]  }
   0x1 LB: > { %s411_s19 = sadd.s32 4294967295, %s466_s18   ;;  %p415_p0 = scmp.ge.s32.totalorder %s466_s18, 1  ;;  %s466_s18 = sphi %s499_s18, %s15_s18  }
   0x2   : > { %p188_p1 = scmp.lt.s32.totalorder %s466_s18, 3 }
   0x4   : > { %p189_p2 = pnand %p415_p0, %p188_p1 }
   0x5   : > { %s416_s20 = sshll.u32 (!%p189_p2), %s411_s19, 1 }
   0x6   : > { %192 = sbr.rel (%p189_p2) target bundleno = 453 (0x1c5), region = 40  ;;  %p217_p3 = scmp.lt.s32.totalorder (!%p189_p2), %s416_s20, 3 }
   0xb   : > { %s547_s20 = smov (!%p217_p3, %s416_s20), 3  ;;  %vm233_vm0 = vcmask 261120   ;;  %v468_v4 = vmov 32.0   ;;  %v432_v21 = vld [vmem:[%s543_s3 + $0x8] sm:$0xff]  ;;  %v431_v23 = vld [vmem:[%s543_s3] sm:$0xff] }
   0xc   : > { %s417_s21 = sshll.u32 %s547_s20, 3  ;;  %450 = vrcp.f32 %v468_v4  ;;  %325 = vmatpush.bf16.msra.mxu0 %v432_v21  ;;  %v447_v42 = vld [vmem:[%s541_s1] ss:$0 sm:$0xff]  ;;  %s419_s10 = sshll.u32 %s547_s20, 2 }
   0xd   : > { %s220_s24 = scalar_lea.vmem %s540_s0, %s417_s21  ;;  %v448_v47 = vld [vmem:[%s542_s2] ss:$0 sm:$0xff]  ;;  %s226_s13 = scalar_lea.vmem %s545_s5, %s419_s10 }
   0xe   : > { %v229_v0 = vld [vmem:[%s220_s24] sm:$0xff]  ;;  %v230_v2 = vld [vmem:[%s220_s24 + $0x8] sm:$0xff] }
   0xf   : > { %v234_v1 = vsel %vm233_vm0, %v229_v0, 0.0  ;;  %v237_v3 = vsel %vm233_vm0, %v230_v2, 0.0  ;;  %v449_v52 = vld [vmem:[%s544_s4] ss:$0 sm:$0xff] }
  0x10   : > { %235 = vadd.xlane.f32.xlu0 %v234_v1  ;;  %326 = vmatpush.bf16.msra.mxu0 %v431_v23 }
  0x12   : > { %v451_v5 = vpop.eup %450 }
  0x13   : > { %v241_v6 = vmul.f32 32.0, %v451_v5  ;;  %vm245_vm1 = vweird.f32 %v451_v5 }
  0x15   : > { %v242_v7 = vsub.f32 1.0, %v241_v6 }
  0x17   : > { %v243_v8 = vmul.f32 %v451_v5, %v242_v7 }
  0x18   : > { %238 = vadd.xlane.f32.xlu0 %v237_v3 }
  0x19   : > { %v244_v9 = vadd.f32 %v451_v5, %v243_v8 }
  0x1b   : > { %v246_v10 = vsel %vm245_vm1, %v451_v5, %v244_v9 }
  0x83   : > { %v236_v11 = vpop.xlane.xlu0 %235 }
  0x84   : > { %v247_v12 = vmul.f32 %v246_v10, %v236_v11 }
  0x86   : > { %v249_v13 = vsub.f32 %v229_v0, %v247_v12 }
  0x88   : > { %v251_v14 = vmul.f32 %v249_v13, %v249_v13 }
  0x8a   : > { %v253_v15 = vsel %vm233_vm0, %v251_v14, 0.0 }
  0x8b   : > { %254 = vadd.xlane.f32.xlu1 %v253_v15  ;;  %v239_v16 = vpop.xlane.xlu0 %238 }
  0x8c   : > { %v248_v17 = vmul.f32 %v246_v10, %v239_v16 }
  0x8e   : > { %v250_v18 = vsub.f32 %v230_v2, %v248_v17 }
  0x90   : > { %v252_v19 = vmul.f32 %v250_v18, %v250_v18 }
  0x92   : > { %v256_v20 = vsel %vm233_vm0, %v252_v19, 0.0 }
  0x93   : > { %257 = vadd.xlane.f32.xlu1 %v256_v20 }
  0xfe   : > { %v255_v22 = vpop.xlane.xlu1 %254 }
  0xff   : > { %v259_v24 = vmul.f32 %v255_v22, %v246_v10 }
 0x101   : > { %v261_v25 = vadd.f32 1e-05, %v259_v24 }
 0x103   : > { %452 = vrsqrt.f32 %v261_v25  ;;  %vm269_vm3 = vweird.f32 %v261_v25 }
 0x106   : > { %v258_v26 = vpop.xlane.xlu1 %257 }
 0x107   : > { %v260_v27 = vmul.f32 %v258_v26, %v246_v10 }
 0x109   : > { %v453_v28 = vpop.eup %452  ;;  %v262_v29 = vadd.f32 1e-05, %v260_v27 }
 0x10a   : > { %v264_v30 = vmul.f32 %v453_v28, %v261_v25  ;;  %vm270_vm2 = vweird.f32 %v453_v28 }
 0x10b   : > { %454 = vrsqrt.f32 %v262_v29  ;;  %vm271_vm4 = vmor %vm269_vm3, %vm270_vm2  ;;  %vm279_vm6 = vweird.f32 %v262_v29 }
 0x10c   : > { %v265_v31 = vmul.f32 %v453_v28, %v264_v30 }
 0x10e   : > { %v266_v32 = vmul.f32 0.5, %v265_v31 }
 0x110   : > { %v267_v33 = vsub.f32 1.5, %v266_v32 }
 0x111   : > { %v455_v34 = vpop.eup %454 }
 0x112   : > { %v268_v35 = vmul.f32 %v453_v28, %v267_v33  ;;  %v274_v36 = vmul.f32 %v455_v34, %v262_v29  ;;  %vm280_vm5 = vweird.f32 %v455_v34 }
 0x113   : > { %vm281_vm7 = vmor %vm279_vm6, %vm280_vm5 }
 0x114   : > { %v275_v37 = vmul.f32 %v455_v34, %v274_v36  ;;  %v272_v38 = vsel %vm271_vm4, %v453_v28, %v268_v35 }
 0x115   : > { %v283_v41 = vmul.f32 %v272_v38, %v249_v13 }
 0x116   : > { %v276_v39 = vmul.f32 0.5, %v275_v37 }
 0x117   : > { %v288_v46 = vmul.f32 %v447_v42, %v283_v41 }
 0x118   : > { %v277_v40 = vsub.f32 1.5, %v276_v39 }
 0x119   : > { %v293_v49 = vadd.f32 %v448_v47, %v288_v46 }
 0x11a   : > { %v278_v43 = vmul.f32 %v455_v34, %v277_v40 }
 0x11c   : > { %v282_v44 = vsel %vm281_vm7, %v455_v34, %v278_v43 }
 0x11d   : > { %v284_v45 = vmul.f32 %v282_v44, %v250_v18 }
 0x11f   : > { %v289_v48 = vmul.f32 %v447_v42, %v284_v45 }
 0x121   : > { %v294_v50 = vadd.f32 %v448_v47, %v289_v48 }
 0x123   : > { %v295_v51 = vpack.c.bf16 %v294_v50, %v293_v49 }
 0x125   : > { %428 = vmatmul.msk.bf16.vlgmr.msra.gmra.mxu0 %vm233_vm0, %v295_v51 }
 0x1a2   : > { %v328_v53 = vpop.f32.mrf.mxu0 }
 0x1a3   : > { %v329_v54 = vadd.f32 %v449_v52, %v328_v53 }
 0x1a5   : > { %v335_v55 = vmul.f32 0.044715, %v329_v54  ;;  %v333_v6 = vmul.f32 0.5, %v329_v54 }
 0x1a7   : > { %v337_v56 = vmul.f32 %v335_v55, %v329_v54 }
 0x1a9   : > { %v339_v57 = vmul.f32 %v337_v56, %v329_v54 }
 0x1aa   : > { %v330_v58 = vpop.f32.mrf.mxu0 }
 0x1ab   : > { %v341_v59 = vadd.f32 %v339_v57, %v329_v54  ;;  %v331_v60 = vadd.f32 %v449_v52, %v330_v58 }
 0x1ad   : > { %v336_v61 = vmul.f32 0.044715, %v331_v60  ;;  %v343_v62 = vmul.f32 0.7978846, %v341_v59  ;;  %v334_v7 = vmul.f32 0.5, %v331_v60 }
 0x1af   : > { %v338_v63 = vmul.f32 %v336_v61, %v331_v60  ;;  %456 = vtanh.f32 %v343_v62 }
 0x1b1   : > { %v340_v0 = vmul.f32 %v338_v63, %v331_v60 }
 0x1b3   : > { %v342_v1 = vadd.f32 %v340_v0, %v331_v60 }
 0x1b5   : > { %v344_v2 = vmul.f32 0.7978846, %v342_v1  ;;  %v457_v3 = vpop.eup %456 }
 0x1b6   : > { %v347_v4 = vadd.f32 1.0, %v457_v3 }
 0x1b7   : > { %458 = vtanh.f32 %v344_v2 }
 0x1b8   : > { %v349_v9 = vmul.f32 %v347_v4, %v333_v6 }
 0x1bd   : > { %v459_v5 = vpop.eup %458 }
 0x1be   : > { %v348_v8 = vadd.f32 1.0, %v459_v5 }
 0x1c0   : > { %v350_v10 = vmul.f32 %v348_v8, %v334_v7 }
 0x1c2   : > { %v436_v11 = vpack.c.bf16 %v350_v10, %v349_v9 }
 0x1c4   : > { %437 = vst [vmem:[%s226_s13] sm:$0xff] %v436_v11  }
 0x1c5 PF: > { %s15_s18 = sadd.s32 1, %s466_s18  }
 0x1c6   : > { %p12_p4 = scmp.ge.s32.totalorder %s15_s18, 4  }
 0x1c8   :  { %14 = sbr.rel (!%p12_p4) target bundleno = 1 (0x1), region = 70 }

// kernel: normal_cell_forward.8
= control target key start
LH: loop header
LB: loop body
LE: loop exit
PB: predicated region body
PF: predicated region fallthrough
CT: control target
= control target key end

     0   :  { %10 = vsyncpa [#allocation4], 0  ;;  %s4596_s0 = inlined_call_operand.vmem [shape: bf16[2,16,96], index: 0, kind: input, shape index: {}]   ;;  %s4597_s1 = inlined_call_operand.hbm [shape: bf16[4,4,8], index: 1, kind: input, shape index: {}]   ;;  %s4598_s2 = inlined_call_operand.hbm [shape: bf16[4,4,8], index: 2, kind: input, shape index: {}]   ;;  %s4599_s3 = inlined_call_operand.vmem [shape: bf16[4,16], index: 3, kind: input, shape index: {}]   ;;  %s4600_s4 = inlined_call_operand.vmem [shape: bf16[4,16], index: 4, kind: input, shape index: {}]   ;;  %s4601_s5 = inlined_call_operand.vmem [shape: bf16[2,16,32], index: 5, kind: output, shape index: {}]  }
   0x1   :  { %11 = vsyncpa [#allocation6], 0  ;;  %s4008_s18 = smov 0  }
   0x2 LB: > { %s169_s21 = sshll.u32 %s4597_s1, 4  ;;  %s3639_s22 = sadd.s32 4294967295, %s3956_s18   ;;  %s3956_s18 = sphi %s4008_s18, %s17_s18   ;;  %s170_s21 = int_to_ptr.hbm [resolvable:$true] %s169_s21 }
   0x3   : > { %p3641_p0 = scmp.ge.s32.totalorder %s3956_s18, 1  ;;  %p158_p1 = scmp.lt.s32.totalorder %s3956_s18, 3 }
   0x4   : > { %p3739_p2 = scmp.eq.s32.totalorder %s3639_s22, 0  ;;  %s3958_s24 = smov [#allocation3]  }
   0x5   : > { %p4019_p3 = pnand %p3641_p0, %p158_p1  ;;  %s171_s25 = sshll.u32 %s3958_s24, 4  ;;  %s172_s25 = int_to_ptr.vmem [resolvable:$true] %s171_s25 }
   0x6   : > { %s183_s28 = sshll.u32 %s4598_s2, 4  ;;  %s3959_s29 = smov [#allocation5]   ;;  %s184_s28 = int_to_ptr.hbm [resolvable:$true] %s183_s28 }
   0x7   : > { %p3732_p4 = pneg %p4019_p3  ;;  %s185_s30 = sshll.u32 %s3959_s29, 4  ;;  %s186_s30 = int_to_ptr.vmem [resolvable:$true] %s185_s30 }
   0x8   : > { %s3960_s6 = smov 32   ;;  %s3961_s7 = smov 2  }
   0x9   : > { %p3733_p5 = pnand %p3739_p2, %p3732_p4  ;;  %215 = sbr.rel (%p4019_p3) target bundleno = 4660 (0x1234), region = 40 }
   0xb   : > { %3735 = dma.hbm_to_vmem [thread:$0]  (!%p3733_p5), %s170_s21, 128, %s172_s25, [#allocation4], %s3960_s6, %s3960_s6, %s3961_s7  }
   0xc   : > { %3738 = dma.hbm_to_vmem [thread:$0]  (!%p3733_p5), %s184_s28, 128, %s186_s30, [#allocation6], %s3960_s6, %s3960_s6, %s3961_s7  }
   0xe   : > { %3947 = dma.done.wait (%p3739_p2), [#allocation4], 128  }
   0xf   : > { %3949 = vsyncadd (%p3739_p2), [#allocation4], 4294967168 }
  0x10   : > { %3951 = dma.done.wait (%p3739_p2), [#allocation6], 128  }
  0x11   : > { %3953 = vsyncadd (%p3739_p2), [#allocation6], 4294967168  ;;  %p249_p6 = scmp.lt.s32.totalorder %s3639_s22, 1  ;;  %vm276_vm0 = vcmask 1041408   ;;  %vm280_vm1 = vcmask 1043458   ;;  %vm442_vm2 = vcmask 1047556  }
  0x12   : > { %v3962_v17 = vmov 1983009808   ;;  %v3963_v22 = vmov 1934713408   ;;  %vm294_vm3 = vcmask 64512   ;;  %s3964_s12 = smov 96  }
  0x13   : > { %s4604_s22 = smov (!%p249_p6, %s3639_s22), 1  ;;  %v434_v18 = vunpack.c.l.s4 %v3962_v17  ;;  %v447_v23 = vunpack.c.l.s4 %v3963_v22  ;;  %vm697_vm4 = vcmask 1043456   ;;  %vm944_vm5 = vcmask 31744   ;;  %s3965_s17 = smov 120  }
  0x14   : > { %s3718_s8 = sshll.u32 %s4604_s22, 3  ;;  %s3966_s19 = smov 64   ;;  %vm1030_vm6 = vcmask 130048   ;;  %vm1076_vm7 = vcmask 60416   ;;  %vm1902_vm8 = vcmask 126016   ;;  %vm2728_vm9 = vcmask 191616  }
  0x15   : > { %s4043_s11 = scalar_lea.vmem %s4596_s0, %s3718_s8  ;;  %v4087_v20 = vunpack.c.0.s8 %v434_v18  ;;  %v4091_v27 = vunpack.c.0.s8 %v447_v23  ;;  %v260_v18 = vld [vmem:[#allocation3] sm:$0x3]  ;;  %s3967_s20 = smov 88   ;;  %vm3554_vm10 = vcmask 257216   ;;  %vm3559_vm11 = vcmask 257024  }
  0x16   : > { %v270_v0 = vld [vmem:[%s4043_s11] sm:$0xf]  ;;  %v4050_v2 = vld [vmem:[%s4043_s11 + $0x4] sm:$0xf]  ;;  %s3968_s21 = smov 112   ;;  %s3969_s23 = smov 56  }
  0x17   : > { %v4047_v1 = vld [vmem:[%s4043_s11] sm:$0xf]  ;;  %v274_v3 = vrot.slane %v270_v0, 2  ;;  %v2736_v5 = vrot.slane %v4050_v2, 2  ;;  %v271_v11 = vld [vmem:[%s4043_s11 + $0x4] sm:$0xf]  ;;  %s258_s10 = scalar_lea.vmem %s4601_s5, %s3718_s8 }
  0x18   : > { %v2735_v4 = vrot.slane %v4047_v1, 2  ;;  %v275_v12 = vrot.slane %v271_v11, 2  ;;  %s3970_s24 = smov 80   ;;  %s3971_s25 = smov 104  }
  0x19   : > { %v4055_v6 = vsel %vm276_vm0, %v270_v0, %v274_v3  ;;  %v4058_v7 = vsel %vm280_vm1, %v270_v0, %v274_v3  ;;  %v4071_v10 = vsel %vm276_vm0, %v4050_v2, %v2736_v5  ;;  %s3972_s26 = smov 48   ;;  %s3973_s27 = smov 72  }
  0x1a   : > { %v4064_v8 = vsel %vm276_vm0, %v4047_v1, %v2735_v4  ;;  %v283_v9 = vrot.slane %v4058_v7, 2  ;;  %v4078_v13 = vsel %vm280_vm1, %v271_v11, %v275_v12  ;;  %v4082_v15 = vsel %vm276_vm0, %v271_v11, %v275_v12  ;;  %v262_v11 = vld [vmem:[#allocation3 + $0x4] sm:$0x3]  ;;  %v263_v12 = vld [vmem:[#allocation3 + $0x6] sm:$0x3]  ;;  %s3974_s28 = smov 40  }
  0x1b   : > { %v289_v14 = vrot.slane %v4078_v13, 2  ;;  %v4111_v17 = vsel %vm294_vm3, %v263_v12, 0  ;;  %s3975_s29 = smov 8   ;;  %s3976_s30 = smov 16  }
  0x1c   : > { %3773 = vxpose.binary.xlu0.c.b16.start.end [1/2] (short) (narrow) %v283_v9, %v4055_v6, 16  ;;  %s3977_s6 = smov 24  }
  0x1d   : > { %363 = vmatpush.bf16.xpose.msra.mxu3 %v4111_v17 }
  0x24   : > { %3655 = vmatmul.msk.bf16.vlgmr.msra.gmra.mxu3 %vm294_vm3, %v289_v14 }
  0x2c   : > { %3776 = vxpose.binary.xlu0.c.b16.start.end [1/2] (short) (narrow) %v289_v14, %v4082_v15, 16 }
  0xc8   : > { %v3774_v16 = vpop.trf.xlu0 }
  0xc9   : > { %v436_v21 = vperm.slane %v3774_v16, %v4087_v20  ;;  %v4108_v16 = vsel %vm294_vm3, %v262_v11, 0 }
  0xca   : > { %344 = vmatpush.bf16.xpose.msra.mxu2 %v4108_v16 }
  0xcb   : > { %v444_v25 = vrot.slane %v436_v21, 4 }
  0xd0   : > { %v3775_v19 = vpop.trf.xlu0 }
  0xd1   : > { %v461_v29 = vperm.slane %v3775_v19, %v4087_v20  ;;  %v261_v19 = vld [vmem:[#allocation3 + $0x2] sm:$0x3]  ;;  %3654 = vmatmul.msk.bf16.vlgmr.msra.gmra.mxu2 %vm294_vm3, %v4082_v15 }
  0xd2   : > { %v4119_v22 = vsel %vm294_vm3, %v261_v19, 0 }
  0xd3   : > { %v468_v32 = vrot.slane %v461_v29, 4  ;;  %326 = vmatpush.bf16.xpose.msra.mxu1 %v4119_v22 }
  0xd8   : > { %v3777_v24 = vpop.trf.xlu0 }
  0xd9   : > { %v440_v26 = vperm.slane %v3777_v24, %v4087_v20 }
  0xda   : > { %3653 = vmatmul.msk.bf16.vlgmr.msra.gmra.mxu1 %vm294_vm3, %v283_v9 }
  0xdb   : > { %v445_v28 = vsel %vm442_vm2, %v440_v26, %v444_v25  ;;  %v441_v42 = vrot.slane %v440_v26, 4  ;;  %v4134_v26 = vld [vmem:[%s4043_s11] sm:$0xff] }
  0xdc   : > { %v453_v30 = vperm.slane %v445_v28, %v4091_v27  ;;  %968 = vrot.lane.b32.xlu0 %v4134_v26, %s3964_s12 }
  0xdd   : > { %v443_v49 = vsel %vm442_vm2, %v441_v42, %v436_v21  ;;  %v4116_v21 = vsel %vm294_vm3, %v260_v18, 0 }
  0xde   : > { %v456_v34 = vrot.slane %v453_v30, 4  ;;  %v502_v38 = vshrl.u32 %v453_v30, 16  ;;  %v449_v53 = vperm.slane %v443_v49, %v4091_v27  ;;  %307 = vmatpush.bf16.xpose.msra.mxu0 %v4116_v21 }
  0xe0   : > { %v3778_v31 = vpop.trf.xlu0  ;;  %v457_v40 = vsel %vm442_vm2, 0, %v456_v34  ;;  %v454_v55 = vrot.slane %v449_v53, 4  ;;  %v486_v58 = vshrl.u32 %v449_v53, 16 }
  0xe1   : > { %v465_v33 = vperm.slane %v3778_v31, %v4087_v20  ;;  %v510_v47 = vshrl.u32 %v457_v40, 16 }
  0xe2   : > { %v455_v59 = vsel %vm442_vm2, 0, %v454_v55 }
  0xe3   : > { %v469_v35 = vsel %vm442_vm2, %v465_v33, %v468_v32  ;;  %v466_v37 = vrot.slane %v465_v33, 4  ;;  %v494_v63 = vshrl.u32 %v455_v59, 16 }
  0xe4   : > { %v477_v36 = vperm.slane %v469_v35, %v4091_v27 }
  0xe5   : > { %v467_v46 = vsel %vm442_vm2, %v466_v37, %v461_v29  ;;  %3652 = vmatmul.msk.bf16.vlgmr.msra.gmra.mxu0 %vm294_vm3, %v4055_v6 }
  0xe6   : > { %v503_v39 = vshrl.u32 %v477_v36, 16  ;;  %v480_v41 = vrot.slane %v477_v36, 4  ;;  %v500_v43 = vpack.i.b16 %v477_v36, %v453_v30  ;;  %v473_v52 = vperm.slane %v467_v46, %v4091_v27 }
  0xe8   : > { %v504_v44 = vpack.i.b16 %v503_v39, %v502_v38  ;;  %v481_v45 = vsel %vm442_vm2, 0, %v480_v41  ;;  %v478_v54 = vrot.slane %v473_v52, 4  ;;  %v487_v56 = vshrl.u32 %v473_v52, 16 }
  0xe9   : > { %v511_v48 = vshrl.u32 %v481_v45, 16  ;;  %v508_v50 = vpack.i.b16 %v481_v45, %v457_v40  ;;  %v484_v61 = vpack.i.b16 %v473_v52, %v449_v53 }
  0xea   : > { %3785 = vxpose.binary.xlu2.c.b16.start.end [1/2] (short) (narrow) %v504_v44, %v500_v43, 16  ;;  %v479_v57 = vsel %vm442_vm2, 0, %v478_v54  ;;  %v488_v62 = vpack.i.b16 %v487_v56, %v486_v58 }
  0xeb   : > { %v512_v51 = vpack.i.b16 %v511_v48, %v510_v47  ;;  %v495_v60 = vshrl.u32 %v479_v57, 16  ;;  %v492_v0 = vpack.i.b16 %v479_v57, %v455_v59  ;;  %v4152_v57 = vld [vmem:[#allocation5] sm:$0x3] }
  0xed   : > { %3779 = vxpose.binary.xlu1.c.b16.start.end [1/2] (short) (narrow) %v512_v51, %v508_v50, 16  ;;  %v496_v3 = vpack.i.b16 %v495_v60, %v494_v63 }
  0xfa   : > { %3788 = vxpose.binary.xlu2.c.b16.start.end [1/2] (short) (narrow) %v488_v62, %v484_v61, 16  ;;  %v4156_v61 = vld [vmem:[#allocation5 + $0x2] sm:$0x3]  ;;  %v4158_v62 = vld [vmem:[#allocation5 + $0x4] sm:$0x3] }
  0xfd   : > { %3782 = vxpose.binary.xlu1.c.b16.start.end [1/2] (short) (narrow) %v496_v3, %v492_v0, 16  ;;  %v4165_v0 = vld [vmem:[#allocation5 + $0x6] sm:$0x3]  ;;  %v268_v3 = vld [vmem:[%s4599_s3] sm:$0x3] }
  0xfe   : > { %v4175_v11 = vsel %vm276_vm0, %v268_v3, 0 }
 0x154   : > { %v346_v19 = vpop.f32.mrf.mxu2 }
 0x155   : > { %936 = vst [vmem:[#allocation1 + $0x10] ss:$2 sm:$0xff] %v346_v19 }
 0x157   : > { %v328_v18 = vpop.f32.mrf.mxu1 }
 0x158   : > { %934 = vst [vmem:[#allocation1 + $0x1] ss:$2 sm:$0xff] %v328_v18 }
 0x162   : > { %v309_v12 = vpop.f32.mrf.mxu0 }
 0x163   : > { %932 = vst [vmem:[#allocation1] ss:$2 sm:$0xff] %v309_v12 }
 0x18b   : > { %v3786_v23 = vpop.trf.xlu2 }
 0x18c   : > { %v642_v13 = vrot.slane %v3786_v23, 4  ;;  %v365_v23 = vpop.f32.mrf.mxu3 }
 0x18d   : > { %938 = vst [vmem:[#allocation1 + $0x11] ss:$2 sm:$0xff] %v365_v23 }
 0x193   : > { %v3787_v25 = vpop.trf.xlu2 }
 0x194   : > { %v662_v32 = vrot.slane %v3787_v25, 4 }
 0x199   : > { %v3780_v24 = vpop.trf.xlu1 }
 0x19a   : > { %v648_v29 = vrot.slane %v3780_v24, 4  ;;  %v969_v24 = vpop.permute.xlu0 %968 }
 0x19b   : > { %v3789_v28 = vpop.trf.xlu2  ;;  %v974_v25 = vsel %vm294_vm3, %v969_v24, 0 }
 0x19c   : > { %v643_v30 = vsel %vm442_vm2, %v642_v13, %v3789_v28  ;;  %v311_v28 = vpop.f32.mrf.mxu0  ;;  %v939_v13 = vld.sshfl [vmem:[#allocation1] sm:$0xff pattern:$0x75316420] }
 0x19d   : > { %v647_v9 = vperm.slane %v643_v30, %v4087_v20  ;;  %v940_v30 = vld.sshfl [vmem:[#allocation1 + $0x10] sm:$0xff pattern:$0x75316420] }
 0x1a1   : > { %v3781_v15 = vpop.trf.xlu1 }
 0x1a2   : > { %v668_v35 = vrot.slane %v3781_v15, 4  ;;  %v330_v15 = vpop.f32.mrf.mxu1 }
 0x1a3   : > { %v3790_v33 = vpop.trf.xlu2 }
 0x1a4   : > { %v663_v37 = vsel %vm442_vm2, %v662_v32, %v3790_v33 }
 0x1a5   : > { %v667_v41 = vperm.slane %v663_v37, %v4087_v20 }
 0x1a9   : > { %v3783_v14 = vpop.trf.xlu1 }
 0x1aa   : > { %v649_v6 = vsel %vm442_vm2, %v648_v29, %v3783_v14  ;;  %v348_v29 = vpop.f32.mrf.mxu2  ;;  %v367_v14 = vpop.f32.mrf.mxu3 }
 0x1ab   : > { %v653_v7 = vperm.slane %v649_v6, %v4087_v20  ;;  %v943_v6 = vpack.c.bf16 %v940_v30, %v939_v13 }
 0x1ad   : > { %v654_v31 = vrot.slane %v653_v7, 4 }
 0x1af   : > { %v655_v34 = vsel %vm442_vm2, %v654_v31, %v647_v9 }
 0x1b0   : > { %v659_v39 = vperm.slane %v655_v34, %v4091_v27 }
 0x1b1   : > { %v3784_v36 = vpop.trf.xlu1 }
 0x1b2   : > { %v669_v38 = vsel %vm442_vm2, %v668_v35, %v3784_v36  ;;  %v660_v43 = vrot.slane %v659_v39, 4  ;;  %v685_v46 = vshrl.u32 %v659_v39, 16 }
 0x1b3   : > { %v673_v40 = vperm.slane %v669_v38, %v4087_v20  ;;  %v1079_v38 = vld [vmem:[%s4043_s11] sm:$0xf] }
 0x1b4   : > { %v661_v49 = vsel %vm442_vm2, 0, %v660_v43  ;;  %v1080_v43 = vld [vmem:[%s4043_s11 + $0x4] sm:$0xf] }
 0x1b5   : > { %v674_v42 = vrot.slane %v673_v40, 4  ;;  %v691_v55 = vshrl.u32 %v661_v49, 16 }
 0x1b7   : > { %v675_v44 = vsel %vm442_vm2, %v674_v42, %v667_v41  ;;  %v1083_v42 = vrot.slane %v1079_v38, 2 }
 0x1b8   : > { %v679_v45 = vperm.slane %v675_v44, %v4091_v27 }
 0x1b9   : > { %v1088_v44 = vsel %vm280_vm1, %v1079_v38, %v1083_v42  ;;  %v1087_v28 = vsel %vm276_vm0, %v1079_v38, %v1083_v42 }
 0x1ba   : > { %v684_v47 = vpack.i.b16 %v679_v45, %v659_v39  ;;  %v686_v48 = vshrl.u32 %v679_v45, 16  ;;  %v680_v50 = vrot.slane %v679_v45, 4  ;;  %v269_v39 = vld [vmem:[%s4600_s4] sm:$0x3] }
 0x1bb   : > { %v4189_v40 = vsel %vm276_vm0, %v269_v39, 0 }
 0x1bc   : > { %v699_v51 = vsel %vm697_vm4, %v684_v47, 0  ;;  %v687_v52 = vpack.i.b16 %v686_v48, %v685_v46  ;;  %v681_v53 = vsel %vm442_vm2, 0, %v680_v50  ;;  %v1084_v46 = vrot.slane %v1080_v43, 2 }
 0x1bd   : > { %708 = vmatpush.bf16.msrb.mxu0 %v699_v51  ;;  %v690_v54 = vpack.i.b16 %v681_v53, %v661_v49  ;;  %v692_v56 = vshrl.u32 %v681_v53, 16  ;;  %v1090_v47 = vrot.slane %v1088_v44, 2 }
 0x1be   : > { %v718_v58 = vsel %vm697_vm4, %v687_v52, 0  ;;  %v1094_v49 = vsel %vm280_vm1, %v1080_v43, %v1084_v46 }
 0x1bf   : > { %727 = vmatpush.bf16.msrb.mxu1 %v718_v58  ;;  %v737_v59 = vsel %vm697_vm4, %v690_v54, 0  ;;  %v693_v60 = vpack.i.b16 %v692_v56, %v691_v55  ;;  %1187 = vst [vmem:[#allocation1 + $0x20] ss:$4 sm:$0xff] %v1090_v47  ;;  %v1096_v51 = vrot.slane %v1094_v49, 2 }
 0x1c0   : > { %746 = vmatpush.bf16.msrb.mxu2 %v737_v59  ;;  %3656 = vmatmul.msk.bf16.vlgmr.msrb.gmra.mxu0 %vm294_vm3, %v4152_v57 }
 0x1c1   : > { %v756_v63 = vsel %vm697_vm4, %v693_v60, 0  ;;  %958 = vmatpush.bf16.msra.mxu0 %v4175_v11 }
 0x1c2   : > { %765 = vmatpush.bf16.msrb.mxu3 %v756_v63  ;;  %3657 = vmatmul.msk.bf16.vlgmr.msrb.gmra.mxu1 %vm294_vm3, %v4156_v61 }
 0x1c3   : > { %3658 = vmatmul.msk.bf16.vlgmr.msrb.gmra.mxu2 %vm294_vm3, %v4158_v62  ;;  %983 = vmatpush.bf16.xpose.msra.mxu1 %v974_v25 }
 0x1c4   : > { %1019 = vmatpush.bf16.msra.mxu2 %v4189_v40 }
 0x1c5   : > { %3659 = vmatmul.msk.bf16.vlgmr.msrb.gmra.mxu3 %vm294_vm3, %v4165_v0  ;;  %1112 = vmatpush.bf16.xpose.msrb.mxu0 %v4116_v21 }
 0x1c6   : > { %v1188_v55 = vld.sshfl [vmem:[#allocation1 + $0x20] sm:$0xff pattern:$0x73625140] }
 0x1c7   : > { %1193 = vst [vmem:[#allocation1 + $0x20] ss:$4 sm:$0xff] %v1096_v51  ;;  %1198 = vrot.lane.b32.xlu0 %v1188_v55, %s3965_s17 }
 0x1c8   : > { %1155 = vmatpush.bf16.xpose.msrb.mxu2 %v4108_v16 }
 0x1cb   : > { %1134 = vmatpush.bf16.xpose.msrb.mxu1 %v4119_v22 }
 0x1ce   : > { %v1194_v15 = vld.sshfl [vmem:[#allocation1 + $0x20] sm:$0xff pattern:$0x73625140] }
 0x1cf   : > { %1202 = vrot.lane.b32.xlu0 %v1194_v15, %s3965_s17 }
 0x1d0   : > { %3660 = vmatmul.msk.bf16.vlgmr.msra.gmra.mxu0 %vm944_vm5, %v943_v6  ;;  %v1093_v6 = vsel %vm276_vm0, %v1080_v43, %v1084_v46 }
 0x1d2   : > { %3665 = vmatmul.msk.bf16.vlgmr.msra.gmra.mxu1 %vm294_vm3, %v4134_v26 }
 0x1d7   : > { %1054 = vrot.lane.b32.xlu0 %v4134_v26, %s3966_s19 }
 0x239   : > { %v1199_v38 = vpop.permute.xlu0 %1198 }
 0x23d   : > { %v710_v7 = vpop.f32.mrf.mxu0 }
 0x23f   : > { %v729_v9 = vpop.f32.mrf.mxu1 }
 0x240   : > { %803 = vxpose.xlu2.b32.start.end [1/1] (short) (narrow) %v729_v9, 8  ;;  %v1905_v9 = vld [vmem:[%s4043_s11] sm:$0xf] }
 0x241   : > { %v1203_v39 = vpop.permute.xlu0 %1202 }
 0x245   : > { %v712_v31 = vpop.f32.mrf.mxu0 }
 0x246   : > { %v748_v32 = vpop.f32.mrf.mxu2  ;;  %v1909_v31 = vrot.slane %v1905_v9, 2 }
 0x247   : > { %835 = vxpose.xlu1.b32.start.end [1/1] (short) (narrow) %v748_v32, 8  ;;  %v731_v33 = vpop.f32.mrf.mxu1 }
 0x248   : > { %v767_v34 = vpop.f32.mrf.mxu3  ;;  %v4214_v32 = vsel %vm276_vm0, %v1905_v9, %v1909_v31  ;;  %v4217_v33 = vsel %vm280_vm1, %v1905_v9, %v1909_v31 }
 0x249   : > { %867 = vxpose.xlu2.b32.start.end [1/1] (short) (narrow) %v767_v34, 8  ;;  %v1916_v34 = vrot.slane %v4217_v33, 2 }
 0x24b   : > { %2013 = vst [vmem:[#allocation1 + $0x20] ss:$4 sm:$0xff] %v1916_v34 }
 0x24d   : > { %v960_v42 = vpop.f32.mrf.mxu0 }
 0x24e   : > { %v750_v35 = vpop.f32.mrf.mxu2 }
 0x24f   : > { %771 = vxpose.xlu1.b32.start.end [1/1] (short) (narrow) %v710_v7, 8  ;;  %v985_v43 = vpop.f32.mrf.mxu1 }
 0x250   : > { %v769_v36 = vpop.f32.mrf.mxu3  ;;  %v986_v44 = vadd.f32 %v985_v43, %v960_v42 }
 0x257   : > { %v987_v49 = vpop.f32.mrf.mxu1 }
 0x2d9   : > { %v819_v37 = vpop.trf.xlu2 }
 0x2e2   : > { %v883_v41 = vpop.trf.xlu2 }
 0x2e3   : > { %v906_v45 = vrot.slane %v883_v41, 4  ;;  %v1055_v41 = vpop.permute.xlu0 %1054 }
 0x2e4   : > { %1067 = vmatpush.bf16.msra.mxu3 %v1055_v41 }
 0x2e5   : > { %v907_v50 = vsel %vm442_vm2, %v906_v45, %v819_v37 }
 0x2e6   : > { %v911_v52 = vperm.slane %v907_v50, %v4087_v20 }
 0x2e8   : > { %v912_v58 = vrot.slane %v911_v52, 4  ;;  %1177 = vmatpush.bf16.xpose.msrb.mxu3 %v4111_v17 }
 0x2eb   : > { %v851_v48 = vpop.trf.xlu1 }
 0x2ec   : > { %v899_v53 = vrot.slane %v851_v48, 4  ;;  %v962_v48 = vpop.f32.mrf.mxu0 }
 0x2f3   : > { %v787_v54 = vpop.trf.xlu1 }
 0x2f4   : > { %v901_v56 = vsel %vm442_vm2, %v899_v53, %v787_v54 }
 0x2f5   : > { %v905_v59 = vperm.slane %v901_v56, %v4087_v20 }
 0x2f7   : > { %v913_v60 = vsel %vm442_vm2, %v912_v58, %v905_v59  ;;  %v914_v63 = vrot.slane %v905_v59, 4 }
 0x2f8   : > { %v919_v3 = vperm.slane %v913_v60, %v4091_v27 }
 0x2f9   : > { %v915_v12 = vsel %vm442_vm2, %v911_v52, %v914_v63 }
 0x2fa   : > { %v923_v18 = vperm.slane %v915_v12, %v4091_v27  ;;  %v924_v19 = vrot.slane %v919_v3, 4  ;;  %994 = vst [vmem:[#allocation1] ss:$2 sm:$0xff] %v919_v3 }
 0x2fc   : > { %v925_v23 = vsel %vm442_vm2, 0.0, %v924_v19  ;;  %v926_v24 = vrot.slane %v923_v18, 4  ;;  %998 = vst [vmem:[#allocation1 + $0x10] ss:$2 sm:$0xff] %v923_v18 }
 0x2fd   : > { %996 = vst [vmem:[#allocation1 + $0x1] ss:$2 sm:$0xff] %v925_v23 }
 0x2fe   : > { %v927_v25 = vsel %vm442_vm2, 0.0, %v926_v24 }
 0x2ff   : > { %1000 = vst [vmem:[#allocation1 + $0x11] ss:$2 sm:$0xff] %v927_v25 }
 0x304   : > { %v1001_v13 = vld.sshfl [vmem:[#allocation1] sm:$0xff pattern:$0x75316420] }
 0x306   : > { %v1002_v29 = vld.sshfl [vmem:[#allocation1 + $0x10] sm:$0xff pattern:$0x75316420] }
 0x307   : > { %v1005_v14 = vpack.c.bf16 %v1002_v29, %v1001_v13  ;;  %1097 = vst [vmem:[#allocation1] ss:$4 sm:$0xff] %v1087_v28 }
 0x309   : > { %3666 = vmatmul.msk.bf16.vlgmr.msra.gmra.mxu2 %vm944_vm5, %v1005_v14 }
 0x30e   : > { %v1098_v30 = vld.sshfl [vmem:[#allocation1] sm:$0xff pattern:$0x73625140] }
 0x30f   : > { %1119 = vst [vmem:[#allocation1] ss:$4 sm:$0xff] %v1090_v47 }
 0x316   : > { %v1120_v7 = vld.sshfl [vmem:[#allocation1] sm:$0xff pattern:$0x73625140] }
 0x317   : > { %1140 = vst [vmem:[#allocation1] ss:$4 sm:$0xff] %v1093_v6 }
 0x31e   : > { %v1141_v26 = vld.sshfl [vmem:[#allocation1] sm:$0xff pattern:$0x73625140] }
 0x31f   : > { %1162 = vst [vmem:[#allocation1] ss:$4 sm:$0xff] %v1096_v51  ;;  %v988_v51 = vadd.f32 %v987_v49, %v962_v48 }
 0x326   : > { %v1163_v35 = vld.sshfl [vmem:[#allocation1] sm:$0xff pattern:$0x73625140] }
 0x327   : > { %1183 = vst [vmem:[#allocation1] ss:$4 sm:$0xff] %v1087_v28 }
 0x32e   : > { %v1184_v36 = vld.sshfl [vmem:[#allocation1] sm:$0xff pattern:$0x73625140] }
 0x32f   : > { %1190 = vst [vmem:[#allocation1] ss:$4 sm:$0xff] %v1093_v6  ;;  %1196 = vrot.lane.b32.xlu0 %v1184_v36, %s3965_s17 }
 0x336   : > { %v1191_v37 = vld.sshfl [vmem:[#allocation1] sm:$0xff pattern:$0x73625140] }
 0x337   : > { %1200 = vrot.lane.b32.xlu1 %v1191_v37, %s3965_s17 }
 0x38c   : > { %v1021_v45 = vpop.f32.mrf.mxu2 }
 0x38d   : > { %v1026_v46 = vadd.f32 %v1021_v45, %v986_v44 }
 0x38f   : > { %v1028_v47 = vmul.f32 0.35355338, %v1026_v46 }
 0x391   : > { %v1031_v50 = vsel %vm1030_vm6, %v1028_v47, -inf }
 0x392   : > { %1032 = vmax.xlane.f32.xlu1 %v1031_v50 }
 0x394   : > { %v1023_v52 = vpop.f32.mrf.mxu2 }
 0x395   : > { %v1027_v53 = vadd.f32 %v1023_v52, %v988_v51 }
 0x397   : > { %v1029_v54 = vmul.f32 0.35355338, %v1027_v53 }
 0x399   : > { %v1034_v55 = vsel %vm1030_vm6, %v1029_v54, -inf }
 0x39a   : > { %1035 = vmax.xlane.f32.xlu2 %v1034_v55 }
 0x3a1   : > { %v1197_v58 = vpop.permute.xlu0 %1196 }
 0x3a9   : > { %v1201_v56 = vpop.permute.xlu1 %1200 }
 0x3c3   : > { %3794 = vxpose.binary.xlu2.c.b16.start.end [1/2] (short) (narrow) %v1203_v39, %v1201_v56, 16 }
 0x3cc   : > { %3791 = vxpose.binary.xlu1.c.b16.start.end [1/2] (short) (narrow) %v1199_v38, %v1197_v58, 16 }
 0x405   : > { %v1033_v59 = vpop.xlane.xlu1 %1032 }
 0x406   : > { %v1037_v60 = vsub.f32 %v1028_v47, %v1033_v59 }
 0x408   : > { %v1039_v63 = vmul.f32 1.442695, %v1037_v60 }
 0x40a   : > { %3845 = vpow2.f32 %v1039_v63 }
 0x40d   : > { %v1036_v18 = vpop.xlane.xlu2 %1035 }
 0x40e   : > { %v1038_v19 = vsub.f32 %v1029_v54, %v1036_v18 }
 0x410   : > { %v4227_v3 = vpop.eup %3845  ;;  %v1041_v23 = vmul.f32 1.442695, %v1038_v19 }
 0x411   : > { %v1043_v12 = vsel %vm1030_vm6, %v4227_v3, 0.0 }
 0x412   : > { %1044 = vadd.xlane.f32.xlu0 %v1043_v12  ;;  %3847 = vpow2.f32 %v1041_v23 }
 0x418   : > { %v3848_v24 = vpop.eup %3847 }
 0x419   : > { %v1046_v25 = vsel %vm1030_vm6, %v3848_v24, 0.0 }
 0x426   : > { %1100 = vrot.lane.b32.xlu1 %v1098_v30, %s3965_s17  ;;  %1165 = vrot.lane.b32.xlu0 %v1163_v35, %s3965_s17 }
 0x42e   : > { %1122 = vrot.lane.b32.xlu0 %v1120_v7, %s3965_s17 }
 0x434   : > { %1047 = vadd.xlane.f32.xlu2 %v1046_v25 }
 0x44c   : > { %1143 = vrot.lane.b32.xlu2 %v1141_v26, %s3965_s17 }
 0x464   : > { %v3795_v15 = vpop.trf.xlu2 }
 0x465   : > { %v1279_v29 = vperm.slane %v3795_v15, %v4087_v20 }
 0x467   : > { %v1280_v43 = vrot.slane %v1279_v29, 4 }
 0x46c   : > { %v3796_v9 = vpop.trf.xlu2 }
 0x46d   : > { %v1303_v35 = vperm.slane %v3796_v9, %v4087_v20 }
 0x46f   : > { %v1304_v39 = vrot.slane %v1303_v35, 4 }
 0x478   : > { %v3792_v28 = vpop.trf.xlu1 }
 0x479   : > { %v1275_v13 = vperm.slane %v3792_v28, %v4087_v20 }
 0x47b   : > { %v1282_v14 = vrot.slane %v1275_v13, 4  ;;  %v1281_v48 = vsel %vm442_vm2, %v1280_v43, %v1275_v13 }
 0x47c   : > { %v1287_v52 = vperm.slane %v1281_v48, %v4091_v27 }
 0x47d   : > { %v1283_v30 = vsel %vm442_vm2, %v1279_v29, %v1282_v14 }
 0x47e   : > { %v1291_v6 = vperm.slane %v1283_v30, %v4091_v27  ;;  %v1292_v55 = vrot.slane %v1287_v52, 4 }
 0x480   : > { %v3793_v31 = vpop.trf.xlu1  ;;  %v1294_v37 = vrot.slane %v1291_v6, 4  ;;  %v1293_v60 = vsel %vm442_vm2, 0, %v1292_v55  ;;  %v1340_v28 = vshrl.u32 %v1291_v6, 16 }
 0x481   : > { %v1299_v7 = vperm.slane %v3793_v31, %v4087_v20  ;;  %v1332_v12 = vshrl.u32 %v1293_v60, 16 }
 0x482   : > { %v1295_v41 = vsel %vm442_vm2, 0, %v1294_v37  ;;  %v1324_v37 = vshrl.u32 %v1287_v52, 16 }
 0x483   : > { %v1306_v36 = vrot.slane %v1299_v7, 4  ;;  %v1305_v45 = vsel %vm442_vm2, %v1304_v39, %v1299_v7  ;;  %v1348_v46 = vshrl.u32 %v1295_v41, 16 }
 0x484   : > { %v1311_v51 = vperm.slane %v1305_v45, %v4091_v27 }
 0x485   : > { %v1307_v26 = vsel %vm442_vm2, %v1303_v35, %v1306_v36  ;;  %v1045_v53 = vpop.xlane.xlu0 %1044 }
 0x486   : > { %v1315_v38 = vperm.slane %v1307_v26, %v4091_v27  ;;  %v1316_v54 = vrot.slane %v1311_v51, 4  ;;  %3849 = vrcp.f32 %v1045_v53  ;;  %v1325_v36 = vshrl.u32 %v1311_v51, 16 }
 0x487   : > { %v1322_v26 = vpack.i.b16 %v1311_v51, %v1287_v52 }
 0x488   : > { %v1318_v42 = vrot.slane %v1315_v38, 4  ;;  %v1317_v56 = vsel %vm442_vm2, 0, %v1316_v54  ;;  %v1341_v15 = vshrl.u32 %v1315_v38, 16  ;;  %v1338_v29 = vpack.i.b16 %v1315_v38, %v1291_v6  ;;  %v4259_v6 = vld [vmem:[%s4043_s11] sm:$0xff] }
 0x489   : > { %v1333_v63 = vshrl.u32 %v1317_v56, 16  ;;  %v1330_v18 = vpack.i.b16 %v1317_v56, %v1293_v60  ;;  %v1326_v39 = vpack.i.b16 %v1325_v36, %v1324_v37  ;;  %1790 = vrot.lane.b32.xlu1 %v4259_v6, %s3967_s20 }
 0x48a   : > { %v1319_v44 = vsel %vm442_vm2, 0, %v1318_v42  ;;  %v1342_v14 = vpack.i.b16 %v1341_v15, %v1340_v28 }
 0x48b   : > { %v1349_v47 = vshrl.u32 %v1319_v44, 16  ;;  %v1346_v49 = vpack.i.b16 %v1319_v44, %v1295_v41  ;;  %v1334_v19 = vpack.i.b16 %v1333_v63, %v1332_v12 }
 0x48c   : > { %v3850_v13 = vpop.eup %3849 }
 0x48d   : > { %v1350_v50 = vpack.i.b16 %v1349_v47, %v1348_v46  ;;  %v1051_v9 = vmul.f32 %v3850_v13, %v4227_v3 }
 0x48f   : > { %3797 = vxpose.binary.xlu0.c.b16.start.end [1/2] (short) (narrow) %v1350_v50, %v1346_v49, 16 }
 0x498   : > { %v1166_v58 = vpop.permute.xlu0 %1165  ;;  %v1101_v59 = vpop.permute.xlu1 %1100 }
 0x499   : > { %3668 = vmatmul.msk.bf16.vlgmr.msrb.gmra.mxu0 %vm294_vm3, %v1101_v59 }
 0x49f   : > { %3800 = vxpose.binary.xlu0.c.b16.start.end [1/2] (short) (narrow) %v1334_v19, %v1330_v18, 16 }
 0x4a0   : > { %v1123_v23 = vpop.permute.xlu0 %1122 }
 0x4a1   : > { %3669 = vmatmul.msk.bf16.vlgmr.msrb.gmra.mxu1 %vm294_vm3, %v1123_v23 }
 0x4a7   : > { %v1048_v25 = vpop.xlane.xlu2 %1047 }
 0x4a8   : > { %3851 = vrcp.f32 %v1048_v25 }
 0x4ae   : > { %v3852_v30 = vpop.eup %3851 }
 0x4af   : > { %v1052_v31 = vmul.f32 %v3852_v30, %v3848_v24  ;;  %3803 = vxpose.binary.xlu0.c.b16.start.end [1/2] (short) (narrow) %v1342_v14, %v1338_v29, 16  ;;  %v1144_v7 = vpop.permute.xlu2 %1143 }
 0x4b0   : > { %3670 = vmatmul.msk.bf16.vlgmr.msrb.gmra.mxu2 %vm294_vm3, %v1144_v7 }
 0x4b1   : > { %v1053_v35 = vpack.c.bf16 %v1052_v31, %v1051_v9 }
 0x4b3   : > { %3667 = vmatmul.msk.bf16.vlgmr.msra.gmra.mxu3 %vm1030_vm6, %v1053_v35 }
 0x4bf   : > { %3806 = vxpose.binary.xlu0.c.b16.start.end [1/2] (short) (narrow) %v1326_v39, %v1322_v26, 16 }
 0x4c3   : > { %3671 = vmatmul.msk.bf16.vlgmr.msrb.gmra.mxu3 %vm294_vm3, %v1166_v58 }
 0x516   : > { %v1114_v3 = vpop.f32.mrf.mxu0 }
 0x517   : > { %1756 = vst [vmem:[#allocation1] ss:$2 sm:$0xff] %v1114_v3 }
 0x51e   : > { %v1116_v24 = vpop.f32.mrf.mxu0  ;;  %v1136_v38 = vpop.f32.mrf.mxu1 }
 0x51f   : > { %1758 = vst [vmem:[#allocation1 + $0x1] ss:$2 sm:$0xff] %v1136_v38  ;;  %v1791_v38 = vpop.permute.xlu1 %1790 }
 0x526   : > { %v1138_v41 = vpop.f32.mrf.mxu1 }
 0x52d   : > { %1788 = vrot.lane.b32.xlu0 %v4259_v6, %s3965_s17 }
 0x533   : > { %v1157_v42 = vpop.f32.mrf.mxu2 }
 0x534   : > { %1760 = vst [vmem:[#allocation1 + $0x10] ss:$2 sm:$0xff] %v1157_v42 }
 0x536   : > { %v1069_v43 = vpop.f32.mrf.mxu3 }
 0x537   : > { %v1074_v44 = vpack.c.bf16 %v1069_v43, %v1069_v43 }
 0x539   : > { %1077 = vst.msk [vmem:[#allocation2] sm:$0xf] %vm1076_vm7, %v1074_v44 }
 0x53b   : > { %v3798_v45 = vpop.trf.xlu0  ;;  %v1159_v46 = vpop.f32.mrf.mxu2 }
 0x53c   : > { %v1486_v56 = vrot.slane %v3798_v45, 4 }
 0x53e   : > { %v1071_v47 = vpop.f32.mrf.mxu3 }
 0x53f   : > { %v1075_v48 = vpack.c.bf16 %v1071_v47, %v1071_v47 }
 0x541   : > { %1078 = vst.msk [vmem:[#allocation2 + $0x4] sm:$0xf] %vm1076_vm7, %v1075_v48  ;;  %v1796_v48 = vsel %vm294_vm3, %v1791_v38, 0 }
 0x543   : > { %v3799_v49 = vpop.trf.xlu0 }
 0x544   : > { %v1506_v12 = vrot.slane %v3799_v49, 4 }
 0x546   : > { %v1179_v50 = vpop.f32.mrf.mxu3 }
 0x547   : > { %1762 = vst [vmem:[#allocation1 + $0x11] ss:$2 sm:$0xff] %v1179_v50 }
 0x54b   : > { %v3801_v51 = vpop.trf.xlu0 }
 0x54c   : > { %v1487_v58 = vsel %vm442_vm2, %v1486_v56, %v3801_v51  ;;  %v1906_v51 = vld [vmem:[%s4043_s11 + $0x4] sm:$0xf] }
 0x54d   : > { %v1491_v59 = vperm.slane %v1487_v58, %v4087_v20 }
 0x54e   : > { %v1181_v52 = vpop.f32.mrf.mxu3  ;;  %v1764_v58 = vld.sshfl [vmem:[#allocation1 + $0x10] sm:$0xff pattern:$0x75316420] }
 0x54f   : > { %v1492_v19 = vrot.slane %v1491_v59, 4  ;;  %v2014_v52 = vld.sshfl [vmem:[#allocation1 + $0x20] sm:$0xff pattern:$0x73625140] }
 0x550   : > { %2024 = vrot.lane.b32.xlu0 %v2014_v52, %s3968_s21  ;;  %v1763_v59 = vld.sshfl [vmem:[#allocation1] sm:$0xff pattern:$0x75316420] }
 0x553   : > { %v3802_v53 = vpop.trf.xlu0 }
 0x554   : > { %v1507_v25 = vsel %vm442_vm2, %v1506_v12, %v3802_v53 }
 0x555   : > { %v1511_v28 = vperm.slane %v1507_v25, %v4087_v20 }
 0x557   : > { %v1512_v9 = vrot.slane %v1511_v28, 4 }
 0x55b   : > { %v3804_v54 = vpop.trf.xlu0 }
 0x55c   : > { %v1480_v60 = vrot.slane %v3804_v54, 4  ;;  %v1910_v54 = vrot.slane %v1906_v51, 2 }
 0x563   : > { %v3805_v55 = vpop.trf.xlu0 }
 0x564   : > { %v1500_v13 = vrot.slane %v3805_v55, 4  ;;  %v4293_v55 = vsel %vm276_vm0, %v1906_v51, %v1910_v54 }
 0x56b   : > { %v3807_v63 = vpop.trf.xlu0 }
 0x56c   : > { %v1481_v18 = vsel %vm442_vm2, %v1480_v60, %v3807_v63  ;;  %v1767_v63 = vpack.c.bf16 %v1764_v58, %v1763_v59 }
 0x56d   : > { %v1485_v23 = vperm.slane %v1481_v18, %v4087_v20 }
 0x56f   : > { %v1493_v15 = vsel %vm442_vm2, %v1492_v19, %v1485_v23 }
 0x570   : > { %v1497_v29 = vperm.slane %v1493_v15, %v4091_v27 }
 0x572   : > { %v1498_v7 = vrot.slane %v1497_v29, 4  ;;  %v1523_v37 = vshrl.u32 %v1497_v29, 16 }
 0x573   : > { %v3808_v14 = vpop.trf.xlu0 }
 0x574   : > { %v1501_v30 = vsel %vm442_vm2, %v1500_v13, %v3808_v14  ;;  %v1499_v3 = vsel %vm442_vm2, 0, %v1498_v7 }
 0x575   : > { %v1505_v31 = vperm.slane %v1501_v30, %v4087_v20  ;;  %v1529_v45 = vshrl.u32 %v1499_v3, 16 }
 0x577   : > { %v1513_v35 = vsel %vm442_vm2, %v1512_v9, %v1505_v31 }
 0x578   : > { %v1517_v36 = vperm.slane %v1513_v35, %v4091_v27 }
 0x57a   : > { %v1522_v26 = vpack.i.b16 %v1517_v36, %v1497_v29  ;;  %v1524_v39 = vshrl.u32 %v1517_v36, 16  ;;  %v1518_v24 = vrot.slane %v1517_v36, 4 }
 0x57c   : > { %v1533_v41 = vsel %vm697_vm4, %v1522_v26, 0  ;;  %v1525_v42 = vpack.i.b16 %v1524_v39, %v1523_v37  ;;  %v1519_v43 = vsel %vm442_vm2, 0, %v1518_v24 }
 0x57d   : > { %1542 = vmatpush.bf16.msra.mxu0 %v1533_v41  ;;  %v1528_v44 = vpack.i.b16 %v1519_v43, %v1499_v3  ;;  %v1530_v46 = vshrl.u32 %v1519_v43, 16 }
 0x57e   : > { %v1549_v47 = vsel %vm697_vm4, %v1525_v42, 0 }
 0x57f   : > { %1558 = vmatpush.bf16.msra.mxu1 %v1549_v47  ;;  %v1565_v49 = vsel %vm697_vm4, %v1528_v44, 0  ;;  %v1531_v50 = vpack.i.b16 %v1530_v46, %v1529_v45 }
 0x580   : > { %3672 = vmatmul.msk.bf16.vlgmr.msra.gmra.mxu0 %vm294_vm3, %v4152_v57  ;;  %1574 = vmatpush.bf16.msra.mxu2 %v1565_v49  ;;  %v4296_v57 = vsel %vm280_vm1, %v1906_v51, %v1910_v54 }
 0x581   : > { %1778 = vmatpush.bf16.msrb.mxu0 %v4175_v11  ;;  %v1581_v53 = vsel %vm697_vm4, %v1531_v50, 0  ;;  %v1922_v56 = vrot.slane %v4296_v57, 2 }
 0x582   : > { %3673 = vmatmul.msk.bf16.vlgmr.msra.gmra.mxu1 %vm294_vm3, %v4156_v61  ;;  %1590 = vmatpush.bf16.msra.mxu3 %v1581_v53  ;;  %v4311_v61 = vsel %vm280_vm1, %v4047_v1, %v2735_v4 }
 0x583   : > { %1805 = vmatpush.bf16.xpose.msrb.mxu1 %v1796_v48  ;;  %3674 = vmatmul.msk.bf16.vlgmr.msra.gmra.mxu2 %vm294_vm3, %v4158_v62  ;;  %2019 = vst [vmem:[#allocation1 + $0x20] ss:$4 sm:$0xff] %v1922_v56  ;;  %v2742_v62 = vrot.slane %v4311_v61, 2 }
 0x584   : > { %1838 = vmatpush.bf16.msrb.mxu2 %v4189_v40 }
 0x585   : > { %1938 = vmatpush.bf16.xpose.msra.mxu0 %v4116_v21  ;;  %3675 = vmatmul.msk.bf16.vlgmr.msra.gmra.mxu3 %vm294_vm3, %v4165_v0 }
 0x588   : > { %1981 = vmatpush.bf16.xpose.msra.mxu2 %v4108_v16 }
 0x58a   : > { %v2020_v60 = vld.sshfl [vmem:[#allocation1 + $0x20] sm:$0xff pattern:$0x73625140] }
 0x58b   : > { %1960 = vmatpush.bf16.xpose.msra.mxu1 %v4119_v22  ;;  %2839 = vst [vmem:[#allocation1 + $0x20] ss:$4 sm:$0xff] %v2742_v62  ;;  %2028 = vrot.lane.b32.xlu0 %v2020_v60, %s3968_s21 }
 0x590   : > { %3676 = vmatmul.msk.bf16.vlgmr.msrb.gmra.mxu0 %vm944_vm5, %v1767_v63 }
 0x59f   : > { %v1789_v0 = vpop.permute.xlu0 %1788 }
 0x5a0   : > { %3681 = vmatmul.msk.bf16.vlgmr.msrb.gmra.mxu1 %vm294_vm3, %v1789_v0 }
 0x5c2   : > { %v4319_v28 = vpop.permute.xlu0 %2024 }
 0x5fd   : > { %v1544_v12 = vpop.f32.mrf.mxu0  ;;  %v2029_v13 = vpop.permute.xlu0 %2028 }
 0x5fe   : > { %1596 = vxpose.xlu1.b32.start.end [1/1] (short) (narrow) %v1544_v12, 8 }
 0x5ff   : > { %v1560_v1 = vpop.f32.mrf.mxu1 }
 0x600   : > { %1628 = vxpose.xlu0.b32.start.end [1/1] (short) (narrow) %v1560_v1, 8 }
 0x605   : > { %v1546_v4 = vpop.f32.mrf.mxu0 }
 0x606   : > { %v1576_v18 = vpop.f32.mrf.mxu2 }
 0x607   : > { %v1562_v19 = vpop.f32.mrf.mxu1  ;;  %1660 = vxpose.xlu2.b32.start.end [1/1] (short) (narrow) %v1576_v18, 8 }
 0x608   : > { %v1592_v23 = vpop.f32.mrf.mxu3 }
 0x609   : > { %1692 = vxpose.xlu0.b32.start.end [1/1] (short) (narrow) %v1592_v23, 8 }
 0x60e   : > { %v1578_v25 = vpop.f32.mrf.mxu2 }
 0x610   : > { %v1594_v15 = vpop.f32.mrf.mxu3 }
 0x61d   : > { %v1807_v33 = vpop.f32.mrf.mxu1 }
 0x625   : > { %v1809_v12 = vpop.f32.mrf.mxu1 }
 0x6a0   : > { %v1676_v29 = vpop.trf.xlu2 }
 0x6a1   : > { %v1724_v30 = vrot.slane %v1676_v29, 4 }
 0x6a2   : > { %v1612_v9 = vpop.trf.xlu1 }
 0x6a3   : > { %v1725_v31 = vsel %vm442_vm2, %v1724_v30, %v1612_v9 }
 0x6a4   : > { %v1644_v14 = vpop.trf.xlu0  ;;  %v1729_v7 = vperm.slane %v1725_v31, %v4087_v20 }
 0x6a6   : > { %v1738_v37 = vrot.slane %v1729_v7, 4 }
 0x6ad   : > { %v1708_v35 = vpop.trf.xlu0 }
 0x6ae   : > { %v1730_v36 = vrot.slane %v1708_v35, 4 }
 0x6b0   : > { %v1731_v26 = vsel %vm442_vm2, %v1730_v36, %v1644_v14 }
 0x6b1   : > { %v1735_v39 = vperm.slane %v1731_v26, %v4087_v20 }
 0x6b3   : > { %v1736_v3 = vrot.slane %v1735_v39, 4  ;;  %v1739_v24 = vsel %vm442_vm2, %v1735_v39, %v1738_v37 }
 0x6b4   : > { %v1747_v38 = vperm.slane %v1739_v24, %v4091_v27 }
 0x6b5   : > { %v1737_v41 = vsel %vm442_vm2, %v1736_v3, %v1729_v7 }
 0x6b6   : > { %v1743_v42 = vperm.slane %v1737_v41, %v4091_v27  ;;  %v1750_v43 = vrot.slane %v1747_v38, 4  ;;  %1820 = vst [vmem:[#allocation1 + $0x10] ss:$2 sm:$0xff] %v1747_v38 }
 0x6b8   : > { %v1748_v44 = vrot.slane %v1743_v42, 4  ;;  %v1751_v45 = vsel %vm442_vm2, 0.0, %v1750_v43  ;;  %1816 = vst [vmem:[#allocation1] ss:$2 sm:$0xff] %v1743_v42 }
 0x6b9   : > { %1822 = vst [vmem:[#allocation1 + $0x11] ss:$2 sm:$0xff] %v1751_v45 }
 0x6ba   : > { %v1749_v46 = vsel %vm442_vm2, 0.0, %v1748_v44 }
 0x6bb   : > { %1818 = vst [vmem:[#allocation1 + $0x1] ss:$2 sm:$0xff] %v1749_v46 }
 0x6c0   : > { %v1824_v48 = vld.sshfl [vmem:[#allocation1 + $0x10] sm:$0xff pattern:$0x75316420] }
 0x6c2   : > { %v1823_v47 = vld.sshfl [vmem:[#allocation1] sm:$0xff pattern:$0x75316420] }
 0x6c3   : > { %1923 = vst [vmem:[#allocation1] ss:$4 sm:$0xff] %v4214_v32  ;;  %v1827_v49 = vpack.c.bf16 %v1824_v48, %v1823_v47 }
 0x6c5   : > { %3682 = vmatmul.msk.bf16.vlgmr.msrb.gmra.mxu2 %vm944_vm5, %v1827_v49 }
 0x6ca   : > { %v4333_v50 = vld.sshfl [vmem:[#allocation1] sm:$0xff pattern:$0x73625140] }
 0x6cb   : > { %1945 = vst [vmem:[#allocation1] ss:$4 sm:$0xff] %v1916_v34  ;;  %v1780_v34 = vpop.f32.mrf.mxu0 }
 0x6cc   : > { %v1808_v59 = vadd.f32 %v1807_v33, %v1780_v34 }
 0x6d2   : > { %v4337_v51 = vld.sshfl [vmem:[#allocation1] sm:$0xff pattern:$0x73625140] }
 0x6d3   : > { %1966 = vst [vmem:[#allocation1] ss:$4 sm:$0xff] %v4293_v55 }
 0x6da   : > { %v1967_v52 = vld.sshfl [vmem:[#allocation1] sm:$0xff pattern:$0x73625140] }
 0x6db   : > { %1988 = vst [vmem:[#allocation1] ss:$4 sm:$0xff] %v1922_v56  ;;  %v1782_v56 = vpop.f32.mrf.mxu0 }
 0x6e2   : > { %v1989_v53 = vld.sshfl [vmem:[#allocation1] sm:$0xff pattern:$0x73625140] }
 0x6e3   : > { %2009 = vst [vmem:[#allocation1] ss:$4 sm:$0xff] %v4214_v32  ;;  %v1810_v32 = vadd.f32 %v1809_v12, %v1782_v56 }
 0x6ea   : > { %v2010_v54 = vld.sshfl [vmem:[#allocation1] sm:$0xff pattern:$0x73625140] }
 0x6eb   : > { %2022 = vrot.lane.b32.xlu0 %v2010_v54, %s3968_s21  ;;  %2016 = vst [vmem:[#allocation1] ss:$4 sm:$0xff] %v4293_v55 }
 0x6f2   : > { %v2017_v58 = vld.sshfl [vmem:[#allocation1] sm:$0xff pattern:$0x73625140] }
 0x6f3   : > { %2026 = vrot.lane.b32.xlu2 %v2017_v58, %s3968_s21 }
 0x748   : > { %v1840_v60 = vpop.f32.mrf.mxu2 }
 0x749   : > { %v1845_v63 = vadd.f32 %v1840_v60, %v1808_v59 }
 0x74b   : > { %v1847_v0 = vmul.f32 0.35355338, %v1845_v63 }
 0x74d   : > { %v1849_v57 = vsel %vm1030_vm6, %v1847_v0, -inf  ;;  %v2027_v19 = vpop.permute.xlu2 %2026 }
 0x74e   : > { %1850 = vmax.xlane.f32.xlu2 %v1849_v57 }
 0x750   : > { %v1842_v1 = vpop.f32.mrf.mxu2 }
 0x751   : > { %v1846_v4 = vadd.f32 %v1842_v1, %v1810_v32 }
 0x753   : > { %v4347_v18 = vmul.f32 0.35355338, %v1846_v4 }
 0x755   : > { %v1852_v55 = vsel %vm1030_vm6, %v4347_v18, -inf }
 0x756   : > { %1853 = vmax.xlane.f32.xlu1 %v1852_v55 }
 0x75d   : > { %v2023_v23 = vpop.permute.xlu0 %2022 }
 0x777   : > { %3812 = vxpose.binary.xlu2.c.b16.start.end [1/2] (short) (narrow) %v2029_v13, %v2027_v19, 16 }
 0x790   : > { %3809 = vxpose.binary.xlu1.c.b16.start.end [1/2] (short) (narrow) %v4319_v28, %v2023_v23, 16 }
 0x7c1   : > { %v1851_v25 = vpop.xlane.xlu2 %1850 }
 0x7c2   : > { %v1855_v15 = vsub.f32 %v1847_v0, %v1851_v25 }
 0x7c4   : > { %v1857_v29 = vmul.f32 1.442695, %v1855_v15 }
 0x7c6   : > { %3853 = vpow2.f32 %v1857_v29 }
 0x7c9   : > { %v1854_v13 = vpop.xlane.xlu1 %1853 }
 0x7cc   : > { %v4353_v14 = vpop.eup %3853 }
 0x7cd   : > { %v1861_v30 = vsel %vm1030_vm6, %v4353_v14, 0.0 }
 0x7e0   : > { %1969 = vrot.lane.b32.xlu2 %v1967_v52, %s3968_s21 }
 0x7f0   : > { %1862 = vadd.xlane.f32.xlu1 %v1861_v30 }
 0x809   : > { %1991 = vrot.lane.b32.xlu1 %v1989_v53, %s3968_s21 }
 0x818   : > { %v3813_v9 = vpop.trf.xlu2 }
 0x819   : > { %v2105_v28 = vperm.slane %v3813_v9, %v4087_v20 }
 0x81b   : > { %v2106_v39 = vrot.slane %v2105_v28, 4 }
 0x820   : > { %v3814_v31 = vpop.trf.xlu2 }
 0x821   : > { %v2129_v37 = vperm.slane %v3814_v31, %v4087_v20 }
 0x823   : > { %v2130_v24 = vrot.slane %v2129_v37, 4 }
 0x83a   : > { %v1970_v7 = vpop.permute.xlu2 %1969 }
 0x83b   : > { %3686 = vmatmul.msk.bf16.vlgmr.msra.gmra.mxu2 %vm294_vm3, %v1970_v7 }
 0x83c   : > { %v3810_v35 = vpop.trf.xlu1 }
 0x83d   : > { %v2101_v36 = vperm.slane %v3810_v35, %v4087_v20 }
 0x83f   : > { %v2108_v26 = vrot.slane %v2101_v36, 4  ;;  %v2107_v38 = vsel %vm442_vm2, %v2106_v39, %v2101_v36  ;;  %v1856_v36 = vsub.f32 %v4347_v18, %v1854_v13 }
 0x840   : > { %v2113_v44 = vperm.slane %v2107_v38, %v4091_v27 }
 0x841   : > { %v2109_v3 = vsel %vm442_vm2, %v2105_v28, %v2108_v26  ;;  %v1859_v26 = vmul.f32 1.442695, %v1856_v36 }
 0x842   : > { %v2117_v41 = vperm.slane %v2109_v3, %v4091_v27  ;;  %v2150_v58 = vshrl.u32 %v2113_v44, 16  ;;  %v2118_v32 = vrot.slane %v2113_v44, 4 }
 0x843   : > { %3855 = vpow2.f32 %v1859_v26 }
 0x844   : > { %v3811_v42 = vpop.trf.xlu1  ;;  %v2120_v48 = vrot.slane %v2117_v41, 4  ;;  %v2119_v4 = vsel %vm442_vm2, 0, %v2118_v32  ;;  %v2166_v29 = vshrl.u32 %v2117_v41, 16 }
 0x845   : > { %v2125_v43 = vperm.slane %v3811_v42, %v4087_v20  ;;  %v2158_v19 = vshrl.u32 %v2119_v4, 16 }
 0x846   : > { %v2121_v33 = vsel %vm442_vm2, 0, %v2120_v48 }
 0x847   : > { %v2131_v45 = vsel %vm442_vm2, %v2130_v24, %v2125_v43  ;;  %v2132_v46 = vrot.slane %v2125_v43, 4  ;;  %v2174_v63 = vshrl.u32 %v2121_v33, 16 }
 0x848   : > { %v2137_v47 = vperm.slane %v2131_v45, %v4091_v27  ;;  %v4388_v45 = vld [vmem:[%s4043_s11] sm:$0xff] }
 0x849   : > { %v2133_v49 = vsel %vm442_vm2, %v2129_v37, %v2132_v46  ;;  %v3856_v38 = vpop.eup %3855  ;;  %2616 = vrot.lane.b32.xlu1 %v4388_v45, %s3970_s24 }
 0x84a   : > { %v2141_v52 = vperm.slane %v2133_v49, %v4091_v27  ;;  %v2148_v53 = vpack.i.b16 %v2137_v47, %v2113_v44  ;;  %v2151_v54 = vshrl.u32 %v2137_v47, 16  ;;  %v2142_v56 = vrot.slane %v2137_v47, 4 }
 0x84c   : > { %v2144_v34 = vrot.slane %v2141_v52, 4  ;;  %v2152_v59 = vpack.i.b16 %v2151_v54, %v2150_v58  ;;  %v2143_v1 = vsel %vm442_vm2, 0, %v2142_v56  ;;  %v2167_v15 = vshrl.u32 %v2141_v52, 16 }
 0x84d   : > { %v2159_v55 = vshrl.u32 %v2143_v1, 16  ;;  %v2156_v23 = vpack.i.b16 %v2143_v1, %v2119_v4  ;;  %v2164_v30 = vpack.i.b16 %v2141_v52, %v2117_v41 }
 0x84e   : > { %v2145_v60 = vsel %vm442_vm2, 0, %v2144_v34  ;;  %v2168_v9 = vpack.i.b16 %v2167_v15, %v2166_v29 }
 0x84f   : > { %v2175_v0 = vshrl.u32 %v2145_v60, 16  ;;  %v2172_v12 = vpack.i.b16 %v2145_v60, %v2121_v33  ;;  %v2160_v25 = vpack.i.b16 %v2159_v55, %v2158_v19 }
 0x851   : > { %v2176_v57 = vpack.i.b16 %v2175_v0, %v2174_v63 }
 0x853   : > { %3815 = vxpose.binary.xlu0.c.b16.start.end [1/2] (short) (narrow) %v2176_v57, %v2172_v12, 16 }
 0x863   : > { %3818 = vxpose.binary.xlu0.c.b16.start.end [1/2] (short) (narrow) %v2160_v25, %v2156_v23, 16  ;;  %v1863_v44 = vpop.xlane.xlu1 %1862 }
 0x864   : > { %3857 = vrcp.f32 %v1863_v44  ;;  %v3881_v44 = vld [vmem:[%s4043_s11 + $0x4] sm:$0xf] }
 0x86a   : > { %v3858_v47 = vpop.eup %3857 }
 0x86b   : > { %v1869_v49 = vmul.f32 %v3858_v47, %v4353_v14 }
 0x873   : > { %3821 = vxpose.binary.xlu0.c.b16.start.end [1/2] (short) (narrow) %v2168_v9, %v2164_v30, 16 }
 0x87b   : > { %v1992_v54 = vpop.permute.xlu1 %1991 }
 0x8be   : > { %v1983_v31 = vpop.f32.mrf.mxu2 }
 0x8bf   : > { %2586 = vst [vmem:[#allocation1 + $0x10] ss:$2 sm:$0xff] %v1983_v31 }
 0x8c6   : > { %v1985_v7 = vpop.f32.mrf.mxu2 }
 0x8e1   : > { %1872 = vrot.lane.b32.xlu0 %v4259_v6, %s3969_s23 }
 0x8e9   : > { %1926 = vrot.lane.b32.xlu0 %v4333_v50, %s3968_s21  ;;  %v1864_v50 = vsel %vm1030_vm6, %v3856_v38, 0.0 }
 0x8f1   : > { %1948 = vrot.lane.b32.xlu0 %v4337_v51, %s3968_s21 }
 0x8ff   : > { %v3816_v28 = vpop.trf.xlu0 }
 0x900   : > { %v2312_v37 = vrot.slane %v3816_v28, 4 }
 0x907   : > { %v3817_v35 = vpop.trf.xlu0 }
 0x908   : > { %v2332_v24 = vrot.slane %v3817_v35, 4 }
 0x90f   : > { %v3819_v39 = vpop.trf.xlu0 }
 0x910   : > { %v2313_v3 = vsel %vm442_vm2, %v2312_v37, %v3819_v39 }
 0x911   : > { %v2317_v60 = vperm.slane %v2313_v3, %v4087_v20 }
 0x913   : > { %v2318_v12 = vrot.slane %v2317_v60, 4 }
 0x917   : > { %v3820_v6 = vpop.trf.xlu0 }
 0x918   : > { %v2333_v41 = vsel %vm442_vm2, %v2332_v24, %v3820_v6 }
 0x919   : > { %v2337_v32 = vperm.slane %v2333_v41, %v4087_v20 }
 0x91b   : > { %1865 = vadd.xlane.f32.xlu0 %v1864_v50  ;;  %v2338_v23 = vrot.slane %v2337_v32, 4  ;;  %v4412_v50 = vld [vmem:[#allocation5] sm:$0x3] }
 0x91f   : > { %v3822_v51 = vpop.trf.xlu0 }
 0x920   : > { %v2306_v63 = vrot.slane %v3822_v51, 4 }
 0x927   : > { %v3823_v42 = vpop.trf.xlu0 }
 0x928   : > { %v2326_v1 = vrot.slane %v3823_v42, 4  ;;  %v4419_v42 = vld [vmem:[#allocation5 + $0x2] sm:$0x3] }
 0x944   : > { %3824 = vxpose.binary.xlu0.c.b16.start.end [1/2] (short) (narrow) %v2152_v59, %v2148_v53, 16 }
 0x953   : > { %v1873_v43 = vpop.permute.xlu0 %1872 }
 0x954   : > { %1885 = vmatpush.bf16.msrb.mxu3 %v1873_v43  ;;  %v4423_v43 = vld [vmem:[#allocation5 + $0x4] sm:$0x3] }
 0x958   : > { %2003 = vmatpush.bf16.xpose.msra.mxu3 %v4111_v17 }
 0x95b   : > { %v1927_v18 = vpop.permute.xlu0 %1926 }
 0x95c   : > { %3684 = vmatmul.msk.bf16.vlgmr.msra.gmra.mxu0 %vm294_vm3, %v1927_v18  ;;  %v4428_v18 = vld [vmem:[#allocation5 + $0x6] sm:$0x3] }
 0x963   : > { %v1949_v13 = vpop.permute.xlu0 %1948 }
 0x964   : > { %3685 = vmatmul.msk.bf16.vlgmr.msra.gmra.mxu1 %vm294_vm3, %v1949_v13  ;;  %v2617_v13 = vpop.permute.xlu1 %2616 }
 0x98e   : > { %v1866_v46 = vpop.xlane.xlu0 %1865 }
 0x98f   : > { %3859 = vrcp.f32 %v1866_v46  ;;  %v4437_v46 = vsel %vm280_vm1, %v3881_v44, %v2736_v5 }
 0x990   : > { %v2748_v47 = vrot.slane %v4437_v46, 2 }
 0x995   : > { %v3860_v48 = vpop.eup %3859 }
 0x996   : > { %v1870_v52 = vmul.f32 %v3860_v48, %v3856_v38 }
 0x998   : > { %v1871_v53 = vpack.c.bf16 %v1870_v52, %v1869_v49 }
 0x99a   : > { %3683 = vmatmul.msk.bf16.vlgmr.msrb.gmra.mxu3 %vm1030_vm6, %v1871_v53 }
 0x9aa   : > { %3687 = vmatmul.msk.bf16.vlgmr.msra.gmra.mxu3 %vm294_vm3, %v1992_v54 }
 0x9b2   : > { %2614 = vrot.lane.b32.xlu0 %v4388_v45, %s3968_s21 }
 0x9d9   : > { %v1940_v58 = vpop.f32.mrf.mxu0 }
 0x9da   : > { %2582 = vst [vmem:[#allocation1] ss:$2 sm:$0xff] %v1940_v58 }
 0x9e1   : > { %v1942_v33 = vpop.f32.mrf.mxu0  ;;  %v1962_v34 = vpop.f32.mrf.mxu1 }
 0x9e2   : > { %2584 = vst [vmem:[#allocation1 + $0x1] ss:$2 sm:$0xff] %v1962_v34 }
 0x9e9   : > { %v1964_v59 = vpop.f32.mrf.mxu1  ;;  %v2589_v54 = vld.sshfl [vmem:[#allocation1] sm:$0xff pattern:$0x75316420] }
 0x9f0   : > { %v3825_v14 = vpop.trf.xlu0 }
 0x9f1   : > { %v2307_v0 = vsel %vm442_vm2, %v2306_v63, %v3825_v14 }
 0x9f2   : > { %v2311_v57 = vperm.slane %v2307_v0, %v4087_v20 }
 0x9f4   : > { %v2319_v56 = vsel %vm442_vm2, %v2318_v12, %v2311_v57 }
 0x9f5   : > { %v2323_v4 = vperm.slane %v2319_v56, %v4091_v27 }
 0x9f7   : > { %v2324_v15 = vrot.slane %v2323_v4, 4  ;;  %v2349_v9 = vshrl.u32 %v2323_v4, 16 }
 0x9f8   : > { %v3826_v55 = vpop.trf.xlu0 }
 0x9f9   : > { %v2327_v19 = vsel %vm442_vm2, %v2326_v1, %v3826_v55  ;;  %v2325_v28 = vsel %vm442_vm2, 0, %v2324_v15 }
 0x9fa   : > { %v2331_v25 = vperm.slane %v2327_v19, %v4087_v20  ;;  %v2355_v3 = vshrl.u32 %v2325_v28, 16 }
 0x9fc   : > { %v2339_v29 = vsel %vm442_vm2, %v2338_v23, %v2331_v25 }
 0x9fd   : > { %v2343_v30 = vperm.slane %v2339_v29, %v4091_v27 }
 0x9ff   : > { %v2348_v31 = vpack.i.b16 %v2343_v30, %v2323_v4  ;;  %v2350_v7 = vshrl.u32 %v2343_v30, 16  ;;  %v2344_v35 = vrot.slane %v2343_v30, 4 }
 0xa01   : > { %v2359_v36 = vsel %vm697_vm4, %v2348_v31, 0  ;;  %v2351_v37 = vpack.i.b16 %v2350_v7, %v2349_v9  ;;  %v2345_v26 = vsel %vm442_vm2, 0, %v2344_v35 }
 0xa02   : > { %2368 = vmatpush.bf16.msrb.mxu0 %v2359_v36  ;;  %v2354_v39 = vpack.i.b16 %v2345_v26, %v2325_v28  ;;  %v2356_v24 = vshrl.u32 %v2345_v26, 16 }
 0xa03   : > { %v2375_v38 = vsel %vm697_vm4, %v2351_v37, 0 }
 0xa04   : > { %2384 = vmatpush.bf16.msrb.mxu1 %v2375_v38  ;;  %v2391_v6 = vsel %vm697_vm4, %v2354_v39, 0  ;;  %v2357_v41 = vpack.i.b16 %v2356_v24, %v2355_v3 }
 0xa05   : > { %3688 = vmatmul.msk.bf16.vlgmr.msrb.gmra.mxu0 %vm294_vm3, %v4412_v50  ;;  %2400 = vmatpush.bf16.msrb.mxu2 %v2391_v6 }
 0xa06   : > { %2604 = vmatpush.bf16.msra.mxu0 %v4175_v11  ;;  %v2407_v51 = vsel %vm697_vm4, %v2357_v41, 0 }
 0xa07   : > { %2416 = vmatpush.bf16.msrb.mxu3 %v2407_v51  ;;  %3689 = vmatmul.msk.bf16.vlgmr.msrb.gmra.mxu1 %vm294_vm3, %v4419_v42 }
 0xa08   : > { %3690 = vmatmul.msk.bf16.vlgmr.msrb.gmra.mxu2 %vm294_vm3, %v4423_v43 }
 0xa09   : > { %2664 = vmatpush.bf16.msra.mxu2 %v4189_v40 }
 0xa0a   : > { %2764 = vmatpush.bf16.xpose.msrb.mxu0 %v4116_v21  ;;  %3691 = vmatmul.msk.bf16.vlgmr.msrb.gmra.mxu3 %vm294_vm3, %v4428_v18  ;;  %v2622_v21 = vsel %vm294_vm3, %v2617_v13, 0 }
 0xa0b   : > { %2631 = vmatpush.bf16.xpose.msra.mxu1 %v2622_v21 }
 0xa0d   : > { %2807 = vmatpush.bf16.xpose.msrb.mxu2 %v4108_v16  ;;  %v2840_v16 = vld.sshfl [vmem:[#allocation1 + $0x20] sm:$0xff pattern:$0x73625140] }
 0xa0e   : > { %2845 = vst [vmem:[#allocation1 + $0x20] ss:$4 sm:$0xff] %v2748_v47  ;;  %2850 = vrot.lane.b32.xlu0 %v2840_v16, %s3971_s25 }
 0xa13   : > { %2786 = vmatpush.bf16.xpose.msrb.mxu1 %v4119_v22 }
 0xa15   : > { %v2846_v49 = vld.sshfl [vmem:[#allocation1 + $0x20] sm:$0xff pattern:$0x73625140] }
 0xa16   : > { %2854 = vrot.lane.b32.xlu2 %v2846_v49, %s3971_s25 }
 0xa1d   : > { %v4444_v48 = vpop.f32.mrf.mxu3 }
 0xa24   : > { %v2615_v2 = vpop.permute.xlu0 %2614 }
 0xa25   : > { %v4447_v5 = vpop.f32.mrf.mxu3  ;;  %3697 = vmatmul.msk.bf16.vlgmr.msra.gmra.mxu1 %vm294_vm3, %v2615_v2 }
 0xa2d   : > { %v2005_v22 = vpop.f32.mrf.mxu3 }
 0xa2e   : > { %2588 = vst [vmem:[#allocation1 + $0x11] ss:$2 sm:$0xff] %v2005_v22 }
 0xa35   : > { %v2590_v52 = vld.sshfl [vmem:[#allocation1 + $0x10] sm:$0xff pattern:$0x75316420]  ;;  %v2007_v53 = vpop.f32.mrf.mxu3 }
 0xa36   : > { %v2593_v58 = vpack.c.bf16 %v2590_v52, %v2589_v54 }
 0xa38   : > { %3692 = vmatmul.msk.bf16.vlgmr.msra.gmra.mxu0 %vm944_vm5, %v2593_v58 }
 0xa70   : > { %v2855_v56 = vpop.permute.xlu2 %2854 }
 0xa80   : > { %v4451_v57 = vpop.permute.xlu0 %2850 }
 0xa82   : > { %v2370_v33 = vpop.f32.mrf.mxu0 }
 0xa83   : > { %2422 = vxpose.xlu0.b32.start.end [1/1] (short) (narrow) %v2370_v33, 8 }
 0xa84   : > { %v2386_v34 = vpop.f32.mrf.mxu1 }
 0xa8a   : > { %v2372_v59 = vpop.f32.mrf.mxu0 }
 0xa8b   : > { %v2402_v60 = vpop.f32.mrf.mxu2  ;;  %2454 = vxpose.xlu0.b32.start.end [1/1] (short) (narrow) %v2386_v34, 8 }
 0xa8c   : > { %2486 = vxpose.xlu1.b32.start.end [1/1] (short) (narrow) %v2402_v60, 8  ;;  %v2388_v63 = vpop.f32.mrf.mxu1 }
 0xa8d   : > { %v2418_v14 = vpop.f32.mrf.mxu3 }
 0xa8e   : > { %2518 = vxpose.xlu2.b32.start.end [1/1] (short) (narrow) %v2418_v14, 8 }
 0xa93   : > { %v2404_v0 = vpop.f32.mrf.mxu2 }
 0xa95   : > { %v2420_v12 = vpop.f32.mrf.mxu3 }
 0xab5   : > { %v2606_v61 = vpop.f32.mrf.mxu0 }
 0xabd   : > { %v2608_v53 = vpop.f32.mrf.mxu0 }
 0xb27   : > { %v2438_v32 = vpop.trf.xlu0  ;;  %v2534_v1 = vpop.trf.xlu2 }
 0xb28   : > { %v2556_v4 = vrot.slane %v2534_v1, 4 }
 0xb2f   : > { %v2470_v55 = vpop.trf.xlu0 }
 0xb30   : > { %v2557_v19 = vsel %vm442_vm2, %v2556_v4, %v2470_v55  ;;  %v2502_v23 = vpop.trf.xlu1 }
 0xb31   : > { %v2561_v25 = vperm.slane %v2557_v19, %v4087_v20  ;;  %v2550_v15 = vrot.slane %v2502_v23, 4 }
 0xb33   : > { %v2562_v29 = vrot.slane %v2561_v25, 4  ;;  %v2551_v30 = vsel %vm442_vm2, %v2550_v15, %v2438_v32 }
 0xb34   : > { %v2555_v9 = vperm.slane %v2551_v30, %v4087_v20 }
 0xb36   : > { %v2563_v31 = vsel %vm442_vm2, %v2562_v29, %v2555_v9  ;;  %v2564_v7 = vrot.slane %v2555_v9, 4 }
 0xb37   : > { %v2569_v28 = vperm.slane %v2563_v31, %v4091_v27 }
 0xb38   : > { %v2565_v35 = vsel %vm442_vm2, %v2561_v25, %v2564_v7 }
 0xb39   : > { %v2573_v36 = vperm.slane %v2565_v35, %v4091_v27  ;;  %v2574_v37 = vrot.slane %v2569_v28, 4  ;;  %2642 = vst [vmem:[#allocation1] ss:$2 sm:$0xff] %v2569_v28 }
 0xb3b   : > { %v2575_v26 = vsel %vm442_vm2, 0.0, %v2574_v37  ;;  %v2576_v39 = vrot.slane %v2573_v36, 4  ;;  %2646 = vst [vmem:[#allocation1 + $0x10] ss:$2 sm:$0xff] %v2573_v36 }
 0xb3c   : > { %2644 = vst [vmem:[#allocation1 + $0x1] ss:$2 sm:$0xff] %v2575_v26 }
 0xb3d   : > { %v2577_v3 = vsel %vm442_vm2, 0.0, %v2576_v39 }
 0xb3e   : > { %2648 = vst [vmem:[#allocation1 + $0x11] ss:$2 sm:$0xff] %v2577_v3 }
 0xb43   : > { %v2649_v24 = vld.sshfl [vmem:[#allocation1] sm:$0xff pattern:$0x75316420] }
 0xb45   : > { %v2650_v38 = vld.sshfl [vmem:[#allocation1 + $0x10] sm:$0xff pattern:$0x75316420] }
 0xb46   : > { %2749 = vst [vmem:[#allocation1] ss:$4 sm:$0xff] %v4064_v8  ;;  %v2653_v6 = vpack.c.bf16 %v2650_v38, %v2649_v24 }
 0xb48   : > { %3698 = vmatmul.msk.bf16.vlgmr.msra.gmra.mxu2 %vm944_vm5, %v2653_v6 }
 0xb4d   : > { %v4465_v41 = vld.sshfl [vmem:[#allocation1] sm:$0xff pattern:$0x73625140] }
 0xb4e   : > { %2771 = vst [vmem:[#allocation1] ss:$4 sm:$0xff] %v2742_v62  ;;  %v2633_v62 = vpop.f32.mrf.mxu1 }
 0xb4f   : > { %v2634_v49 = vadd.f32 %v2633_v62, %v2606_v61 }
 0xb55   : > { %v4469_v51 = vld.sshfl [vmem:[#allocation1] sm:$0xff pattern:$0x73625140] }
 0xb56   : > { %2792 = vst [vmem:[#allocation1] ss:$4 sm:$0xff] %v4071_v10  ;;  %v2635_v46 = vpop.f32.mrf.mxu1 }
 0xb5d   : > { %v4472_v13 = vld.sshfl [vmem:[#allocation1] sm:$0xff pattern:$0x73625140] }
 0xb5e   : > { %2814 = vst [vmem:[#allocation1] ss:$4 sm:$0xff] %v2748_v47 }
 0xb65   : > { %v2815_v21 = vld.sshfl [vmem:[#allocation1] sm:$0xff pattern:$0x73625140] }
 0xb66   : > { %2835 = vst [vmem:[#allocation1] ss:$4 sm:$0xff] %v4064_v8  ;;  %v2636_v8 = vadd.f32 %v2635_v46, %v2608_v53 }
 0xb6d   : > { %v2836_v44 = vld.sshfl [vmem:[#allocation1] sm:$0xff pattern:$0x73625140] }
 0xb6e   : > { %2848 = vrot.lane.b32.xlu0 %v2836_v44, %s3971_s25  ;;  %2842 = vst [vmem:[#allocation1] ss:$4 sm:$0xff] %v4071_v10 }
 0xb75   : > { %v2843_v16 = vld.sshfl [vmem:[#allocation1] sm:$0xff pattern:$0x73625140] }
 0xb76   : > { %2852 = vrot.lane.b32.xlu1 %v2843_v16, %s3971_s25 }
 0xbcb   : > { %v2666_v2 = vpop.f32.mrf.mxu2 }
 0xbcc   : > { %v2671_v22 = vadd.f32 %v2666_v2, %v2634_v49 }
 0xbce   : > { %v2673_v52 = vmul.f32 0.35355338, %v2671_v22 }
 0xbd0   : > { %v2675_v47 = vsel %vm1030_vm6, %v2673_v52, -inf }
 0xbd1   : > { %2676 = vmax.xlane.f32.xlu2 %v2675_v47 }
 0xbd3   : > { %v2668_v54 = vpop.f32.mrf.mxu2 }
 0xbd4   : > { %v2672_v58 = vadd.f32 %v2668_v54, %v2636_v8 }
 0xbd6   : > { %v4481_v33 = vmul.f32 0.35355338, %v2672_v58 }
 0xbd8   : > { %v2678_v10 = vsel %vm1030_vm6, %v4481_v33, -inf }
 0xbd9   : > { %2679 = vmax.xlane.f32.xlu1 %v2678_v10 }
 0xbe0   : > { %v2849_v59 = vpop.permute.xlu0 %2848 }
 0xbe8   : > { %v2853_v34 = vpop.permute.xlu1 %2852 }
 0xbe9   : > { %3830 = vxpose.binary.xlu0.c.b16.start.end [1/2] (short) (narrow) %v2855_v56, %v2853_v34, 16 }
 0xbfa   : > { %3827 = vxpose.binary.xlu2.c.b16.start.end [1/2] (short) (narrow) %v4451_v57, %v2849_v59, 16 }
 0xc44   : > { %v2677_v60 = vpop.xlane.xlu2 %2676 }
 0xc45   : > { %v2681_v63 = vsub.f32 %v2673_v52, %v2677_v60 }
 0xc47   : > { %v2683_v14 = vmul.f32 1.442695, %v2681_v63 }
 0xc49   : > { %3861 = vpow2.f32 %v2683_v14 }
 0xc4c   : > { %v2680_v60 = vpop.xlane.xlu1 %2679 }
 0xc4d   : > { %v2682_v63 = vsub.f32 %v4481_v33, %v2680_v60 }
 0xc4f   : > { %v4486_v0 = vpop.eup %3861  ;;  %v2685_v14 = vmul.f32 1.442695, %v2682_v63 }
 0xc50   : > { %v2687_v12 = vsel %vm1030_vm6, %v4486_v0, 0.0 }
 0xc51   : > { %3863 = vpow2.f32 %v2685_v14 }
 0xc5a   : > { %2688 = vadd.xlane.f32.xlu0 %v2687_v12  ;;  %v3864_v12 = vpop.eup %3863 }
 0xc63   : > { %2698 = vrot.lane.b32.xlu2 %v4388_v45, %s3972_s26 }
 0xc6e   : > { %2817 = vrot.lane.b32.xlu0 %v2815_v21, %s3971_s25 }
 0xc95   : > { %v3831_v32 = vpop.trf.xlu0 }
 0xc96   : > { %v2931_v56 = vperm.slane %v3831_v32, %v4087_v20  ;;  %v2690_v32 = vsel %vm1030_vm6, %v3864_v12, 0.0 }
 0xc98   : > { %v2932_v23 = vrot.slane %v2931_v56, 4 }
 0xc9b   : > { %v3828_v1 = vpop.trf.xlu2 }
 0xc9c   : > { %v2927_v57 = vperm.slane %v3828_v1, %v4087_v20 }
 0xc9d   : > { %v3832_v4 = vpop.trf.xlu0 }
 0xc9e   : > { %v2934_v55 = vrot.slane %v2927_v57, 4  ;;  %v2955_v19 = vperm.slane %v3832_v4, %v4087_v20  ;;  %v2933_v29 = vsel %vm442_vm2, %v2932_v23, %v2927_v57 }
 0xc9f   : > { %v2939_v31 = vperm.slane %v2933_v29, %v4091_v27 }
 0xca0   : > { %v2935_v25 = vsel %vm442_vm2, %v2931_v56, %v2934_v55  ;;  %v2956_v15 = vrot.slane %v2955_v19, 4 }
 0xca1   : > { %v2943_v45 = vperm.slane %v2935_v25, %v4091_v27  ;;  %v2976_v24 = vshrl.u32 %v2939_v31, 16  ;;  %v2944_v47 = vrot.slane %v2939_v31, 4 }
 0xca3   : > { %v3829_v30 = vpop.trf.xlu2  ;;  %v2946_v36 = vrot.slane %v2943_v45, 4  ;;  %v2992_v38 = vshrl.u32 %v2943_v45, 16  ;;  %v2945_v54 = vsel %vm442_vm2, 0, %v2944_v47 }
 0xca4   : > { %v2951_v9 = vperm.slane %v3829_v30, %v4087_v20  ;;  %v2984_v10 = vshrl.u32 %v2945_v54, 16 }
 0xca5   : > { %v2947_v21 = vsel %vm442_vm2, 0, %v2946_v36 }
 0xca6   : > { %v2957_v7 = vsel %vm442_vm2, %v2956_v15, %v2951_v9  ;;  %v2958_v28 = vrot.slane %v2951_v9, 4  ;;  %v3000_v2 = vshrl.u32 %v2947_v21, 16 }
 0xca7   : > { %v2963_v35 = vperm.slane %v2957_v7, %v4091_v27 }
 0xca8   : > { %v2959_v37 = vsel %vm442_vm2, %v2955_v19, %v2958_v28 }
 0xca9   : > { %v2967_v26 = vperm.slane %v2959_v37, %v4091_v27  ;;  %v2974_v39 = vpack.i.b16 %v2963_v35, %v2939_v31  ;;  %v2977_v3 = vshrl.u32 %v2963_v35, 16  ;;  %v2968_v46 = vrot.slane %v2963_v35, 4 }
 0xcab   : > { %v2993_v6 = vshrl.u32 %v2967_v26, 16  ;;  %v2970_v44 = vrot.slane %v2967_v26, 4  ;;  %v2978_v16 = vpack.i.b16 %v2977_v3, %v2976_v24  ;;  %v2990_v61 = vpack.i.b16 %v2967_v26, %v2943_v45 }
 0xcac   : > { %v2969_v8 = vsel %vm442_vm2, 0, %v2968_v46 }
 0xcad   : > { %v2994_v62 = vpack.i.b16 %v2993_v6, %v2992_v38  ;;  %v2971_v49 = vsel %vm442_vm2, 0, %v2970_v44  ;;  %v2985_v58 = vshrl.u32 %v2969_v8, 16  ;;  %v2982_v34 = vpack.i.b16 %v2969_v8, %v2945_v54 }
 0xcae   : > { %v3001_v22 = vshrl.u32 %v2971_v49, 16  ;;  %v2998_v52 = vpack.i.b16 %v2971_v49, %v2947_v21 }
 0xcaf   : > { %3839 = vxpose.binary.xlu2.c.b16.start.end [1/2] (short) (narrow) %v2994_v62, %v2990_v61, 16  ;;  %v2986_v59 = vpack.i.b16 %v2985_v58, %v2984_v10 }
 0xcb0   : > { %v3002_v53 = vpack.i.b16 %v3001_v22, %v3000_v2 }
 0xcb2   : > { %3833 = vxpose.binary.xlu1.c.b16.start.end [1/2] (short) (narrow) %v3002_v53, %v2998_v52, 16 }
 0xcbd   : > { %v2699_v25 = vpop.permute.xlu2 %2698 }
 0xcbe   : > { %2711 = vmatpush.bf16.msra.mxu3 %v2699_v25 }
 0xcc2   : > { %3836 = vxpose.binary.xlu1.c.b16.start.end [1/2] (short) (narrow) %v2986_v59, %v2982_v34, 16 }
 0xcc3   : > { %2829 = vmatpush.bf16.xpose.msrb.mxu3 %v4111_v17 }
 0xccd   : > { %v2689_v15 = vpop.xlane.xlu0 %2688 }
 0xcce   : > { %3865 = vrcp.f32 %v2689_v15 }
 0xcd4   : > { %v3866_v45 = vpop.eup %3865 }
 0xcd5   : > { %v2695_v9 = vmul.f32 %v3866_v45, %v4486_v0 }
 0xce0   : > { %v2818_v28 = vpop.permute.xlu0 %2817 }
 0xd1c   : > { %2795 = vrot.lane.b32.xlu1 %v4472_v13, %s3971_s25 }
 0xd24   : > { %2752 = vrot.lane.b32.xlu1 %v4465_v41, %s3971_s25 }
 0xd2c   : > { %2774 = vrot.lane.b32.xlu1 %v4469_v51, %s3971_s25 }
 0xd50   : > { %v3840_v3 = vpop.trf.xlu2 }
 0xd51   : > { %v3132_v24 = vrot.slane %v3840_v3, 4 }
 0xd56   : > { %2691 = vadd.xlane.f32.xlu1 %v2690_v32 }
 0xd5e   : > { %v3834_v56 = vpop.trf.xlu1 }
 0xd5f   : > { %v3138_v57 = vrot.slane %v3834_v56, 4 }
 0xd66   : > { %v3835_v1 = vpop.trf.xlu1 }
 0xd67   : > { %v3158_v55 = vrot.slane %v3835_v1, 4 }
 0xd6e   : > { %v3837_v4 = vpop.trf.xlu1 }
 0xd6f   : > { %v3139_v13 = vsel %vm442_vm2, %v3138_v57, %v3837_v4 }
 0xd70   : > { %v3143_v0 = vperm.slane %v3139_v13, %v4087_v20 }
 0xd72   : > { %v3144_v21 = vrot.slane %v3143_v0, 4 }
 0xd76   : > { %v3838_v41 = vpop.trf.xlu1 }
 0xd77   : > { %v3159_v19 = vsel %vm442_vm2, %v3158_v55, %v3838_v41 }
 0xd78   : > { %v3163_v49 = vperm.slane %v3159_v19, %v4087_v20 }
 0xd7a   : > { %v3164_v53 = vrot.slane %v3163_v49, 4 }
 0xd8e   : > { %v2796_v51 = vpop.permute.xlu1 %2795 }
 0xd8f   : > { %3702 = vmatmul.msk.bf16.vlgmr.msrb.gmra.mxu2 %vm294_vm3, %v2796_v51 }
 0xd90   : > { %3842 = vxpose.binary.xlu1.c.b16.start.end [1/2] (short) (narrow) %v2978_v16, %v2974_v39, 16  ;;  %v3841_v16 = vpop.trf.xlu2 }
 0xd91   : > { %v3152_v62 = vrot.slane %v3841_v16, 4 }
 0xd96   : > { %v2753_v33 = vpop.permute.xlu1 %2752 }
 0xd97   : > { %3700 = vmatmul.msk.bf16.vlgmr.msrb.gmra.mxu0 %vm294_vm3, %v2753_v33 }
 0xd9e   : > { %v2775_v23 = vpop.permute.xlu1 %2774 }
 0xd9f   : > { %3701 = vmatmul.msk.bf16.vlgmr.msrb.gmra.mxu1 %vm294_vm3, %v2775_v23 }
 0xdc9   : > { %v2692_v29 = vpop.xlane.xlu1 %2691 }
 0xdca   : > { %3867 = vrcp.f32 %v2692_v29 }
 0xdd0   : > { %v3868_v30 = vpop.eup %3867 }
 0xdd1   : > { %v2696_v31 = vmul.f32 %v3868_v30, %v3864_v12 }
 0xdd3   : > { %v2697_v7 = vpack.c.bf16 %v2696_v31, %v2695_v9  ;;  %v1893_v9 = vpack.c.bf16 %v4447_v5, %v4447_v5 }
 0xdd5   : > { %3699 = vmatmul.msk.bf16.vlgmr.msra.gmra.mxu3 %vm1030_vm6, %v2697_v7 }
 0xde5   : > { %3703 = vmatmul.msk.bf16.vlgmr.msrb.gmra.mxu3 %vm294_vm3, %v2818_v28 }
 0xe12   : > { %v2809_v35 = vpop.f32.mrf.mxu2 }
 0xe13   : > { %3412 = vst [vmem:[#allocation1 + $0x10] ss:$2 sm:$0xff] %v2809_v35 }
 0xe14   : > { %v2766_v36 = vpop.f32.mrf.mxu0 }
 0xe15   : > { %3408 = vst [vmem:[#allocation1] ss:$2 sm:$0xff] %v2766_v36 }
 0xe1a   : > { %v2811_v17 = vpop.f32.mrf.mxu2 }
 0xe1c   : > { %v2768_v37 = vpop.f32.mrf.mxu0  ;;  %v2788_v26 = vpop.f32.mrf.mxu1 }
 0xe1d   : > { %3410 = vst [vmem:[#allocation1 + $0x1] ss:$2 sm:$0xff] %v2788_v26 }
 0xe24   : > { %v2790_v39 = vpop.f32.mrf.mxu1  ;;  %v3415_v51 = vld.sshfl [vmem:[#allocation1] sm:$0xff pattern:$0x75316420] }
 0xe3c   : > { %v3843_v38 = vpop.trf.xlu1 }
 0xe3d   : > { %v3133_v6 = vsel %vm442_vm2, %v3132_v24, %v3843_v38 }
 0xe3e   : > { %v3137_v44 = vperm.slane %v3133_v6, %v4087_v20 }
 0xe40   : > { %v3145_v61 = vsel %vm442_vm2, %v3144_v21, %v3137_v44 }
 0xe41   : > { %v3149_v2 = vperm.slane %v3145_v61, %v4091_v27 }
 0xe43   : > { %v3150_v47 = vrot.slane %v3149_v2, 4  ;;  %v3175_v58 = vshrl.u32 %v3149_v2, 16 }
 0xe44   : > { %v3844_v22 = vpop.trf.xlu1 }
 0xe45   : > { %v3153_v52 = vsel %vm442_vm2, %v3152_v62, %v3844_v22  ;;  %v3151_v59 = vsel %vm442_vm2, 0, %v3150_v47 }
 0xe46   : > { %v3157_v46 = vperm.slane %v3153_v52, %v4087_v20  ;;  %v3181_v56 = vshrl.u32 %v3151_v59, 16 }
 0xe48   : > { %v3165_v8 = vsel %vm442_vm2, %v3164_v53, %v3157_v46 }
 0xe49   : > { %v3169_v54 = vperm.slane %v3165_v8, %v4091_v27 }
 0xe4b   : > { %v3174_v10 = vpack.i.b16 %v3169_v54, %v3149_v2  ;;  %v3176_v34 = vshrl.u32 %v3169_v54, 16  ;;  %v3170_v60 = vrot.slane %v3169_v54, 4 }
 0xe4d   : > { %v3185_v63 = vsel %vm697_vm4, %v3174_v10, 0  ;;  %v3177_v14 = vpack.i.b16 %v3176_v34, %v3175_v58  ;;  %v3171_v12 = vsel %vm442_vm2, 0, %v3170_v60 }
 0xe4e   : > { %3194 = vmatpush.bf16.msra.mxu0 %v3185_v63  ;;  %v3180_v32 = vpack.i.b16 %v3171_v12, %v3151_v59  ;;  %v3182_v1 = vshrl.u32 %v3171_v12, 16 }
 0xe4f   : > { %v3201_v57 = vsel %vm697_vm4, %v3177_v14, 0 }
 0xe50   : > { %3210 = vmatpush.bf16.msra.mxu1 %v3201_v57  ;;  %v3217_v4 = vsel %vm697_vm4, %v3180_v32, 0  ;;  %v3183_v13 = vpack.i.b16 %v3182_v1, %v3181_v56 }
 0xe51   : > { %3226 = vmatpush.bf16.msra.mxu2 %v3217_v4  ;;  %3704 = vmatmul.msk.bf16.vlgmr.msra.gmra.mxu0 %vm294_vm3, %v4412_v50 }
 0xe52   : > { %3430 = vmatpush.bf16.msrb.mxu0 %v4175_v11  ;;  %v3233_v55 = vsel %vm697_vm4, %v3183_v13, 0 }
 0xe53   : > { %3242 = vmatpush.bf16.msra.mxu3 %v3233_v55  ;;  %3705 = vmatmul.msk.bf16.vlgmr.msra.gmra.mxu1 %vm294_vm3, %v4419_v42 }
 0xe54   : > { %3706 = vmatmul.msk.bf16.vlgmr.msra.gmra.mxu2 %vm294_vm3, %v4423_v43 }
 0xe55   : > { %3490 = vmatpush.bf16.msrb.mxu2 %v4189_v40 }
 0xe56   : > { %3707 = vmatmul.msk.bf16.vlgmr.msra.gmra.mxu3 %vm294_vm3, %v4428_v18  ;;  %v3723_v18 = vld [vmem:[%s4043_s11] sm:$0xff] }
 0xe57   : > { %3442 = vrot.lane.b32.xlu1 %v3723_v18, %s3973_s27 }
 0xe58   : > { %v4551_v11 = vpop.f32.mrf.mxu3 }
 0xe59   : > { %v2718_v13 = vpack.c.bf16 %v4551_v11, %v4551_v11  ;;  %v1892_v11 = vpack.c.bf16 %v4444_v48, %v4444_v48 }
 0xe60   : > { %v2715_v41 = vpop.f32.mrf.mxu3 }
 0xe61   : > { %v2719_v31 = vpack.c.bf16 %v2715_v41, %v2715_v41 }
 0xe68   : > { %v2831_v19 = vpop.f32.mrf.mxu3 }
 0xe69   : > { %3414 = vst [vmem:[#allocation1 + $0x11] ss:$2 sm:$0xff] %v2831_v19 }
 0xe70   : > { %v2833_v50 = vpop.f32.mrf.mxu3  ;;  %v3416_v33 = vld.sshfl [vmem:[#allocation1 + $0x10] sm:$0xff pattern:$0x75316420] }
 0xe71   : > { %v3419_v40 = vpack.c.bf16 %v3416_v33, %v3415_v51 }
 0xe73   : > { %3708 = vmatmul.msk.bf16.vlgmr.msrb.gmra.mxu0 %vm944_vm5, %v3419_v40 }
 0xec9   : > { %v3443_v7 = vpop.permute.xlu1 %3442 }
 0xeca   : > { %v3448_v28 = vsel %vm294_vm3, %v3443_v7, 0 }
 0xecb   : > { %3457 = vmatpush.bf16.xpose.msrb.mxu1 %v3448_v28 }
 0xece   : > { %v3196_v23 = vpop.f32.mrf.mxu0 }
 0xecf   : > { %3248 = vxpose.xlu2.b32.start.end [1/1] (short) (narrow) %v3196_v23, 8 }
 0xed0   : > { %v3212_v42 = vpop.f32.mrf.mxu1 }
 0xed6   : > { %v3198_v25 = vpop.f32.mrf.mxu0 }
 0xed7   : > { %v3228_v43 = vpop.f32.mrf.mxu2 }
 0xed8   : > { %3312 = vxpose.xlu0.b32.start.end [1/1] (short) (narrow) %v3228_v43, 8  ;;  %v3214_v15 = vpop.f32.mrf.mxu1 }
 0xed9   : > { %v3244_v29 = vpop.f32.mrf.mxu3 }
 0xeda   : > { %3344 = vxpose.xlu2.b32.start.end [1/1] (short) (narrow) %v3244_v29, 8 }
 0xedf   : > { %v3230_v45 = vpop.f32.mrf.mxu2 }
 0xee0   : > { %3280 = vxpose.xlu0.b32.start.end [1/1] (short) (narrow) %v3212_v42, 8 }
 0xee1   : > { %v3246_v30 = vpop.f32.mrf.mxu3 }
 0xef0   : > { %v3432_v54 = vpop.f32.mrf.mxu0 }
 0xef8   : > { %v3434_v14 = vpop.f32.mrf.mxu0 }
 0xf43   : > { %3440 = vrot.lane.b32.xlu2 %v3723_v18, %s3971_s25 }
 0xf4b   : > { %3524 = vrot.lane.b32.xlu2 %v3723_v18, %s3974_s28 }
 0xf53   : > { %1898 = vrot.lane.b32.xlu2 %v1893_v9, %s3975_s29 }
 0xf5b   : > { %2724 = vrot.lane.b32.xlu2 %v2719_v31, %s3976_s30 }
 0xf68   : > { %v3264_v35 = vpop.trf.xlu2 }
 0xf73   : > { %v3360_v37 = vpop.trf.xlu2 }
 0xf74   : > { %v3382_v39 = vrot.slane %v3360_v37, 4 }
 0xf7c   : > { %v3328_v36 = vpop.trf.xlu0 }
 0xf7d   : > { %v3376_v17 = vrot.slane %v3328_v36, 4 }
 0xf7f   : > { %v3377_v26 = vsel %vm442_vm2, %v3376_v17, %v3264_v35 }
 0xf80   : > { %v3381_v5 = vperm.slane %v3377_v26, %v4087_v20 }
 0xf82   : > { %v3390_v0 = vrot.slane %v3381_v5, 4 }
 0xf84   : > { %v3296_v3 = vpop.trf.xlu0 }
 0xf85   : > { %v3383_v24 = vsel %vm442_vm2, %v3382_v39, %v3296_v3 }
 0xf86   : > { %v3387_v38 = vperm.slane %v3383_v24, %v4087_v20 }
 0xf88   : > { %v3388_v6 = vrot.slane %v3387_v38, 4  ;;  %v3391_v21 = vsel %vm442_vm2, %v3387_v38, %v3390_v0 }
 0xf89   : > { %v3399_v44 = vperm.slane %v3391_v21, %v4091_v27 }
 0xf8a   : > { %v3389_v16 = vsel %vm442_vm2, %v3388_v6, %v3381_v5 }
 0xf8b   : > { %v3395_v61 = vperm.slane %v3389_v16, %v4091_v27  ;;  %v3402_v62 = vrot.slane %v3399_v44, 4  ;;  %3472 = vst [vmem:[#allocation1 + $0x10] ss:$2 sm:$0xff] %v3399_v44 }
 0xf8d   : > { %v3400_v49 = vrot.slane %v3395_v61, 4  ;;  %v3403_v2 = vsel %vm442_vm2, 0.0, %v3402_v62  ;;  %3468 = vst [vmem:[#allocation1] ss:$2 sm:$0xff] %v3395_v61 }
 0xf8e   : > { %3474 = vst [vmem:[#allocation1 + $0x11] ss:$2 sm:$0xff] %v3403_v2 }
 0xf8f   : > { %v3401_v22 = vsel %vm442_vm2, 0.0, %v3400_v49 }
 0xf90   : > { %3470 = vst [vmem:[#allocation1 + $0x1] ss:$2 sm:$0xff] %v3401_v22 }
 0xf95   : > { %v3476_v52 = vld.sshfl [vmem:[#allocation1 + $0x10] sm:$0xff pattern:$0x75316420] }
 0xf97   : > { %v3475_v20 = vld.sshfl [vmem:[#allocation1] sm:$0xff pattern:$0x75316420] }
 0xf98   : > { %v3479_v53 = vpack.c.bf16 %v3476_v52, %v3475_v20 }
 0xf9a   : > { %3714 = vmatmul.msk.bf16.vlgmr.msrb.gmra.mxu2 %vm944_vm5, %v3479_v53 }
 0xf9d   : > { %v3441_v46 = vpop.permute.xlu2 %3440 }
 0xf9e   : > { %3713 = vmatmul.msk.bf16.vlgmr.msrb.gmra.mxu1 %vm294_vm3, %v3441_v46 }
 0xfa5   : > { %v3525_v47 = vpop.permute.xlu2 %3524 }
 0xfa6   : > { %3537 = vmatpush.bf16.msrb.mxu3 %v3525_v47 }
 0xfad   : > { %v1899_v27 = vpop.permute.xlu2 %1898 }
 0xfae   : > { %1904 = vst.msk [vmem:[#allocation2 + $0x4] sm:$0xf] %vm1902_vm8, %v1899_v27 }
 0xfb5   : > { %v2725_v8 = vpop.permute.xlu2 %2724 }
 0xfb6   : > { %2730 = vst.msk [vmem:[#allocation2 + $0x4] sm:$0xf] %vm2728_vm9, %v2725_v8 }
0x101b   : > { %v3459_v58 = vpop.f32.mrf.mxu1 }
0x101c   : > { %v3460_v10 = vadd.f32 %v3459_v58, %v3432_v54 }
0x101d   : > { %v3492_v34 = vpop.f32.mrf.mxu2 }
0x101e   : > { %v3497_v59 = vadd.f32 %v3492_v34, %v3460_v10 }
0x1020   : > { %v3499_v60 = vmul.f32 0.35355338, %v3497_v59 }
0x1022   : > { %v3501_v63 = vsel %vm1030_vm6, %v3499_v60, -inf }
0x1023   : > { %v3461_v12 = vpop.f32.mrf.mxu1  ;;  %3502 = vmax.xlane.f32.xlu0 %v3501_v63 }
0x1024   : > { %v3462_v32 = vadd.f32 %v3461_v12, %v3434_v14 }
0x1025   : > { %v3494_v56 = vpop.f32.mrf.mxu2 }
0x1026   : > { %v3498_v1 = vadd.f32 %v3494_v56, %v3462_v32 }
0x1028   : > { %v3500_v57 = vmul.f32 0.35355338, %v3498_v1 }
0x102a   : > { %v3504_v4 = vsel %vm1030_vm6, %v3500_v57, -inf }
0x102b   : > { %3505 = vmax.xlane.f32.xlu1 %v3504_v4 }
0x1037   : > { %2722 = vrot.lane.b32.xlu0 %v2718_v13, %s3976_s30 }
0x1096   : > { %v3503_v55 = vpop.xlane.xlu0 %3502 }
0x1097   : > { %v3507_v41 = vsub.f32 %v3499_v60, %v3503_v55 }
0x1099   : > { %v3509_v19 = vmul.f32 1.442695, %v3507_v41 }
0x109b   : > { %3869 = vpow2.f32 %v3509_v19 }
0x109e   : > { %v3506_v50 = vpop.xlane.xlu1 %3505 }
0x109f   : > { %v3508_v51 = vsub.f32 %v3500_v57, %v3506_v50 }
0x10a1   : > { %v3870_v33 = vpop.eup %3869  ;;  %v3511_v40 = vmul.f32 1.442695, %v3508_v51 }
0x10a2   : > { %v3513_v23 = vsel %vm1030_vm6, %v3870_v33, 0.0 }
0x10a3   : > { %3871 = vpow2.f32 %v3511_v40  ;;  %3514 = vadd.xlane.f32.xlu1 %v3513_v23 }
0x10a9   : > { %v3872_v42 = vpop.eup %3871  ;;  %v2723_v7 = vpop.permute.xlu0 %2722 }
0x10aa   : > { %v3516_v25 = vsel %vm1030_vm6, %v3872_v42, 0.0 }
0x10ab   : > { %3517 = vadd.xlane.f32.xlu1 %v3516_v25 }
0x10c4   : > { %1896 = vrot.lane.b32.xlu1 %v1892_v11, %s3975_s29 }
0x1116   : > { %v3515_v43 = vpop.xlane.xlu1 %3514 }
0x1117   : > { %3873 = vrcp.f32 %v3515_v43 }
0x111d   : > { %v3874_v18 = vpop.eup %3873 }
0x111e   : > { %v3518_v15 = vpop.xlane.xlu1 %3517  ;;  %v3521_v45 = vmul.f32 %v3874_v18, %v3870_v33 }
0x111f   : > { %3875 = vrcp.f32 %v3518_v15 }
0x1125   : > { %v3876_v29 = vpop.eup %3875 }
0x1126   : > { %v3522_v30 = vmul.f32 %v3876_v29, %v3872_v42 }
0x1128   : > { %v3523_v9 = vpack.c.bf16 %v3522_v30, %v3521_v45 }
0x112a   : > { %3715 = vmatmul.msk.bf16.vlgmr.msrb.gmra.mxu3 %vm1030_vm6, %v3523_v9 }
0x1136   : > { %v1897_v31 = vpop.permute.xlu1 %1896 }
0x1137   : > { %1903 = vst.msk [vmem:[#allocation2] sm:$0xf] %vm1902_vm8, %v1897_v31 }
0x1138   : > { %2729 = vst.msk [vmem:[#allocation2] sm:$0xf] %vm2728_vm9, %v2723_v7 }
0x11ad   : > { %v3539_v48 = vpop.f32.mrf.mxu3 }
0x11ae   : > { %v3544_v28 = vpack.c.bf16 %v3539_v48, %v3539_v48 }
0x11b0   : > { %3548 = vrot.lane.b32.xlu2 %v3544_v28, %s3977_s6 }
0x11b5   : > { %v3541_v35 = vpop.f32.mrf.mxu3 }
0x11b6   : > { %v3545_v36 = vpack.c.bf16 %v3541_v35, %v3541_v35 }
0x11b8   : > { %3550 = vrot.lane.b32.xlu1 %v3545_v36, %s3977_s6 }
0x120a   : > { %v3549_v17 = vpop.permute.xlu2 %3548 }
0x120b   : > { %3555 = vst.msk [vmem:[#allocation2] sm:$0xf] %vm3554_vm10, %v3549_v17 }
0x1212   : > { %v3557_v37 = vld [vmem:[#allocation2] sm:$0xf] }
0x1213   : > { %3560 = vst.msk [vmem:[%s258_s10] sm:$0xf] %vm3559_vm11, %v3557_v37 }
0x122a   : > { %v3551_v26 = vpop.permute.xlu1 %3550 }
0x122b   : > { %3556 = vst.msk [vmem:[#allocation2 + $0x4] sm:$0xf] %vm3554_vm10, %v3551_v26 }
0x1232   : > { %v3558_v39 = vld [vmem:[#allocation2 + $0x4] sm:$0xf] }
0x1233   : > { %3561 = vst.msk [vmem:[%s258_s10 + $0x4] sm:$0xf] %vm3559_vm11, %v3558_v39 }
0x1234 PF: > { %s17_s18 = sadd.s32 1, %s3956_s18  }
0x1235   : > { %p14_p7 = scmp.ge.s32.totalorder %s17_s18, 4  }
0x1237   :  { %16 = sbr.rel (!%p14_p7) target bundleno = 2 (0x2), region = 106 }
0x123c   :  { %3583 = vsyncpa [#allocation4], 1 }
0x123d   :  { %3585 = vsyncpa [#allocation4 + $0x1], 1 }
0x123e   :  { %3586 = vsyncpa [#allocation6], 1 }

// kernel: normal_cell_forward.11
= control target key start
LH: loop header
LB: loop body
LE: loop exit
PB: predicated region body
PF: predicated region fallthrough
CT: control target
= control target key end

     0   :  { %9 = vsyncpa [#allocation3], 0  ;;  %s715_s0 = inlined_call_operand.vmem [shape: bf16[32,128], index: 0, kind: input, shape index: {}]   ;;  %s716_s1 = inlined_call_operand.vmem [shape: bf16[128,32], index: 1, kind: input, shape index: {}]   ;;  %s717_s2 = inlined_call_operand.vmem [shape: f32[1,32], index: 2, kind: input, shape index: {}]   ;;  %s718_s3 = inlined_call_operand.vmem [shape: f32[32,32], index: 3, kind: input, shape index: {}]   ;;  %s719_s4 = inlined_call_operand.hbm [shape: f32[32,32], index: 4, kind: output, shape index: {}]  }
   0x1   :  { %11 = vsyncpa [#allocation3 + $0x1], 0  ;;  %s601_s15 = smov 0   ;;  %s603_s16 = smov 0  }
   0x2   :  { %s605_s17 = smov 0   ;;  %s607_s18 = smov 0  }
   0x3 LB: > { %s622_s19 = sadd.s32 4294967295, %s572_s18   ;;  %s408_s20 = sadd.s32 4294967294, %s572_s18   ;;  %s572_s18 = sphi %s607_s18, %s725_s18   ;;  %s568_s17 = sphi %s605_s17, %s724_s17   ;;  %s564_s16 = sphi %s603_s16, %s723_s16   ;;  %s560_s15 = sphi %s601_s15, %s722_s15  }
   0x4   : > { %s626_s21 = sadd.s32 1, %s572_s18   ;;  %s118_s22 = sadd.s32 1, %s568_s17 }
   0x5   : > { %s115_s23 = ssub.s32 %s572_s18, %s626_s21  ;;  %p128_p0 = scmp.ne.s32.totalorder %s568_s17, %s564_s16 }
   0x6   : > { %p116_p1 = scmp.eq.s32.totalorder %s115_s23, 0  ;;  %p129_p2 = scmp.eq.s32.totalorder %s622_s19, 1 }
   0x7   : > { %p134_p3 = scmp.ne.s32.totalorder %s564_s16, %s560_s15  ;;  %p135_p4 = scmp.eq.s32.totalorder %s408_s20, 1 }
   0x8   : > { %s637_s24 = scalar_select %p116_p1, %s568_s17, %s118_s22  }
   0x9   : > { %p639_p5 = por %p129_p2, %p128_p0  ;;  %p643_p6 = por %p135_p4, %p134_p3 }
   0xa   : > { %p411_p7 = scmp.ge.s32.totalorder %s572_s18, 1  ;;  %p177_p8 = scmp.lt.s32.totalorder %s572_s18, 3 }
   0xc   : > { %p178_p9 = pnand %p411_p7, %p177_p8 }
   0xd   : > { %s413_s9 = sshll.u32 (!%p178_p9), %s622_s19, 1  ;;  %s205_s6 = sand.u32 (!%p178_p9), 1, %s564_s16  }
   0xe   : > { %181 = sbr.rel (%p178_p9) target bundleno = 193 (0xc1), region = 36  ;;  %p209_p10 = scmp.lt.s32.totalorder (!%p178_p9), %s413_s9, 3 }
   0xf   : > { %s412_s13 = sshll.u32 (!%p178_p9), %s205_s6, 4  ;;  %s467_s14 = sshll.u32 (!%p178_p9), %s622_s19, 4 }
  0x10   : > { %s207_s23 = scalar_lea.vmem (!%p178_p9), [#allocation2], %s412_s13  ;;  %s319_s29 = scalar_lea.sflag (!%p178_p9), [#allocation3], %s205_s6 }
  0x11   : > { %s331_s27 = sshll.u32 (!%p178_p9), %s207_s23, 4  ;;  %s530_s8 = scalar_lea.hbm (!%p178_p9), %s719_s4, 32  ;;  %s332_s27 = int_to_ptr.vmem [resolvable:$true] %s331_s27 }
  0x13   : > { %v466_v0 = vld [vmem:[%s716_s1 + $0x38] sm:$0xff]  ;;  %v465_v1 = vld [vmem:[%s716_s1 + $0x30] sm:$0xff]  ;;  %v464_v2 = vld [vmem:[%s716_s1 + $0x28] sm:$0xff]  ;;  %s727_s9 = smov (!%p209_p10, %s413_s9), 3  ;;  %vm315_vm0 = vcmask 261120  }
  0x14   : > { %297 = vmatpush.bf16.msra.mxu0 %v466_v0  ;;  %v463_v3 = vld [vmem:[%s716_s1 + $0x20] sm:$0xff]  ;;  %v462_v4 = vld [vmem:[%s716_s1 + $0x18] sm:$0xff]  ;;  %v461_v5 = vld [vmem:[%s716_s1 + $0x10] sm:$0xff]  ;;  %s414_s22 = sshll.u32 %s727_s9, 2  ;;  %s416_s5 = sshll.u32 %s727_s9, 3 }
  0x15   : > { %v460_v6 = vld [vmem:[%s716_s1 + $0x8] sm:$0xff]  ;;  %v459_v7 = vld [vmem:[%s716_s1] sm:$0xff]  ;;  %s212_s30 = scalar_lea.vmem %s715_s0, %s414_s22  ;;  %s218_s10 = scalar_lea.vmem %s718_s3, %s416_s5 }
  0x16   : > { %v458_v8 = vld [vmem:[%s212_s30] sm:$0xff]  ;;  %s330_s9 = scalar_lea.hbm %s719_s4, %s467_s14  ;;  %v312_v15 = vld [vmem:[%s218_s10 + $0x8] sm:$0xff] }
  0x17   : > { %v509_v9 = vld [vmem:[%s717_s2] ss:$0 sm:$0xff]  ;;  %s333_s28 = sshll.u32 %s330_s9, 4  ;;  %s334_s28 = int_to_ptr.hbm [resolvable:$true] %s333_s28 }
  0x18   : > { %298 = vmatpush.bf16.msra.mxu0 %v465_v1  ;;  %v311_v11 = vld [vmem:[%s218_s10] sm:$0xff]  ;;  %s524_s19 = sshra.s32 %s334_s28, 4  ;;  %s525_s19 = int_to_ptr.hbm [resolvable:$true] %s524_s19 }
  0x19   : > { %s526_s30 = scalar_lea.hbm %s525_s19, 16  ;;  %p531_p0 = scmp.lt.s32.totalorder %s525_s19, %s719_s4 }
  0x1a   : > { %p527_p11 = scmp.ne.s32.totalorder %s525_s19, %s526_s30  ;;  %p532_p1 = scmp.lt.s32.totalorder %s530_s8, %s526_s30 }
  0x1c   : > { %299 = vmatpush.bf16.msra.mxu0 %v464_v2  ;;  %p528_p12 = pnand %p527_p11, %p639_p5  ;;  %p533_p2 = por %p532_p1, %p531_p0 }
  0x1e   : > { %p529_p13 = pneg %p528_p12 }
  0x20   : > { %300 = vmatpush.bf16.msra.mxu0 %v463_v3  ;;  %p534_p3 = pnand %p533_p2, %p529_p13 }
  0x24   : > { %301 = vmatpush.bf16.msra.mxu0 %v462_v4 }
  0x28   : > { %302 = vmatpush.bf16.msra.mxu0 %v461_v5 }
  0x2c   : > { %303 = vmatpush.bf16.msra.mxu0 %v460_v6 }
  0x30   : > { %304 = vmatpush.bf16.msra.mxu0 %v459_v7 }
  0x33   : > { %305 = vmatmul.bf16.vlgmr.msra.gmra.mxu0 %v458_v8 }
  0xb0   : > { %v306_v10 = vpop.f32.mrf.mxu0 }
  0xb1   : > { %v307_v12 = vadd.f32 %v509_v9, %v306_v10 }
  0xb3   : > { %v313_v13 = vadd.f32 %v311_v11, %v307_v12 }
  0xb5   : > { %316 = vst.msk [vmem:[%s207_s23] sm:$0xff] %vm315_vm0, %v313_v13 }
  0xb8   : > { %v308_v14 = vpop.f32.mrf.mxu0 }
  0xb9   : > { %v309_v16 = vadd.f32 %v509_v9, %v308_v14 }
  0xbb   : > { %v314_v17 = vadd.f32 %v312_v15, %v309_v16 }
  0xbd   : > { %317 = vst.msk [vmem:[%s207_s23 + $0x8] sm:$0xff] %vm315_vm0, %v314_v17 }
  0xbe   : > { %537 = shalt.err (!%p534_p3)
}
  0xbf   : > { %s574_s6 = smov 128   ;;  %s575_s10 = smov 8  }
  0xc0   : > { %468 = dma.vmem_to_hbm [thread:$0]  (%p639_p5), %s332_s27, 256, %s334_s28, %s319_s29, %s574_s6, %s574_s6, %s575_s10  }
  0xc1 PF: > { %p474_p4 = scmp.ge.s32.totalorder %s572_s18, 2  ;;  %s348_s13 = sand.u32 1, %s560_s15  }
  0xc2   : > { %s349_s14 = scalar_lea.sflag [#allocation3], %s348_s13 }
  0xc3   : > { %p471_p7 = pnand %p474_p4, %p643_p6 }
  0xc5   : > { %p472_p8 = pneg %p471_p7 }
  0xc7   : > { %555 = dma.done.wait (%p472_p8), %s349_s14, 256  }
  0xc8   : > { %557 = vsyncadd (%p472_p8), %s349_s14, 4294967040  ;;  %p14_p9 = scmp.ge.s32.totalorder %s626_s21, 4   ;;  %s722_s15 = smov %s564_s16 }
  0xc9   : > { %s723_s16 = smov %s568_s17  ;;  %s724_s17 = smov %s637_s24 }
  0xca   : > { %s725_s18 = smov %s626_s21  ;;  %16 = sbr.rel (!%p14_p9) target bundleno = 3 (0x3), region = 74 }
  0xcf   :  { %355 = vsyncpa [#allocation3], 1 }
  0xd0   :  { %357 = vsyncpa [#allocation3 + $0x1], 1 }

// kernel: normal_cell_forward.6
= control target key start
LH: loop header
LB: loop body
LE: loop exit
PB: predicated region body
PF: predicated region fallthrough
CT: control target
= control target key end

     0   :  { %s3402_s24 = smov 0   ;;  %s3404_s25 = smov 0   ;;  %s4073_s0 = inlined_call_operand.vmem [shape: f32[2,16,32], index: 0, kind: input, shape index: {}]   ;;  %s4074_s1 = inlined_call_operand.vmem [shape: bf16[288,128], index: 1, kind: input, shape index: {}]   ;;  %s4075_s2 = inlined_call_operand.vmem [shape: f32[1,128], index: 2, kind: input, shape index: {}]   ;;  %s4076_s3 = inlined_call_operand.vmem [shape: f32[1,128], index: 3, kind: input, shape index: {}]   ;;  %s4077_s4 = inlined_call_operand.vmem [shape: f32[1,128], index: 4, kind: input, shape index: {}]   ;;  %s4078_s5 = inlined_call_operand.vmem [shape: bf16[1152,32], index: 5, kind: input, shape index: {}]   ;;  %s4079_s6 = inlined_call_operand.vmem [shape: f32[1,32], index: 6, kind: input, shape index: {}]   ;;  %s4080_s7 = inlined_call_operand.vmem [shape: f32[2,16,32], index: 7, kind: output, shape index: {}]  }
   0x1   :  { %s3406_s26 = smov 0  }
   0x2 LB: > { %s29_s27 = sadd.s32 1, %s3352_s25  ;;  %p2786_p0 = scmp.ge.s32.totalorder %s3356_s26, 1  ;;  %s3356_s26 = sphi %s3406_s26, %s17_s26   ;;  %s3352_s25 = sphi %s3404_s25, %s4098_s25   ;;  %s3348_s24 = sphi %s3402_s24, %s4097_s24  }
   0x3   : > { %p31_p1 = scmp.ge.s32.totalorder %s29_s27, 2  ;;  %p268_p2 = scmp.lt.s32.totalorder %s3356_s26, 3 }
   0x5   : > { %s4100_s27 = smov (%p31_p1, %s29_s27), 0  ;;  %p269_p3 = pnand %p2786_p0, %p268_p2 }
   0x6   : > { %p310_p4 = scmp.lt.s32.totalorder (!%p269_p3), %s3348_s24, 1  ;;  %s3359_s9 = smov (!%p269_p3), 32  }
   0x7   : > { %272 = sbr.rel (%p269_p3) target bundleno = 656 (0x290), region = 48  ;;  %s3360_s10 = smov (!%p269_p3), 64  }
   0x8   : > { %s3361_s11 = smov (!%p269_p3), 96  }
   0xc   : > { %vm335_vm0 = vcmask 256000   ;;  %vm339_vm1 = vcmask 253952   ;;  %vm340_vm2 = vsmask.f32 256  ;;  %v3358_v0 = vmov 0   ;;  %s4102_s24 = smov (!%p310_p4, %s3348_s24), 1 }
   0xd   : > { %336 = vst.msk [vmem:[#allocation2] sm:$0x7] %vm335_vm0, %v3358_v0  ;;  %vm3423_vm3 = vmand %vm339_vm1, %vm340_vm2  ;;  %v345_v2 = vld [vmem:[#allocation2 + $0x4] sm:$0x1]  ;;  %v348_v3 = vld [vmem:[#allocation2 + $0x8] sm:$0x1] }
   0xe   : > { %v346_v4 = vsel %vm3423_vm3, 0, %v345_v2  ;;  %v349_v5 = vsel %vm3423_vm3, 0, %v348_v3  ;;  %v351_v6 = vld [vmem:[#allocation2 + $0xc] sm:$0x1]  ;;  %vm360_vm4 = vcmask 256002   ;;  %s3202_s28 = sshll.u32 %s4102_s24, 4 }
   0xf   : > { %347 = vst [vmem:[#allocation2 + $0x4] sm:$0x1] %v346_v4  ;;  %v352_v7 = vsel %vm3423_vm3, 0, %v351_v6  ;;  %vm361_vm5 = vsmask.f32 7946  ;;  %s314_s8 = scalar_lea.vmem %s4073_s0, %s3202_s28  ;;  %vm500_vm9 = vcmask 1041408   ;;  %s329_s22 = scalar_lea.vmem %s4080_s7, %s3202_s28 }
  0x10   : > { %350 = vst [vmem:[#allocation2 + $0x8] sm:$0x1] %v349_v5  ;;  %vm3437_vm6 = vmand %vm360_vm4, %vm361_vm5  ;;  %v366_v9 = vld [vmem:[#allocation2 + $0x4] sm:$0x4]  ;;  %v369_v11 = vld [vmem:[#allocation2 + $0x8] sm:$0x4] }
  0x11   : > { %353 = vst [vmem:[#allocation2 + $0xc] sm:$0x1] %v352_v7  ;;  %v367_v10 = vsel %vm3437_vm6, 0, %v366_v9  ;;  %v370_v12 = vsel %vm3437_vm6, 0, %v369_v11  ;;  %v372_v13 = vld [vmem:[#allocation2 + $0xc] sm:$0x4] }
  0x12   : > { %368 = vst [vmem:[#allocation2 + $0x4] sm:$0x4] %v367_v10  ;;  %v424_v14 = vld [vmem:[%s314_s8] sm:$0xff]  ;;  %v373_v15 = vsel %vm3437_vm6, 0, %v372_v13  ;;  %v425_v16 = vld [vmem:[%s314_s8 + $0x8] sm:$0xff]  ;;  %vm504_vm13 = vcmask 1043458  }
  0x13   : > { %371 = vst [vmem:[#allocation2 + $0x8] sm:$0x4] %v370_v12  ;;  %v428_v17 = vrot.slane %v424_v14, 4  ;;  %v432_v18 = vpack.c.bf16 %v424_v14, %v424_v14  ;;  %v434_v21 = vpack.c.bf16 %v425_v16, %v425_v16  ;;  %v429_v32 = vrot.slane %v425_v16, 4  ;;  %v354_v45 = vld [vmem:[#allocation2 + $0x10] sm:$0x1] }
  0x14   : > { %v342_v19 = vld [vmem:[#allocation2] sm:$0x1]  ;;  %v363_v20 = vld [vmem:[#allocation2] sm:$0x4]  ;;  %374 = vst [vmem:[#allocation2 + $0xc] sm:$0x4] %v373_v15 }
  0x15   : > { %v343_v22 = vsel %vm3423_vm3, 0, %v342_v19  ;;  %v364_v23 = vsel %vm3437_vm6, 0, %v363_v20  ;;  %v433_v24 = vpack.c.bf16 %v428_v17, %v428_v17  ;;  %v437_v25 = vshrl.u32 %v432_v18, 16  ;;  %338 = vst.msk [vmem:[#allocation2 + $0x14] sm:$0x7] %vm335_vm0, %v3358_v0 }
  0x16   : > { %344 = vst [vmem:[#allocation2] sm:$0x1] %v343_v22  ;;  %v440_v26 = vshll.u32 %v432_v18, 16  ;;  %v451_v27 = vshrl.u32 %v434_v21, 16  ;;  %v454_v28 = vshll.u32 %v434_v21, 16  ;;  %v3467_v43 = vpack.c.bf16 %v429_v32, %v429_v32 }
  0x17   : > { %365 = vst [vmem:[#allocation2] sm:$0x4] %v364_v23  ;;  %v439_v29 = vrot.slane %v437_v25, 7  ;;  %v444_v30 = vshrl.u32 %v433_v24, 16  ;;  %v447_v31 = vshll.u32 %v433_v24, 16  ;;  %v355_v49 = vsel %vm3423_vm3, 0, %v354_v45 }
  0x18   : > { %v453_v33 = vrot.slane %v451_v27, 7  ;;  %vm470_vm7 = vsmask.f32 2306  ;;  %vm526_vm10 = vsmask.f32 1280  ;;  %v458_v52 = vshrl.u32 %v3467_v43, 16 }
  0x19   : > { %v442_v34 = vor.u32 %v440_v26, %v439_v29  ;;  %v446_v35 = vrot.slane %v444_v30, 7  ;;  %vm3460_vm8 = vmand %vm335_vm0, %vm470_vm7  ;;  %v472_v37 = vld [vmem:[#allocation2 + $0x4] sm:$0x7]  ;;  %381 = vst [vmem:[#allocation3] sm:$0x7] %v3358_v0  ;;  %v461_v62 = vshll.u32 %v3467_v43, 16 }
  0x1a   : > { %v456_v38 = vor.u32 %v454_v28, %v453_v33  ;;  %v475_v39 = vld [vmem:[#allocation2 + $0x8] sm:$0x7]  ;;  %vm527_vm11 = vsmask.f32 3336  ;;  %vm529_vm12 = vsmask.f32 5392 }
  0x1b   : > { %v449_v40 = vor.u32 %v447_v31, %v446_v35  ;;  %v473_v41 = vsel %vm3460_vm8, %v442_v34, %v472_v37  ;;  %v478_v42 = vld [vmem:[#allocation2 + $0xc] sm:$0x7]  ;;  %vm531_vm14 = vsmask.f32 7448  ;;  %v375_v51 = vld [vmem:[#allocation2 + $0x10] sm:$0x4]  ;;  %vm528_vm15 = vmor %vm526_vm10, %vm527_vm11 }
  0x1c   : > { %474 = vst [vmem:[#allocation2 + $0x4] sm:$0x7] %v473_v41  ;;  %v479_v44 = vsel %vm3460_vm8, %v456_v38, %v478_v42  ;;  %v376_v53 = vsel %vm3437_vm6, 0, %v375_v51  ;;  %v460_v61 = vrot.slane %v458_v52, 7  ;;  %vm530_vm0 = vmor %vm528_vm15, %vm529_vm12  ;;  %vm384_vm4 = vcmask 1040384  }
  0x1d   : > { %v476_v46 = vsel %vm3460_vm8, %v449_v40, %v475_v39  ;;  %480 = vst [vmem:[#allocation2 + $0xc] sm:$0x7] %v479_v44  ;;  %v484_v47 = vld [vmem:[#allocation2] sm:$0x3]  ;;  %vm3492_vm1 = vmor %vm530_vm0, %vm531_vm14  ;;  %vm404_vm10 = vcmask 1042434   ;;  %vm626_vm12 = vcmask 1044484  }
  0x1e   : > { %477 = vst [vmem:[#allocation2 + $0x8] sm:$0x7] %v476_v46  ;;  %v488_v48 = vld [vmem:[#allocation2] sm:$0x7]  ;;  %v463_v34 = vor.u32 %v461_v62, %v460_v61  ;;  %vm625_vm11 = vmor %vm384_vm4, %vm404_vm10  ;;  %vm628_vm14 = vcmask 1046534   ;;  %vm1075_vm0 = vcmask 785408  }
  0x1f   : > { %v496_v50 = vrot.slane %v488_v48, 2  ;;  %944 = vst [vmem:[#allocation1] ss:$4 sm:$0xff] %v484_v47  ;;  %v585_v33 = vld [vmem:[#allocation2] sm:$0x6] }
  0x20   : > { %383 = vst [vmem:[#allocation3 + $0x14] sm:$0x7] %v3358_v0 }
  0x21   : > { %v503_v54 = vsel %vm500_vm9, %v488_v48, %v496_v50  ;;  %v505_v55 = vsel %vm504_vm13, %v488_v48, %v496_v50  ;;  %356 = vst [vmem:[#allocation2 + $0x10] sm:$0x1] %v355_v49 }
  0x22   : > { %v507_v56 = vrot.slane %v505_v55, 2  ;;  %v533_v57 = vshrl.u32 %v503_v54, 16  ;;  %v536_v58 = vshll.u32 %v503_v54, 16  ;;  %377 = vst [vmem:[#allocation2 + $0x10] sm:$0x4] %v376_v53  ;;  %v593_v55 = vrot.slane %v585_v33, 2 }
  0x23   : > { %v485_v59 = vld [vmem:[#allocation2 + $0x4] sm:$0x3] }
  0x24   : > { %v489_v60 = vld [vmem:[#allocation2 + $0x4] sm:$0x7]  ;;  %v487_v63 = vld [vmem:[#allocation2 + $0xc] sm:$0x3]  ;;  %v535_v3 = vrot.slane %v533_v57, 6  ;;  %v538_v7 = vrot.slane %v536_v58, 7 }
  0x25   : > { %v491_v0 = vld [vmem:[#allocation2 + $0xc] sm:$0x7]  ;;  %v497_v2 = vrot.slane %v489_v60, 2  ;;  %v486_v4 = vld [vmem:[#allocation2 + $0x8] sm:$0x3]  ;;  %v542_v12 = vshll.u32 %v507_v56, 16 }
  0x26   : > { %v490_v5 = vld [vmem:[#allocation2 + $0x8] sm:$0x7]  ;;  %v499_v6 = vrot.slane %v491_v0, 2  ;;  %947 = vst [vmem:[#allocation1 + $0x1] ss:$4 sm:$0xff] %v485_v59  ;;  %v539_v16 = vor.u32 %v538_v7, %v535_v3 }
  0x27   : > { %v498_v9 = vrot.slane %v490_v5, 2  ;;  %v510_v10 = vsel %vm500_vm9, %v489_v60, %v497_v2  ;;  %v511_v11 = vsel %vm504_vm13, %v489_v60, %v497_v2  ;;  %950 = vst [vmem:[#allocation1 + $0x2] ss:$4 sm:$0xff] %v486_v4  ;;  %v544_v20 = vrot.slane %v542_v12, 7  ;;  %v586_v45 = vld [vmem:[#allocation2 + $0x4] sm:$0x6] }
  0x28   : > { %v513_v13 = vrot.slane %v511_v11, 2  ;;  %v522_v14 = vsel %vm500_vm9, %v491_v0, %v499_v6  ;;  %v523_v15 = vsel %vm504_vm13, %v491_v0, %v499_v6  ;;  %953 = vst [vmem:[#allocation1 + $0x3] ss:$4 sm:$0xff] %v487_v63  ;;  %v540_v23 = vrot.slane %v539_v16, 2  ;;  %v587_v48 = vld [vmem:[#allocation2 + $0x8] sm:$0x6] }
  0x29   : > { %v516_v17 = vsel %vm500_vm9, %v490_v5, %v498_v9  ;;  %v517_v18 = vsel %vm504_vm13, %v490_v5, %v498_v9  ;;  %v525_v19 = vrot.slane %v523_v15, 2  ;;  %v546_v24 = vshrl.u32 %v510_v10, 16  ;;  %v481_v40 = vld [vmem:[#allocation2 + $0x10] sm:$0x7]  ;;  %v588_v49 = vld [vmem:[#allocation2 + $0xc] sm:$0x6] }
  0x2a   : > { %v519_v21 = vrot.slane %v517_v18, 2  ;;  %v549_v25 = vshll.u32 %v510_v10, 16  ;;  %v555_v26 = vshll.u32 %v513_v13, 16  ;;  %v559_v27 = vshrl.u32 %v516_v17, 16  ;;  %v650_v12 = vld [vmem:[#allocation2 + $0x4] sm:$0x7] }
  0x2b   : > { %v562_v28 = vshll.u32 %v516_v17, 16  ;;  %v572_v29 = vshrl.u32 %v522_v14, 16  ;;  %v548_v30 = vrot.slane %v546_v24, 6  ;;  %v545_v35 = vsel %vm3492_vm1, %v540_v23, %v544_v20  ;;  %v651_v16 = vld [vmem:[#allocation2 + $0x8] sm:$0x7] }
  0x2c   : > { %v551_v31 = vrot.slane %v549_v25, 7  ;;  %v568_v32 = vshll.u32 %v519_v21, 16  ;;  %v557_v37 = vrot.slane %v555_v26, 7  ;;  %v561_v38 = vrot.slane %v559_v27, 6  ;;  %v739_v1 = vld [vmem:[#allocation2 + $0x8] sm:$0x6] }
  0x2d   : > { %v564_v39 = vrot.slane %v562_v28, 7  ;;  %v574_v42 = vrot.slane %v572_v29, 6  ;;  %v575_v43 = vshll.u32 %v522_v14, 16  ;;  %v581_v44 = vshll.u32 %v525_v19, 16  ;;  %v652_v19 = vld [vmem:[#allocation2 + $0xc] sm:$0x7] }
  0x2e   : > { %v552_v41 = vor.u32 %v551_v31, %v548_v30  ;;  %v570_v47 = vrot.slane %v568_v32, 7  ;;  %v482_v53 = vsel %vm3460_vm8, %v463_v34, %v481_v40  ;;  %v594_v59 = vrot.slane %v586_v45, 2  ;;  %vm627_vm8 = vmor %vm625_vm11, %vm626_vm12 }
  0x2f   : > { %v565_v46 = vor.u32 %v564_v39, %v561_v38  ;;  %v577_v51 = vrot.slane %v575_v43, 7  ;;  %v3498_v52 = vld.sshfl [vmem:[#allocation1] sm:$0xff pattern:$0x73625140]  ;;  %v583_v58 = vrot.slane %v581_v44, 7  ;;  %v595_v61 = vrot.slane %v587_v48, 2  ;;  %vm3518_vm15 = vmor %vm627_vm8, %vm628_vm14 }
  0x30   : > { %v553_v50 = vrot.slane %v552_v41, 2  ;;  %956 = vst [vmem:[#allocation1] ss:$4 sm:$0xff] %v545_v35  ;;  %v596_v62 = vrot.slane %v588_v49, 2  ;;  %v599_v63 = vsel %vm500_vm9, %v585_v33, %v593_v55  ;;  %v601_v0 = vsel %vm504_vm13, %v585_v33, %v593_v55  ;;  %vm3667_vm11 = vmand %vm384_vm4, %vm340_vm2 }
  0x31   : > { %v566_v54 = vrot.slane %v565_v46, 2  ;;  %v578_v57 = vor.u32 %v577_v51, %v574_v42  ;;  %483 = vst [vmem:[#allocation2 + $0x10] sm:$0x7] %v482_v53  ;;  %v606_v3 = vsel %vm500_vm9, %v586_v45, %v594_v59  ;;  %v608_v4 = vsel %vm504_vm13, %v586_v45, %v594_v59  ;;  %v647_v51 = vld [vmem:[#allocation2 + $0x8] sm:$0x3]  ;;  %vm3677_vm12 = vmand %vm404_vm10, %vm361_vm5 }
  0x32   : > { %v558_v56 = vsel %vm3492_vm1, %v553_v50, %v557_v37  ;;  %v613_v5 = vsel %vm500_vm9, %v587_v48, %v595_v61  ;;  %v615_v6 = vsel %vm504_vm13, %v587_v48, %v595_v61  ;;  %v620_v7 = vsel %vm500_vm9, %v588_v49, %v596_v62  ;;  %v646_v48 = vld [vmem:[#allocation2 + $0x4] sm:$0x3] }
  0x33   : > { %v571_v60 = vsel %vm3492_vm1, %v566_v54, %v570_v47  ;;  %959 = vst [vmem:[#allocation1 + $0x1] ss:$4 sm:$0xff] %v558_v56  ;;  %v579_v36 = vrot.slane %v578_v57, 2  ;;  %v622_v9 = vsel %vm504_vm13, %v588_v49, %v596_v62  ;;  %v2791_v10 = vrot.slane %v599_v63, 9  ;;  %v648_v56 = vld [vmem:[#allocation2 + $0xc] sm:$0x3] }
  0x34   : > { %962 = vst [vmem:[#allocation1 + $0x2] ss:$4 sm:$0xff] %v571_v60  ;;  %v2792_v11 = vrot.slane %v601_v0, 9  ;;  %v2793_v14 = vrot.slane %v606_v3, 9  ;;  %v2794_v15 = vrot.slane %v608_v4, 9  ;;  %v2795_v17 = vrot.slane %v613_v5, 9 }
  0x35   : > { %v584_v2 = vsel %vm3492_vm1, %v579_v36, %v583_v58  ;;  %v2796_v18 = vrot.slane %v615_v6, 9  ;;  %v2797_v21 = vrot.slane %v620_v7, 9  ;;  %v2798_v23 = vrot.slane %v622_v9, 9  ;;  %v357_v0 = vld [vmem:[#allocation2 + $0x14] sm:$0x1] }
  0x36   : > { %965 = vst [vmem:[#allocation1 + $0x3] ss:$4 sm:$0xff] %v584_v2  ;;  %v658_v24 = vrot.slane %v650_v12, 2  ;;  %v633_v25 = vsel %vm3518_vm15, %v2791_v10, %v2792_v11  ;;  %v659_v26 = vrot.slane %v651_v16, 2  ;;  %v637_v27 = vsel %vm3518_vm15, %v2793_v14, %v2794_v15  ;;  %v378_v4 = vld [vmem:[#allocation2 + $0x14] sm:$0x4] }
  0x37   : > { %v660_v28 = vrot.slane %v652_v19, 2  ;;  %v641_v31 = vsel %vm3518_vm15, %v2795_v17, %v2796_v18  ;;  %v645_v32 = vsel %vm3518_vm15, %v2797_v21, %v2798_v23  ;;  %v358_v11 = vsel %vm3423_vm3, 0, %v357_v0  ;;  %v738_v23 = vld [vmem:[#allocation2 + $0x4] sm:$0x6] }
  0x38   : > { %v653_v20 = vld [vmem:[#allocation2 + $0x10] sm:$0x7]  ;;  %v664_v33 = vsel %vm500_vm9, %v650_v12, %v658_v24  ;;  %v670_v34 = vsel %vm500_vm9, %v651_v16, %v659_v26  ;;  %v665_v40 = vsel %vm504_vm13, %v650_v12, %v658_v24  ;;  %v671_v41 = vsel %vm504_vm13, %v651_v16, %v659_v26  ;;  %359 = vst [vmem:[#allocation2 + $0x14] sm:$0x1] %v358_v11 }
  0x39   : > { %v661_v29 = vrot.slane %v653_v20, 2  ;;  %v676_v35 = vsel %vm500_vm9, %v652_v19, %v660_v28  ;;  %v686_v38 = vshrl.u32 %v664_v33, 16  ;;  %v689_v39 = vshll.u32 %v664_v33, 16  ;;  %v649_v5 = vld [vmem:[#allocation2 + $0x10] sm:$0x3] }
  0x3a   : > { %v699_v42 = vshrl.u32 %v670_v34, 16  ;;  %v702_v43 = vshll.u32 %v670_v34, 16  ;;  %v677_v44 = vsel %vm504_vm13, %v652_v19, %v660_v28  ;;  %v712_v45 = vshrl.u32 %v676_v35, 16  ;;  %v740_v28 = vld [vmem:[#allocation2 + $0xc] sm:$0x6] }
  0x3b   : > { %v682_v37 = vsel %vm500_vm9, %v653_v20, %v661_v29  ;;  %v715_v46 = vshll.u32 %v676_v35, 16  ;;  %v683_v49 = vsel %vm504_vm13, %v653_v20, %v661_v29  ;;  %v667_v53 = vrot.slane %v665_v40, 2  ;;  %v741_v29 = vld [vmem:[#allocation2 + $0x10] sm:$0x6] }
  0x3c   : > { %v725_v47 = vshrl.u32 %v682_v37, 16  ;;  %v728_v50 = vshll.u32 %v682_v37, 16  ;;  %v688_v54 = vrot.slane %v686_v38, 6  ;;  %v691_v55 = vrot.slane %v689_v39, 7 }
  0x3d   : > { %v966_v30 = vld.sshfl [vmem:[#allocation1] sm:$0xff pattern:$0x73625140]  ;;  %v673_v57 = vrot.slane %v671_v41, 2  ;;  %v679_v58 = vrot.slane %v677_v44, 2  ;;  %v701_v59 = vrot.slane %v699_v42, 6 }
  0x3e   : > { %968 = vrot.lane.b32.xlu0 %v966_v30, %s3359_s9  ;;  %971 = vst [vmem:[#allocation1] ss:$4 sm:$0xff] %v633_v25  ;;  %v704_v60 = vrot.slane %v702_v43, 7  ;;  %v685_v61 = vrot.slane %v683_v49, 2  ;;  %v714_v36 = vrot.slane %v712_v45, 6  ;;  %v717_v62 = vrot.slane %v715_v46, 7 }
  0x3f   : > { %974 = vst [vmem:[#allocation1 + $0x1] ss:$4 sm:$0xff] %v637_v27  ;;  %v727_v63 = vrot.slane %v725_v47, 6  ;;  %v730_v3 = vrot.slane %v728_v50, 7  ;;  %v692_v6 = vor.u32 %v691_v55, %v688_v54  ;;  %v695_v7 = vshll.u32 %v667_v53, 16 }
  0x40   : > { %977 = vst [vmem:[#allocation1 + $0x2] ss:$4 sm:$0xff] %v641_v31  ;;  %v705_v9 = vor.u32 %v704_v60, %v701_v59  ;;  %v708_v10 = vshll.u32 %v673_v57, 16  ;;  %v718_v12 = vor.u32 %v717_v62, %v714_v36  ;;  %v721_v14 = vshll.u32 %v679_v58, 16  ;;  %v799_v49 = vld [vmem:[#allocation2 + $0x8] sm:$0x7] }
  0x41   : > { %980 = vst [vmem:[#allocation1 + $0x3] ss:$4 sm:$0xff] %v645_v32  ;;  %v379_v15 = vsel %vm3437_vm6, 0, %v378_v4  ;;  %v731_v16 = vor.u32 %v730_v3, %v727_v63  ;;  %v734_v17 = vshll.u32 %v685_v61, 16  ;;  %v693_v18 = vrot.slane %v692_v6, 2 }
  0x42   : > { %v697_v19 = vrot.slane %v695_v7, 7  ;;  %v706_v20 = vrot.slane %v705_v9, 2  ;;  %v710_v21 = vrot.slane %v708_v10, 7  ;;  %380 = vst [vmem:[#allocation2 + $0x14] sm:$0x4] %v379_v15  ;;  %v719_v24 = vrot.slane %v718_v12, 2 }
  0x43   : > { %v723_v25 = vrot.slane %v721_v14, 7  ;;  %v732_v26 = vrot.slane %v731_v16, 2  ;;  %v736_v27 = vrot.slane %v734_v17, 7  ;;  %v746_v30 = vrot.slane %v738_v23, 2  ;;  %v800_v53 = vld [vmem:[#allocation2 + $0xc] sm:$0x7] }
  0x44   : > { %v698_v8 = vsel %vm3492_vm1, %v693_v18, %v697_v19  ;;  %v711_v31 = vsel %vm3492_vm1, %v706_v20, %v710_v21  ;;  %v747_v32 = vrot.slane %v739_v1, 2  ;;  %v748_v35 = vrot.slane %v740_v28, 2  ;;  %v3211_v7 = vld [vmem:[%s4074_s1 + $0x38] sm:$0xff]  ;;  %v3210_v15 = vld [vmem:[%s4074_s1 + $0x30] sm:$0xff] }
  0x45   : > { %v724_v34 = vsel %vm3492_vm1, %v719_v24, %v723_v25  ;;  %v737_v37 = vsel %vm3492_vm1, %v732_v26, %v736_v27  ;;  %v749_v38 = vrot.slane %v741_v29, 2  ;;  %v752_v39 = vsel %vm500_vm9, %v738_v23, %v746_v30  ;;  %v3219_v10 = vld [vmem:[%s4074_s1 + $0x78] sm:$0xff]  ;;  %1236 = vmatpush.bf16.msra.mxu0 %v3211_v7  ;;  %v3218_v7 = vld [vmem:[%s4074_s1 + $0x70] sm:$0xff] }
  0x46   : > { %v754_v40 = vsel %vm504_vm13, %v738_v23, %v746_v30  ;;  %v759_v41 = vsel %vm500_vm9, %v739_v1, %v747_v32  ;;  %v761_v42 = vsel %vm504_vm13, %v739_v1, %v747_v32  ;;  %v766_v43 = vsel %vm500_vm9, %v740_v28, %v748_v35  ;;  %1250 = vmatpush.bf16.msra.mxu1 %v3219_v10  ;;  %v795_v1 = vld [vmem:[#allocation2 + $0x8] sm:$0x3]  ;;  %v796_v30 = vld [vmem:[#allocation2 + $0xc] sm:$0x3]  ;;  %v3217_v10 = vld [vmem:[%s4074_s1 + $0x68] sm:$0xff] }
  0x47   : > { %v768_v44 = vsel %vm504_vm13, %v740_v28, %v748_v35  ;;  %v773_v45 = vsel %vm500_vm9, %v741_v29, %v749_v38  ;;  %v775_v46 = vsel %vm504_vm13, %v741_v29, %v749_v38  ;;  %v2799_v47 = vrot.slane %v752_v39, 9  ;;  %v3209_v29 = vld [vmem:[%s4074_s1 + $0x28] sm:$0xff] }
  0x48   : > { %v981_v2 = vld.sshfl [vmem:[#allocation1] sm:$0xff pattern:$0x73625140]  ;;  %v2801_v50 = vrot.slane %v759_v41, 9  ;;  %v2803_v54 = vrot.slane %v766_v43, 9  ;;  %v2804_v55 = vrot.slane %v768_v44, 9 }
  0x49   : > { %983 = vrot.lane.b32.xlu0 %v981_v2, %s3360_s10  ;;  %986 = vst [vmem:[#allocation1] ss:$4 sm:$0xff] %v646_v48  ;;  %v2800_v48 = vrot.slane %v754_v40, 9  ;;  %v2805_v57 = vrot.slane %v773_v45, 9  ;;  %v2806_v58 = vrot.slane %v775_v46, 9  ;;  %v807_v60 = vrot.slane %v799_v49, 2  ;;  %1237 = vmatpush.bf16.msra.mxu0 %v3210_v15 }
  0x4a   : > { %989 = vst [vmem:[#allocation1 + $0x1] ss:$4 sm:$0xff] %v647_v51  ;;  %v2802_v51 = vrot.slane %v761_v42, 9  ;;  %v802_v59 = vld [vmem:[#allocation2 + $0x14] sm:$0x7]  ;;  %v808_v36 = vrot.slane %v800_v53, 2  ;;  %v789_v0 = vsel %vm3518_vm15, %v2803_v54, %v2804_v55  ;;  %1251 = vmatpush.bf16.msra.mxu1 %v3218_v7 }
  0x4b   : > { %992 = vst [vmem:[#allocation1 + $0x2] ss:$4 sm:$0xff] %v648_v56  ;;  %v801_v56 = vld [vmem:[#allocation2 + $0x10] sm:$0x7]  ;;  %v781_v61 = vsel %vm3518_vm15, %v2799_v47, %v2800_v48  ;;  %v810_v3 = vrot.slane %v802_v59, 2  ;;  %v793_v4 = vsel %vm3518_vm15, %v2805_v57, %v2806_v58  ;;  %v814_v16 = vsel %vm504_vm13, %v799_v49, %v807_v60  ;;  %v3208_v46 = vld [vmem:[%s4074_s1 + $0x20] sm:$0xff] }
  0x4c   : > { %995 = vst [vmem:[#allocation1 + $0x3] ss:$4 sm:$0xff] %v649_v5  ;;  %v785_v62 = vsel %vm3518_vm15, %v2801_v50, %v2802_v51  ;;  %v809_v63 = vrot.slane %v801_v56, 2  ;;  %v813_v5 = vsel %vm500_vm9, %v799_v49, %v807_v60  ;;  %v819_v6 = vsel %vm500_vm9, %v800_v53, %v808_v36  ;;  %v798_v43 = vld [vmem:[#allocation2 + $0x14] sm:$0x3] }
  0x4d   : > { %v831_v11 = vsel %vm500_vm9, %v802_v59, %v810_v3  ;;  %v835_v12 = vshrl.u32 %v813_v5, 16  ;;  %v838_v14 = vshll.u32 %v813_v5, 16  ;;  %v848_v17 = vshrl.u32 %v819_v6, 16  ;;  %1238 = vmatpush.bf16.msra.mxu0 %v3209_v29  ;;  %v889_v15 = vld [vmem:[#allocation2 + $0x10] sm:$0x6] }
  0x4e   : > { %v825_v9 = vsel %vm500_vm9, %v801_v56, %v809_v63  ;;  %v851_v18 = vshll.u32 %v819_v6, 16  ;;  %v820_v19 = vsel %vm504_vm13, %v800_v53, %v808_v36  ;;  %v826_v23 = vsel %vm504_vm13, %v801_v56, %v809_v63  ;;  %v3207_v56 = vld [vmem:[%s4074_s1 + $0x18] sm:$0xff]  ;;  %v3206_v63 = vld [vmem:[%s4074_s1 + $0x10] sm:$0xff]  ;;  %1252 = vmatpush.bf16.msra.mxu1 %v3217_v10  ;;  %v406_v7 = vld [vmem:[#allocation3] sm:$0x4] }
  0x4f   : > { %v861_v20 = vshrl.u32 %v825_v9, 16  ;;  %v864_v21 = vshll.u32 %v825_v9, 16  ;;  %v874_v24 = vshrl.u32 %v831_v11, 16  ;;  %v877_v25 = vshll.u32 %v831_v11, 16  ;;  %v3205_v9 = vld [vmem:[%s4074_s1 + $0x8] sm:$0xff]  ;;  %v3204_v11 = vld [vmem:[%s4074_s1] sm:$0xff] }
  0x50   : > { %v816_v26 = vrot.slane %v814_v16, 2  ;;  %v832_v27 = vsel %vm504_vm13, %v802_v59, %v810_v3  ;;  %v837_v28 = vrot.slane %v835_v12, 6  ;;  %v850_v32 = vrot.slane %v848_v17, 6  ;;  %v887_v12 = vld [vmem:[#allocation2 + $0x8] sm:$0x6]  ;;  %v3216_v16 = vld [vmem:[%s4074_s1 + $0x60] sm:$0xff] }
  0x51   : > { %v828_v35 = vrot.slane %v826_v23, 2  ;;  %v866_v38 = vrot.slane %v864_v21, 7  ;;  %v834_v40 = vrot.slane %v832_v27, 2  ;;  %v876_v41 = vrot.slane %v874_v24, 6  ;;  %1239 = vmatpush.bf16.msra.mxu0 %v3208_v46  ;;  %v3221_v17 = vld [vmem:[%s4074_s1 + $0x88] sm:$0xff]  ;;  %v3215_v24 = vld [vmem:[%s4074_s1 + $0x58] sm:$0xff] }
  0x52   : > { %v879_v42 = vrot.slane %v877_v25, 7  ;;  %v844_v45 = vshll.u32 %v816_v26, 16  ;;  %v897_v21 = vrot.slane %v889_v15, 2  ;;  %1253 = vmatpush.bf16.msra.mxu1 %v3216_v16  ;;  %1270 = vmatpush.bf16.msra.mxu2 %v3221_v17  ;;  %v3220_v25 = vld [vmem:[%s4074_s1 + $0x80] sm:$0xff]  ;;  %v3213_v46 = vld [vmem:[%s4074_s1 + $0x48] sm:$0xff]  ;;  %vm1069_vm3 = vcmask 261120  }
  0x53   : > { %v996_v33 = vld.sshfl [vmem:[#allocation1] sm:$0xff pattern:$0x73625140]  ;;  %v870_v50 = vshll.u32 %v828_v35, 16  ;;  %v883_v53 = vshll.u32 %v834_v40, 16  ;;  %vm1072_vm6 = vcmask 523264  }
  0x54   : > { %998 = vrot.lane.b32.xlu1 %v996_v33, %s3361_s11  ;;  %1001 = vst [vmem:[#allocation1] ss:$4 sm:$0xff] %v698_v8  ;;  %v840_v8 = vrot.slane %v838_v14, 7  ;;  %v853_v33 = vrot.slane %v851_v18, 7  ;;  %v880_v51 = vor.u32 %v879_v42, %v876_v41  ;;  %v846_v55 = vrot.slane %v844_v45, 7  ;;  %v3214_v42 = vld [vmem:[%s4074_s1 + $0x50] sm:$0xff] }
  0x55   : > { %1004 = vst [vmem:[#allocation1 + $0x1] ss:$4 sm:$0xff] %v711_v31  ;;  %v822_v31 = vrot.slane %v820_v19, 2  ;;  %v872_v60 = vrot.slane %v870_v50, 7  ;;  %v885_v36 = vrot.slane %v883_v53, 7  ;;  %1240 = vmatpush.bf16.msra.mxu0 %v3207_v56  ;;  %v895_v19 = vrot.slane %v887_v12, 2 }
  0x56   : > { %1007 = vst [vmem:[#allocation1 + $0x2] ss:$4 sm:$0xff] %v724_v34  ;;  %v797_v34 = vld [vmem:[#allocation2 + $0x10] sm:$0x3]  ;;  %v841_v44 = vor.u32 %v840_v8, %v837_v28  ;;  %v854_v47 = vor.u32 %v853_v33, %v850_v32  ;;  %v888_v14 = vld [vmem:[#allocation2 + $0xc] sm:$0x6]  ;;  %v915_v8 = vsel %vm500_vm9, %v889_v15, %v897_v21  ;;  %v917_v29 = vsel %vm504_vm13, %v889_v15, %v897_v21 }
  0x57   : > { %1010 = vst [vmem:[#allocation1 + $0x3] ss:$4 sm:$0xff] %v737_v37  ;;  %v863_v37 = vrot.slane %v861_v20, 6  ;;  %v857_v48 = vshll.u32 %v822_v31, 16  ;;  %v890_v18 = vld [vmem:[#allocation2 + $0x14] sm:$0x6]  ;;  %v903_v26 = vsel %vm504_vm13, %v887_v12, %v895_v19  ;;  %1254 = vmatpush.bf16.msra.mxu1 %v3215_v24  ;;  %1271 = vmatpush.bf16.msra.mxu2 %v3220_v25 }
  0x58   : > { %v842_v54 = vrot.slane %v841_v44, 2  ;;  %v855_v57 = vrot.slane %v854_v47, 2  ;;  %v896_v20 = vrot.slane %v888_v14, 2  ;;  %v898_v23 = vrot.slane %v890_v18, 2  ;;  %v409_v10 = vld [vmem:[#allocation3 + $0x4] sm:$0x4] }
  0x59   : > { %v867_v49 = vor.u32 %v866_v38, %v863_v37  ;;  %v859_v58 = vrot.slane %v857_v48, 7  ;;  %1241 = vmatpush.bf16.msra.mxu0 %v3206_v63  ;;  %v2808_v33 = vrot.slane %v903_v26, 9  ;;  %v2811_v37 = vrot.slane %v915_v8, 9  ;;  %v421_v15 = vld [vmem:[#allocation3 + $0x14] sm:$0x4] }
  0x5a   : > { %v908_v27 = vsel %vm500_vm9, %v888_v14, %v896_v20  ;;  %v910_v28 = vsel %vm504_vm13, %v888_v14, %v896_v20  ;;  %v924_v31 = vsel %vm504_vm13, %v890_v18, %v898_v23  ;;  %v2812_v38 = vrot.slane %v917_v29, 9  ;;  %v3323_v24 = vld [vmem:[%s4076_s3] ss:$0 sm:$0xff] }
  0x5b   : > { %v868_v59 = vrot.slane %v867_v49, 2  ;;  %v2810_v35 = vrot.slane %v910_v28, 9  ;;  %v2814_v41 = vrot.slane %v924_v31, 9  ;;  %1255 = vmatpush.bf16.msra.mxu1 %v3214_v42  ;;  %v3212_v49 = vld [vmem:[%s4074_s1 + $0x40] sm:$0xff]  ;;  %v422_v16 = vsel %vm3677_vm12, 0, %v421_v15 }
  0x5c   : > { %v938_v44 = vsel %vm3518_vm15, %v2811_v37, %v2812_v38  ;;  %423 = vst [vmem:[#allocation3 + $0x14] sm:$0x4] %v422_v16  ;;  %vm1373_vm8 = vcmask 1042432  }
  0x5d   : > { %1242 = vmatpush.bf16.msra.mxu0 %v3205_v9  ;;  %v407_v9 = vsel %vm3677_vm12, 0, %v406_v7  ;;  %vm3714_vm14 = vmand %vm1373_vm8, %vm470_vm7 }
  0x5e   : > { %v3567_v2 = vld.sshfl [vmem:[#allocation1] sm:$0xff pattern:$0x73625140]  ;;  %408 = vst [vmem:[#allocation3] sm:$0x4] %v407_v9 }
  0x5f   : > { %1013 = vst [vmem:[#allocation1] ss:$4 sm:$0xff] %v781_v61  ;;  %v881_v61 = vrot.slane %v880_v51, 2  ;;  %1256 = vmatpush.bf16.msra.mxu1 %v3213_v46 }
  0x60   : > { %1016 = vst [vmem:[#allocation1 + $0x1] ss:$4 sm:$0xff] %v785_v62  ;;  %v847_v62 = vsel %vm3492_vm1, %v842_v54, %v846_v55 }
  0x61   : > { %1019 = vst [vmem:[#allocation1 + $0x2] ss:$4 sm:$0xff] %v789_v0  ;;  %v860_v0 = vsel %vm3492_vm1, %v855_v57, %v859_v58  ;;  %v886_v5 = vsel %vm3492_vm1, %v881_v61, %v885_v36  ;;  %1243 = vmatpush.bf16.msra.mxu0 %v3204_v11  ;;  %v386_v36 = vld [vmem:[#allocation3] sm:$0x1]  ;;  %v410_v11 = vsel %vm3677_vm12, 0, %v409_v10 }
  0x62   : > { %1022 = vst [vmem:[#allocation1 + $0x3] ss:$4 sm:$0xff] %v793_v4  ;;  %v873_v4 = vsel %vm3492_vm1, %v868_v59, %v872_v60  ;;  %v387_v63 = vsel %vm3667_vm11, 0, %v386_v36  ;;  %v418_v36 = vld [vmem:[#allocation3 + $0x10] sm:$0x4] }
  0x63   : > { %1257 = vmatpush.bf16.msra.mxu1 %v3212_v49  ;;  %388 = vst [vmem:[#allocation3] sm:$0x1] %v387_v63  ;;  %v419_v63 = vsel %vm3677_vm12, 0, %v418_v36 }
  0x64   : > { %411 = vst [vmem:[#allocation3 + $0x4] sm:$0x4] %v410_v11 }
  0x65   : > { %420 = vst [vmem:[#allocation3 + $0x10] sm:$0x4] %v419_v63  ;;  %v3253_v63 = vld [vmem:[%s4078_s5 + $0xf8] sm:$0xff] }
  0x67   : > { %2588 = vmatpush.bf16.msrb.mxu1 %v3253_v63 }
  0x69   : > { %v1023_v39 = vld.sshfl [vmem:[#allocation1] sm:$0xff pattern:$0x73625140] }
  0x6a   : > { %1025 = vrot.lane.b32.xlu1 %v1023_v39, %s3359_s9  ;;  %1028 = vst [vmem:[#allocation1] ss:$4 sm:$0xff] %v795_v1  ;;  %v901_v1 = vsel %vm500_vm9, %v887_v12, %v895_v19  ;;  %v412_v12 = vld [vmem:[#allocation3 + $0x8] sm:$0x4]  ;;  %v1387_v42 = vld [vmem:[#allocation3] sm:$0x3] }
  0x6b   : > { %1031 = vst [vmem:[#allocation1 + $0x1] ss:$4 sm:$0xff] %v796_v30  ;;  %v922_v30 = vsel %vm500_vm9, %v890_v18, %v898_v23  ;;  %v2807_v32 = vrot.slane %v901_v1, 9  ;;  %v413_v14 = vsel %vm3677_vm12, 0, %v412_v12  ;;  %v3322_v18 = vld [vmem:[%s4075_s2] ss:$0 sm:$0xff] }
  0x6c   : > { %1034 = vst [vmem:[#allocation1 + $0x2] ss:$4 sm:$0xff] %v797_v34  ;;  %v2809_v34 = vrot.slane %v908_v27, 9  ;;  %v2813_v40 = vrot.slane %v922_v30, 9  ;;  %v3324_v1 = vld [vmem:[%s4077_s4] ss:$0 sm:$0xff] }
  0x6d   : > { %1037 = vst [vmem:[#allocation1 + $0x3] ss:$4 sm:$0xff] %v798_v43  ;;  %v930_v39 = vsel %vm3518_vm15, %v2807_v32, %v2808_v33 }
  0x6e   : > { %v934_v43 = vsel %vm3518_vm15, %v2809_v34, %v2810_v35  ;;  %v942_v45 = vsel %vm3518_vm15, %v2813_v40, %v2814_v41  ;;  %414 = vst [vmem:[#allocation3 + $0x8] sm:$0x4] %v413_v14 }
  0x74   : > { %v1038_v3 = vld.sshfl [vmem:[#allocation1] sm:$0xff pattern:$0x73625140] }
  0x75   : > { %1040 = vrot.lane.b32.xlu2 %v1038_v3, %s3360_s10  ;;  %1043 = vst [vmem:[#allocation1] ss:$4 sm:$0xff] %v847_v62  ;;  %v389_v62 = vld [vmem:[#allocation3 + $0x4] sm:$0x1]  ;;  %v392_v3 = vld [vmem:[#allocation3 + $0x8] sm:$0x1] }
  0x76   : > { %1046 = vst [vmem:[#allocation1 + $0x1] ss:$4 sm:$0xff] %v860_v0  ;;  %v390_v0 = vsel %vm3667_vm11, 0, %v389_v62 }
  0x77   : > { %1049 = vst [vmem:[#allocation1 + $0x2] ss:$4 sm:$0xff] %v873_v4  ;;  %v401_v4 = vld [vmem:[#allocation3 + $0x14] sm:$0x1] }
  0x78   : > { %1052 = vst [vmem:[#allocation1 + $0x3] ss:$4 sm:$0xff] %v886_v5  ;;  %v393_v5 = vsel %vm3667_vm11, 0, %v392_v3 }
  0x79   : > { %391 = vst [vmem:[#allocation3 + $0x4] sm:$0x1] %v390_v0 }
  0x7a   : > { %394 = vst [vmem:[#allocation3 + $0x8] sm:$0x1] %v393_v5 }
  0x7f   : > { %v1053_v6 = vld.sshfl [vmem:[#allocation1] sm:$0xff pattern:$0x73625140] }
  0x80   : > { %1055 = vrot.lane.b32.xlu2 %v1053_v6, %s3361_s11  ;;  %1058 = vst [vmem:[#allocation1] ss:$4 sm:$0xff] %v930_v39  ;;  %v402_v6 = vsel %vm3667_vm11, 0, %v401_v4  ;;  %v1375_v12 = vld [vmem:[#allocation3 + $0x4] sm:$0x7] }
  0x81   : > { %1061 = vst [vmem:[#allocation1 + $0x1] ss:$4 sm:$0xff] %v934_v43  ;;  %v1378_v16 = vld [vmem:[#allocation3 + $0x8] sm:$0x7] }
  0x82   : > { %1064 = vst [vmem:[#allocation1 + $0x2] ss:$4 sm:$0xff] %v938_v44 }
  0x83   : > { %1067 = vst [vmem:[#allocation1 + $0x3] ss:$4 sm:$0xff] %v942_v45 }
  0x84   : > { %403 = vst [vmem:[#allocation3 + $0x14] sm:$0x1] %v402_v6 }
  0x8a   : > { %v1068_v48 = vld.sshfl [vmem:[#allocation1] sm:$0xff pattern:$0x73625140] }
  0x8b   : > { %2887 = vmatmul.msk.bf16.vlgmr.msra.gmra.mxu2 %vm1069_vm3, %v1068_v48  ;;  %1850 = vst [vmem:[#allocation1] ss:$4 sm:$0xff] %v1387_v42  ;;  %v3235_v42 = vld [vmem:[%s4078_s5 + $0x68] sm:$0xff] }
  0xb0   : > { %v969_v47 = vpop.permute.xlu0 %968 }
  0xb1   : > { %v1071_v50 = vsel %vm1069_vm3, %v3498_v52, %v969_v47 }
  0xbb   : > { %v984_v51 = vpop.permute.xlu0 %983 }
  0xbc   : > { %v1074_v53 = vsel %vm1072_vm6, %v1071_v50, %v984_v51 }
  0xc6   : > { %v999_v54 = vpop.permute.xlu1 %998 }
  0xc7   : > { %v1077_v55 = vsel %vm1075_vm0, %v1074_v53, %v999_v54 }
  0xc8   : > { %1244 = vmatmul.bf16.vlgmr.msra.gmra.mxu0 %v1077_v55  ;;  %v395_v55 = vld [vmem:[#allocation3 + $0xc] sm:$0x1] }
  0xcf   : > { %v1041_v56 = vpop.permute.xlu2 %1040 }
  0xda   : > { %v1056_v58 = vpop.permute.xlu2 %1055 }
  0xdc   : > { %v1026_v57 = vpop.permute.xlu1 %1025 }
  0xdd   : > { %v1080_v59 = vsel %vm1069_vm3, %v3567_v2, %v1026_v57 }
  0xde   : > { %v1082_v60 = vsel %vm1072_vm6, %v1080_v59, %v1041_v56  ;;  %v415_v56 = vld [vmem:[#allocation3 + $0xc] sm:$0x4] }
  0xdf   : > { %v1084_v61 = vsel %vm1075_vm0, %v1082_v60, %v1056_v58  ;;  %v396_v58 = vsel %vm3667_vm11, 0, %v395_v55  ;;  %v416_v59 = vsel %vm3677_vm12, 0, %v415_v56  ;;  %v3223_v55 = vld [vmem:[%s4078_s5 + $0x8] sm:$0xff] }
  0xe0   : > { %1258 = vmatmul.bf16.vlgmr.msra.gmra.mxu1 %v1084_v61  ;;  %397 = vst [vmem:[#allocation3 + $0xc] sm:$0x1] %v396_v58  ;;  %v398_v61 = vld [vmem:[#allocation3 + $0x10] sm:$0x1] }
  0xe1   : > { %v399_v62 = vsel %vm3667_vm11, 0, %v398_v61  ;;  %417 = vst [vmem:[#allocation3 + $0xc] sm:$0x4] %v416_v59 }
  0xe2   : > { %400 = vst [vmem:[#allocation3 + $0x10] sm:$0x1] %v399_v62  ;;  %v3243_v62 = vld [vmem:[%s4078_s5 + $0xa8] sm:$0xff] }
  0xe9   : > { %v1384_v36 = vld [vmem:[#allocation3 + $0x10] sm:$0x7] }
 0x10e   : > { %v1273_v20 = vpop.f32.mrf.mxu2 }
 0x116   : > { %v1275_v32 = vpop.f32.mrf.mxu2 }
 0x145   : > { %v1245_v17 = vpop.f32.mrf.mxu0 }
 0x146   : > { %v1246_v19 = vadd.f32 %v3322_v18, %v1245_v17 }
 0x14d   : > { %v1247_v26 = vpop.f32.mrf.mxu0 }
 0x14e   : > { %v1248_v28 = vadd.f32 %v3322_v18, %v1247_v26 }
 0x15d   : > { %v1259_v21 = vpop.f32.mrf.mxu1 }
 0x15e   : > { %v1260_v23 = vadd.f32 %v1259_v21, %v1246_v19 }
 0x160   : > { %v1274_v25 = vadd.f32 %v1273_v20, %v1260_v23 }
 0x162   : > { %v1282_v27 = vmul.f32 %v3323_v24, %v1274_v25 }
 0x164   : > { %v1288_v8 = vadd.f32 %v3324_v1, %v1282_v27 }
 0x165   : > { %v1261_v29 = vpop.f32.mrf.mxu1 }
 0x166   : > { %v1290_v30 = vsub.f32 0.0, %v1288_v8  ;;  %v1262_v31 = vadd.f32 %v1261_v29, %v1248_v28  ;;  %v3229_v28 = vld [vmem:[%s4078_s5 + $0x38] sm:$0xff] }
 0x167   : > { %2546 = vmatpush.bf16.msra.mxu3 %v3229_v28  ;;  %v3261_v28 = vld [vmem:[%s4078_s5 + $0x138] sm:$0xff] }
 0x168   : > { %v1292_v33 = vmul.f32 1.442695, %v1290_v30  ;;  %v1276_v34 = vadd.f32 %v1275_v32, %v1262_v31  ;;  %v3228_v30 = vld [vmem:[%s4078_s5 + $0x30] sm:$0xff]  ;;  %v3227_v32 = vld [vmem:[%s4078_s5 + $0x28] sm:$0xff] }
 0x16a   : > { %3326 = vpow2.f32 %v1292_v33  ;;  %v1283_v35 = vmul.f32 %v3323_v24, %v1276_v34  ;;  %v3237_v33 = vld [vmem:[%s4078_s5 + $0x78] sm:$0xff] }
 0x16b   : > { %2547 = vmatpush.bf16.msra.mxu3 %v3228_v30  ;;  %2560 = vmatpush.bf16.msrb.mxu2 %v3237_v33 }
 0x16c   : > { %v3702_v37 = vadd.f32 %v3324_v1, %v1283_v35  ;;  %v3226_v35 = vld [vmem:[%s4078_s5 + $0x20] sm:$0xff] }
 0x16e   : > { %v1291_v38 = vsub.f32 0.0, %v3702_v37 }
 0x16f   : > { %2548 = vmatpush.bf16.msra.mxu3 %v3227_v32 }
 0x170   : > { %v3327_v39 = vpop.eup %3326  ;;  %v1294_v40 = vmul.f32 1.442695, %v1291_v38 }
 0x171   : > { %v1296_v41 = vadd.f32 1.0, %v3327_v39 }
 0x172   : > { %3328 = vpow2.f32 %v1294_v40  ;;  %v3225_v40 = vld [vmem:[%s4078_s5 + $0x18] sm:$0xff] }
 0x173   : > { %3330 = vrcp.f32 %v1296_v41  ;;  %v1309_v48 = vand.u32 2147483648, %v1296_v41  ;;  %v1307_v50 = vand.u32 2147483647, %v1296_v41  ;;  %vm1303_vm5 = vweird.f32 %v1296_v41  ;;  %2549 = vmatpush.bf16.msra.mxu3 %v3226_v35 }
 0x175   : > { %v1310_v53 = vor.u32 1.1754944e-38, %v1309_v48  ;;  %vm1308_vm10 = vcmp.eq.f32.partialorder %v1307_v50, 8.507059e+37 }
 0x177   : > { %2550 = vmatpush.bf16.msra.mxu3 %v3225_v40 }
 0x178   : > { %v3329_v43 = vpop.eup %3328 }
 0x179   : > { %v3331_v44 = vpop.eup %3330  ;;  %v1297_v47 = vadd.f32 1.0, %v3329_v43 }
 0x17a   : > { %v1299_v45 = vmul.f32 %v3331_v44, %v1296_v41  ;;  %vm1304_vm2 = vweird.f32 %v3331_v44 }
 0x17b   : > { %3332 = vrcp.f32 %v1297_v47  ;;  %vm1305_vm4 = vmor %vm1303_vm5, %vm1304_vm2  ;;  %v1324_v24 = vand.u32 2147483648, %v1297_v47  ;;  %vm1318_vm6 = vweird.f32 %v1297_v47  ;;  %v1322_v25 = vand.u32 2147483647, %v1297_v47 }
 0x17c   : > { %v1300_v46 = vsub.f32 1.0, %v1299_v45  ;;  %v3224_v45 = vld [vmem:[%s4078_s5 + $0x10] sm:$0xff] }
 0x17d   : > { %v1325_v27 = vor.u32 1.1754944e-38, %v1324_v24  ;;  %vm1323_vm11 = vcmp.eq.f32.partialorder %v1322_v25, 8.507059e+37  ;;  %2551 = vmatpush.bf16.msra.mxu3 %v3224_v45 }
 0x17e   : > { %v1301_v49 = vmul.f32 %v3331_v44, %v1300_v46  ;;  %v1391_v46 = vld [vmem:[#allocation3] sm:$0x7] }
 0x180   : > { %v1302_v51 = vadd.f32 %v3331_v44, %v1301_v49  ;;  %v3234_v49 = vld [vmem:[%s4078_s5 + $0x60] sm:$0xff] }
 0x181   : > { %v3333_v0 = vpop.eup %3332  ;;  %2552 = vmatpush.bf16.msra.mxu3 %v3223_v55 }
 0x182   : > { %v1306_v54 = vsel %vm1305_vm4, %v3331_v44, %v1302_v51  ;;  %v1314_v7 = vmul.f32 %v3333_v0, %v1297_v47  ;;  %vm1319_vm7 = vweird.f32 %v3333_v0  ;;  %v3245_v44 = vld [vmem:[%s4078_s5 + $0xb8] sm:$0xff]  ;;  %v3244_v51 = vld [vmem:[%s4078_s5 + $0xb0] sm:$0xff] }
 0x183   : > { %v1311_v57 = vsel %vm1308_vm10, %v1310_v53, %v1306_v54  ;;  %vm1320_vm0 = vmor %vm1318_vm6, %vm1319_vm7  ;;  %2574 = vmatpush.bf16.msrb.mxu0 %v3245_v44  ;;  %v1399_v53 = vrot.slane %v1391_v46, 2  ;;  %v1381_v54 = vld [vmem:[#allocation3 + $0xc] sm:$0x7] }
 0x184   : > { %v1328_v60 = vmul.f32 %v1311_v57, %v1288_v8  ;;  %v1315_v17 = vsub.f32 1.0, %v1314_v7 }
 0x186   : > { %v1332_v3 = vrot.slane %v1328_v60, 4  ;;  %v1336_v4 = vpack.c.bf16 %v1328_v60, %v1328_v60  ;;  %v1316_v21 = vmul.f32 %v3333_v0, %v1315_v17  ;;  %v3233_v60 = vld [vmem:[%s4078_s5 + $0x58] sm:$0xff]  ;;  %v3231_v17 = vld [vmem:[%s4078_s5 + $0x48] sm:$0xff] }
 0x187   : > { %2575 = vmatpush.bf16.msrb.mxu0 %v3244_v51 }
 0x188   : > { %v1337_v5 = vpack.c.bf16 %v1332_v3, %v1332_v3  ;;  %v1341_v6 = vshrl.u32 %v1336_v4, 16  ;;  %v1344_v10 = vshll.u32 %v1336_v4, 16  ;;  %v1317_v23 = vadd.f32 %v3333_v0, %v1316_v21  ;;  %v3222_v4 = vld [vmem:[%s4078_s5] sm:$0xff] }
 0x189   : > { %2553 = vmatpush.bf16.msra.mxu3 %v3222_v4 }
 0x18a   : > { %v1343_v9 = vrot.slane %v1341_v6, 7  ;;  %v1348_v11 = vshrl.u32 %v1337_v5, 16  ;;  %v1351_v15 = vshll.u32 %v1337_v5, 16  ;;  %v1321_v1 = vsel %vm1320_vm0, %v3333_v0, %v1317_v23 }
 0x18b   : > { %v1326_v29 = vsel %vm1323_vm11, %v1325_v27, %v1321_v1  ;;  %v1406_v0 = vsel %vm500_vm9, %v1391_v46, %v1399_v53  ;;  %2576 = vmatpush.bf16.msrb.mxu0 %v3243_v62  ;;  %v3259_v62 = vld [vmem:[%s4078_s5 + $0x128] sm:$0xff] }
 0x18c   : > { %v1346_v2 = vor.u32 %v1344_v10, %v1343_v9  ;;  %v1350_v14 = vrot.slane %v1348_v11, 7  ;;  %v1329_v31 = vmul.f32 %v1326_v29, %v3702_v37  ;;  %v3236_v37 = vld [vmem:[%s4078_s5 + $0x70] sm:$0xff]  ;;  %v3242_v10 = vld [vmem:[%s4078_s5 + $0xa0] sm:$0xff] }
 0x18d   : > { %2561 = vmatpush.bf16.msrb.mxu2 %v3236_v37  ;;  %v3232_v9 = vld [vmem:[%s4078_s5 + $0x50] sm:$0xff]  ;;  %2602 = vmatpush.bf16.msrb.mxu3 %v3261_v28  ;;  %v3247_v28 = vld [vmem:[%s4078_s5 + $0xc8] sm:$0xff] }
 0x18e   : > { %v1353_v18 = vor.u32 %v1351_v15, %v1350_v14  ;;  %v1376_v19 = vsel %vm3714_vm14, %v1346_v2, %v1375_v12  ;;  %v1338_v34 = vpack.c.bf16 %v1329_v31, %v1329_v31  ;;  %v1333_v38 = vrot.slane %v1329_v31, 4  ;;  %v3252_v11 = vld [vmem:[%s4078_s5 + $0xf0] sm:$0xff] }
 0x18f   : > { %1377 = vst [vmem:[#allocation3 + $0x4] sm:$0x7] %v1376_v19  ;;  %v1408_v12 = vsel %vm504_vm13, %v1391_v46, %v1399_v53  ;;  %v1436_v2 = vshrl.u32 %v1406_v0, 16  ;;  %v1439_v14 = vshll.u32 %v1406_v0, 16  ;;  %2577 = vmatpush.bf16.msrb.mxu0 %v3242_v10  ;;  %2589 = vmatpush.bf16.msrb.mxu1 %v3252_v11  ;;  %v3251_v19 = vld [vmem:[%s4078_s5 + $0xe8] sm:$0xff]  ;;  %v3230_v46 = vld [vmem:[%s4078_s5 + $0x40] sm:$0xff] }
 0x190   : > { %v1379_v20 = vsel %vm3714_vm14, %v1353_v18, %v1378_v16  ;;  %v1355_v39 = vshrl.u32 %v1338_v34, 16  ;;  %v1339_v41 = vpack.c.bf16 %v1333_v38, %v1333_v38  ;;  %v1358_v47 = vshll.u32 %v1338_v34, 16  ;;  %v3241_v18 = vld [vmem:[%s4078_s5 + $0x98] sm:$0xff]  ;;  %v1488_v53 = vld [vmem:[#allocation3] sm:$0x6]  ;;  %v3268_v0 = vld [vmem:[%s4078_s5 + $0x170] sm:$0xff] }
 0x191   : > { %1380 = vst [vmem:[#allocation3 + $0x8] sm:$0x7] %v1379_v20  ;;  %2562 = vmatpush.bf16.msrb.mxu2 %v3235_v42  ;;  %v1410_v15 = vrot.slane %v1408_v12, 2  ;;  %v1438_v20 = vrot.slane %v1436_v2, 6  ;;  %v1441_v23 = vrot.slane %v1439_v14, 7  ;;  %v1496_v4 = vrot.slane %v1488_v53, 2 }
 0x192   : > { %v1357_v43 = vrot.slane %v1355_v39, 7  ;;  %v1362_v48 = vshrl.u32 %v1339_v41, 16  ;;  %v1365_v59 = vshll.u32 %v1339_v41, 16  ;;  %v3238_v11 = vld [vmem:[%s4078_s5 + $0x80] sm:$0xff] }
 0x193   : > { %2578 = vmatpush.bf16.msrb.mxu0 %v3241_v18  ;;  %2590 = vmatpush.bf16.msrb.mxu1 %v3251_v19  ;;  %v1442_v38 = vor.u32 %v1441_v23, %v1438_v20  ;;  %v3267_v18 = vld [vmem:[%s4078_s5 + $0x168] sm:$0xff]  ;;  %v3277_v19 = vld [vmem:[%s4078_s5 + $0x1b8] sm:$0xff]  ;;  %v1502_v23 = vsel %vm500_vm9, %v1488_v53, %v1496_v4 }
 0x194   : > { %v1360_v50 = vor.u32 %v1358_v47, %v1357_v43  ;;  %v1364_v58 = vrot.slane %v1362_v48, 7  ;;  %v3240_v48 = vld [vmem:[%s4078_s5 + $0x90] sm:$0xff] }
 0x195   : > { %2563 = vmatpush.bf16.msrb.mxu2 %v3234_v49  ;;  %v3250_v49 = vld [vmem:[%s4078_s5 + $0xe0] sm:$0xff]  ;;  %v1443_v55 = vrot.slane %v1442_v38, 2 }
 0x196   : > { %v1388_v26 = vld [vmem:[#allocation3 + $0x4] sm:$0x3]  ;;  %v1382_v61 = vsel %vm3714_vm14, %v1360_v50, %v1381_v54  ;;  %v1367_v3 = vor.u32 %v1365_v59, %v1364_v58  ;;  %v3260_v50 = vld [vmem:[%s4078_s5 + $0x130] sm:$0xff]  ;;  %v3239_v58 = vld [vmem:[%s4078_s5 + $0x88] sm:$0xff] }
 0x197   : > { %1853 = vst [vmem:[#allocation1 + $0x1] ss:$4 sm:$0xff] %v1388_v26  ;;  %v1392_v56 = vld [vmem:[#allocation3 + $0x4] sm:$0x7]  ;;  %2579 = vmatpush.bf16.msrb.mxu0 %v3240_v48  ;;  %2591 = vmatpush.bf16.msrb.mxu1 %v3250_v49  ;;  %v3249_v59 = vld [vmem:[%s4078_s5 + $0xd8] sm:$0xff] }
 0x198   : > { %v1389_v8 = vld [vmem:[#allocation3 + $0x8] sm:$0x3]  ;;  %1383 = vst [vmem:[#allocation3 + $0xc] sm:$0x7] %v1382_v61  ;;  %v1400_v5 = vrot.slane %v1392_v56, 2  ;;  %v1385_v7 = vsel %vm3714_vm14, %v1367_v3, %v1384_v36  ;;  %2603 = vmatpush.bf16.msrb.mxu3 %v3260_v50 }
 0x199   : > { %1856 = vst [vmem:[#allocation1 + $0x2] ss:$4 sm:$0xff] %v1389_v8  ;;  %v1393_v57 = vld [vmem:[#allocation3 + $0x8] sm:$0x7]  ;;  %2564 = vmatpush.bf16.msrb.mxu2 %v3233_v60  ;;  %v1445_v8 = vshll.u32 %v1410_v15, 16  ;;  %v3269_v60 = vld [vmem:[%s4078_s5 + $0x178] sm:$0xff] }
 0x19a   : > { %v1401_v6 = vrot.slane %v1393_v57, 2  ;;  %1386 = vst [vmem:[#allocation3 + $0x10] sm:$0x7] %v1385_v7  ;;  %v1413_v52 = vsel %vm500_vm9, %v1392_v56, %v1400_v5  ;;  %v1414_v30 = vsel %vm504_vm13, %v1392_v56, %v1400_v5  ;;  %v1490_v10 = vld [vmem:[#allocation3 + $0x8] sm:$0x6]  ;;  %v3258_v15 = vld [vmem:[%s4078_s5 + $0x120] sm:$0xff] }
 0x19b   : > { %v1449_v24 = vshrl.u32 %v1413_v52, 16  ;;  %v1452_v25 = vshll.u32 %v1413_v52, 16  ;;  %v1416_v44 = vrot.slane %v1414_v30, 2  ;;  %v1447_v56 = vrot.slane %v1445_v8, 7  ;;  %2580 = vmatpush.bf16.msrb.mxu0 %v3239_v58  ;;  %2592 = vmatpush.bf16.msrb.mxu1 %v3249_v59  ;;  %v3248_v52 = vld [vmem:[%s4078_s5 + $0xd0] sm:$0xff]  ;;  %v3257_v8 = vld [vmem:[%s4078_s5 + $0x118] sm:$0xff] }
 0x19c   : > { %v1419_v16 = vsel %vm500_vm9, %v1393_v57, %v1401_v6  ;;  %v1420_v35 = vsel %vm504_vm13, %v1393_v57, %v1401_v6  ;;  %2604 = vmatpush.bf16.msrb.mxu3 %v3259_v62  ;;  %v3276_v30 = vld [vmem:[%s4078_s5 + $0x1b0] sm:$0xff]  ;;  %v3274_v62 = vld [vmem:[%s4078_s5 + $0x1a0] sm:$0xff] }
 0x19d   : > { %2565 = vmatpush.bf16.msrb.mxu2 %v3232_v9  ;;  %v1462_v26 = vshrl.u32 %v1419_v16, 16  ;;  %v1465_v27 = vshll.u32 %v1419_v16, 16  ;;  %v1451_v37 = vrot.slane %v1449_v24, 6  ;;  %v1454_v39 = vrot.slane %v1452_v25, 7  ;;  %v1489_v9 = vld [vmem:[#allocation3 + $0x4] sm:$0x6] }
 0x19e   : > { %v1422_v47 = vrot.slane %v1420_v35, 2  ;;  %v1458_v61 = vshll.u32 %v1416_v44, 16  ;;  %v1448_v6 = vsel %vm3492_vm1, %v1443_v55, %v1447_v56 }
 0x19f   : > { %v1394_v21 = vld [vmem:[#allocation3 + $0xc] sm:$0x7]  ;;  %v1464_v40 = vrot.slane %v1462_v26, 6  ;;  %v1467_v41 = vrot.slane %v1465_v27, 7  ;;  %v1455_v51 = vor.u32 %v1454_v39, %v1451_v37  ;;  %v1504_v26 = vsel %vm504_vm13, %v1488_v53, %v1496_v4  ;;  %2581 = vmatpush.bf16.msrb.mxu0 %v3238_v11  ;;  %2593 = vmatpush.bf16.msrb.mxu1 %v3248_v52  ;;  %v1556_v37 = vld [vmem:[#allocation3 + $0x4] sm:$0x7] }
 0x1a0   : > { %v1402_v1 = vrot.slane %v1394_v21, 2  ;;  %v1390_v31 = vld [vmem:[#allocation3 + $0xc] sm:$0x3]  ;;  %v1471_v63 = vshll.u32 %v1422_v47, 16  ;;  %v1460_v12 = vrot.slane %v1458_v61, 7  ;;  %2605 = vmatpush.bf16.msrb.mxu3 %v3258_v15  ;;  %v3285_v53 = vld [vmem:[%s4078_s5 + $0x1f8] sm:$0xff] }
 0x1a1   : > { %2566 = vmatpush.bf16.msrb.mxu2 %v3231_v17  ;;  %1859 = vst [vmem:[#allocation1 + $0x3] ss:$4 sm:$0xff] %v1390_v31  ;;  %v1468_v57 = vor.u32 %v1467_v41, %v1464_v40  ;;  %v1456_v3 = vrot.slane %v1455_v51, 2  ;;  %v1491_v14 = vld [vmem:[#allocation3 + $0xc] sm:$0x6]  ;;  %v3265_v51 = vld [vmem:[%s4078_s5 + $0x158] sm:$0xff] }
 0x1a2   : > { %v1425_v29 = vsel %vm500_vm9, %v1394_v21, %v1402_v1  ;;  %v1426_v32 = vsel %vm504_vm13, %v1394_v21, %v1402_v1  ;;  %v1473_v16 = vrot.slane %v1471_v63, 7  ;;  %v1497_v21 = vrot.slane %v1489_v9, 2  ;;  %v3875_v39 = vld [vmem:[#allocation3 + $0x8] sm:$0x7]  ;;  %v3890_v50 = vld [vmem:[#allocation3 + $0xc] sm:$0x7] }
 0x1a3   : > { %v1475_v33 = vshrl.u32 %v1425_v29, 16  ;;  %v1478_v34 = vshll.u32 %v1425_v29, 16  ;;  %v1428_v45 = vrot.slane %v1426_v32, 2  ;;  %v1469_v7 = vrot.slane %v1468_v57, 2  ;;  %2630 = vmatpush.bf16.msra.mxu0 %v3277_v19  ;;  %v3266_v29 = vld [vmem:[%s4078_s5 + $0x160] sm:$0xff]  ;;  %2594 = vmatpush.bf16.msrb.mxu1 %v3247_v28  ;;  %v3284_v4 = vld [vmem:[%s4078_s5 + $0x1f0] sm:$0xff] }
 0x1a4   : > { %v1461_v20 = vsel %vm3492_vm1, %v1456_v3, %v1460_v12  ;;  %v1498_v1 = vrot.slane %v1490_v10, 2  ;;  %v1499_v27 = vrot.slane %v1491_v14, 2  ;;  %v1509_v31 = vsel %vm500_vm9, %v1489_v9, %v1497_v21  ;;  %2606 = vmatpush.bf16.msrb.mxu3 %v3257_v8  ;;  %v3899_v58 = vld [vmem:[#allocation3 + $0x10] sm:$0x7]  ;;  %v3273_v12 = vld [vmem:[%s4078_s5 + $0x198] sm:$0xff] }
 0x1a5   : > { %v1477_v42 = vrot.slane %v1475_v33, 6  ;;  %v1480_v43 = vrot.slane %v1478_v34, 7  ;;  %2567 = vmatpush.bf16.msrb.mxu2 %v3230_v46  ;;  %v1484_v36 = vshll.u32 %v1428_v45, 16  ;;  %v1474_v25 = vsel %vm3492_vm1, %v1469_v7, %v1473_v16  ;;  %v3275_v46 = vld [vmem:[%s4078_s5 + $0x1a8] sm:$0xff]  ;;  %v3264_v3 = vld [vmem:[%s4078_s5 + $0x150] sm:$0xff] }
 0x1a6   : > { %v1511_v32 = vsel %vm504_vm13, %v1489_v9, %v1497_v21  ;;  %v2888_v33 = vrot.slane %v1502_v23, 9  ;;  %v2889_v34 = vrot.slane %v1504_v26, 9  ;;  %v1516_v35 = vsel %vm500_vm9, %v1490_v10, %v1498_v1  ;;  %v3254_v9 = vld [vmem:[%s4078_s5 + $0x100] sm:$0xff]  ;;  %v3292_v26 = vld [vmem:[%s4078_s5 + $0x230] sm:$0xff] }
 0x1a7   : > { %v1481_v54 = vor.u32 %v1480_v43, %v1477_v42  ;;  %v1486_v2 = vrot.slane %v1484_v36, 7  ;;  %v1518_v38 = vsel %vm504_vm13, %v1490_v10, %v1498_v1  ;;  %v1523_v40 = vsel %vm500_vm9, %v1491_v14, %v1499_v27  ;;  %v3246_v42 = vld [vmem:[%s4078_s5 + $0xc0] sm:$0xff]  ;;  %v3256_v43 = vld [vmem:[%s4078_s5 + $0x110] sm:$0xff]  ;;  %2631 = vmatpush.bf16.msra.mxu0 %v3276_v30 }
 0x1a8   : > { %v1860_v17 = vld.sshfl [vmem:[#allocation1] sm:$0xff pattern:$0x73625140]  ;;  %v1525_v41 = vsel %vm504_vm13, %v1491_v14, %v1499_v27  ;;  %v2890_v44 = vrot.slane %v1509_v31, 9  ;;  %v2891_v45 = vrot.slane %v1511_v32, 9  ;;  %v1538_v47 = vsel %vm3518_vm15, %v2888_v33, %v2889_v34  ;;  %2595 = vmatpush.bf16.msrb.mxu1 %v3246_v42  ;;  %2607 = vmatpush.bf16.msrb.mxu3 %v3256_v43  ;;  %v3272_v1 = vld [vmem:[%s4078_s5 + $0x190] sm:$0xff] }
 0x1a9   : > { %2616 = vmatpush.bf16.msra.mxu2 %v3269_v60  ;;  %v1482_v5 = vrot.slane %v1481_v54, 2  ;;  %1863 = vst [vmem:[#allocation1] ss:$4 sm:$0xff] %v1448_v6  ;;  %2554 = vmatmul.bf16.vlgmr.msra.gmra.mxu3 %v1860_v17  ;;  %v2892_v48 = vrot.slane %v1516_v35, 9  ;;  %v2893_v49 = vrot.slane %v1518_v38, 9  ;;  %v1564_v54 = vrot.slane %v1556_v37, 2 }
 0x1aa   : > { %1866 = vst [vmem:[#allocation1 + $0x1] ss:$4 sm:$0xff] %v1461_v20  ;;  %v1565_v55 = vrot.slane %v3875_v39, 2  ;;  %v2894_v56 = vrot.slane %v1523_v40, 9  ;;  %v2895_v57 = vrot.slane %v1525_v41, 9  ;;  %v3255_v60 = vld [vmem:[%s4078_s5 + $0x108] sm:$0xff]  ;;  %v1542_v61 = vsel %vm3518_vm15, %v2890_v44, %v2891_v45 }
 0x1ab   : > { %v1487_v24 = vsel %vm3492_vm1, %v1482_v5, %v1486_v2  ;;  %1869 = vst [vmem:[#allocation1 + $0x2] ss:$4 sm:$0xff] %v1474_v25  ;;  %v1566_v36 = vrot.slane %v3890_v50, 2  ;;  %2632 = vmatpush.bf16.msra.mxu0 %v3275_v46  ;;  %v1546_v63 = vsel %vm3518_vm15, %v2892_v48, %v2893_v49  ;;  %v1570_v5 = vsel %vm500_vm9, %v1556_v37, %v1564_v54  ;;  %v3293_v2 = vld [vmem:[%s4078_s5 + $0x238] sm:$0xff]  ;;  %v3263_v17 = vld [vmem:[%s4078_s5 + $0x148] sm:$0xff]  ;;  %v3262_v30 = vld [vmem:[%s4078_s5 + $0x140] sm:$0xff] }
 0x1ac   : > { %1872 = vst [vmem:[#allocation1 + $0x3] ss:$4 sm:$0xff] %v1487_v24  ;;  %2644 = vmatpush.bf16.msra.mxu1 %v3285_v53  ;;  %v1576_v6 = vsel %vm500_vm9, %v3875_v39, %v1565_v55  ;;  %v1550_v7 = vsel %vm3518_vm15, %v2894_v56, %v2895_v57  ;;  %2608 = vmatpush.bf16.msrb.mxu3 %v3255_v60  ;;  %v1592_v14 = vshrl.u32 %v1570_v5, 16  ;;  %v1595_v52 = vshll.u32 %v1570_v5, 16  ;;  %v3282_v31 = vld [vmem:[%s4078_s5 + $0x1e0] sm:$0xff]  ;;  %v3291_v53 = vld [vmem:[%s4078_s5 + $0x228] sm:$0xff] }
 0x1ad   : > { %2617 = vmatpush.bf16.msra.mxu2 %v3268_v0  ;;  %v1567_v0 = vrot.slane %v3899_v58, 2  ;;  %v1571_v10 = vsel %vm504_vm13, %v1556_v37, %v1564_v54  ;;  %v1582_v11 = vsel %vm500_vm9, %v3890_v50, %v1566_v36  ;;  %v1605_v15 = vshrl.u32 %v1576_v6, 16  ;;  %v1552_v32 = vld [vmem:[#allocation3 + $0x4] sm:$0x3]  ;;  %v1554_v34 = vld [vmem:[#allocation3 + $0xc] sm:$0x3] }
 0x1ae   : > { %v1608_v19 = vshll.u32 %v1576_v6, 16  ;;  %v1618_v20 = vshrl.u32 %v1582_v11, 16  ;;  %v1621_v21 = vshll.u32 %v1582_v11, 16  ;;  %v1573_v23 = vrot.slane %v1571_v10, 2  ;;  %v1555_v37 = vld [vmem:[#allocation3 + $0x10] sm:$0x3] }
 0x1af   : > { %2633 = vmatpush.bf16.msra.mxu0 %v3274_v62  ;;  %v1588_v16 = vsel %vm500_vm9, %v3899_v58, %v1567_v0  ;;  %v1577_v27 = vsel %vm504_vm13, %v3875_v39, %v1565_v55  ;;  %v1594_v28 = vrot.slane %v1592_v14, 6  ;;  %v1597_v8 = vrot.slane %v1595_v52, 7  ;;  %v1553_v45 = vld [vmem:[#allocation3 + $0x8] sm:$0x3]  ;;  %v3280_v62 = vld [vmem:[%s4078_s5 + $0x1d0] sm:$0xff] }
 0x1b0   : > { %2645 = vmatpush.bf16.msra.mxu1 %v3284_v4  ;;  %2609 = vmatpush.bf16.msrb.mxu3 %v3254_v9  ;;  %v1631_v24 = vshrl.u32 %v1588_v16, 16  ;;  %v1634_v25 = vshll.u32 %v1588_v16, 16  ;;  %v1610_v33 = vrot.slane %v1608_v19, 7  ;;  %v1583_v35 = vsel %vm504_vm13, %v3890_v50, %v1566_v36  ;;  %v3271_v50 = vld [vmem:[%s4078_s5 + $0x188] sm:$0xff] }
 0x1b1   : > { %2618 = vmatpush.bf16.msra.mxu2 %v3267_v18  ;;  %v3283_v18 = vld [vmem:[%s4078_s5 + $0x1e8] sm:$0xff]  ;;  %v1589_v39 = vsel %vm504_vm13, %v3899_v58, %v1567_v0  ;;  %v1620_v40 = vrot.slane %v1618_v20, 6  ;;  %v1623_v41 = vrot.slane %v1621_v21, 7  ;;  %v1579_v42 = vrot.slane %v1577_v27, 2  ;;  %v3270_v58 = vld [vmem:[%s4078_s5 + $0x180] sm:$0xff] }
 0x1b2   : > { %v1633_v43 = vrot.slane %v1631_v24, 6  ;;  %v1636_v44 = vrot.slane %v1634_v25, 7  ;;  %v1598_v46 = vor.u32 %v1597_v8, %v1594_v28  ;;  %v1591_v49 = vrot.slane %v1589_v39, 2  ;;  %v1645_v4 = vld [vmem:[#allocation3 + $0x8] sm:$0x6]  ;;  %v3289_v25 = vld [vmem:[%s4078_s5 + $0x218] sm:$0xff] }
 0x1b3   : > { %v1873_v59 = vld.sshfl [vmem:[#allocation1] sm:$0xff pattern:$0x73625140]  ;;  %2634 = vmatpush.bf16.msra.mxu0 %v3273_v12  ;;  %v1601_v54 = vshll.u32 %v1573_v23, 16  ;;  %v1624_v55 = vor.u32 %v1623_v41, %v1620_v40  ;;  %v1614_v56 = vshll.u32 %v1579_v42, 16  ;;  %v3279_v24 = vld [vmem:[%s4078_s5 + $0x1c8] sm:$0xff] }
 0x1b4   : > { %1876 = vst [vmem:[#allocation1] ss:$4 sm:$0xff] %v1538_v47  ;;  %2568 = vmatmul.bf16.vlgmr.msrb.gmra.mxu2 %v1873_v59  ;;  %2658 = vmatpush.bf16.msra.mxu3 %v3293_v2  ;;  %v1585_v47 = vrot.slane %v1583_v35, 2  ;;  %v1637_v57 = vor.u32 %v1636_v44, %v1633_v43  ;;  %v3290_v59 = vld [vmem:[%s4078_s5 + $0x220] sm:$0xff]  ;;  %v1599_v60 = vrot.slane %v1598_v46, 2  ;;  %v1640_v0 = vshll.u32 %v1591_v49, 16 }
 0x1b5   : > { %2619 = vmatpush.bf16.msra.mxu2 %v3266_v29  ;;  %1879 = vst [vmem:[#allocation1 + $0x1] ss:$4 sm:$0xff] %v1542_v61  ;;  %v1607_v29 = vrot.slane %v1605_v15, 6  ;;  %2646 = vmatpush.bf16.msra.mxu1 %v3283_v18  ;;  %v1644_v61 = vld [vmem:[#allocation3 + $0x4] sm:$0x6]  ;;  %v1625_v5 = vrot.slane %v1624_v55, 2 }
 0x1b6   : > { %1882 = vst [vmem:[#allocation1 + $0x2] ss:$4 sm:$0xff] %v1546_v63  ;;  %v1627_v36 = vshll.u32 %v1585_v47, 16  ;;  %v1616_v6 = vrot.slane %v1614_v56, 7  ;;  %v1638_v9 = vrot.slane %v1637_v57, 2  ;;  %v1653_v15 = vrot.slane %v1645_v4, 2 }
 0x1b7   : > { %1885 = vst [vmem:[#allocation1 + $0x3] ss:$4 sm:$0xff] %v1550_v7  ;;  %2635 = vmatpush.bf16.msra.mxu0 %v3272_v1  ;;  %v1611_v48 = vor.u32 %v1610_v33, %v1607_v29  ;;  %v1652_v7 = vrot.slane %v1644_v61, 2  ;;  %v1646_v10 = vld [vmem:[#allocation3 + $0xc] sm:$0x6]  ;;  %v1642_v16 = vrot.slane %v1640_v0, 7 }
 0x1b8   : > { %2659 = vmatpush.bf16.msra.mxu3 %v3292_v26  ;;  %v1629_v12 = vrot.slane %v1627_v36, 7  ;;  %v1647_v2 = vld [vmem:[#allocation3 + $0x10] sm:$0x6]  ;;  %v1654_v18 = vrot.slane %v1646_v10, 2  ;;  %v1665_v1 = vsel %vm500_vm9, %v1645_v4, %v1653_v15  ;;  %v1667_v26 = vsel %vm504_vm13, %v1645_v4, %v1653_v15  ;;  %v1708_v27 = vld [vmem:[#allocation3 + $0x14] sm:$0x7] }
 0x1b9   : > { %2620 = vmatpush.bf16.msra.mxu2 %v3265_v51  ;;  %2647 = vmatpush.bf16.msra.mxu1 %v3282_v31  ;;  %v3281_v51 = vld [vmem:[%s4078_s5 + $0x1d8] sm:$0xff]  ;;  %v1612_v63 = vrot.slane %v1611_v48, 2  ;;  %v1643_v19 = vsel %vm3492_vm1, %v1638_v9, %v1642_v16  ;;  %v1655_v20 = vrot.slane %v1647_v2, 2  ;;  %v1658_v21 = vsel %vm500_vm9, %v1644_v61, %v1652_v7  ;;  %v3278_v29 = vld [vmem:[%s4078_s5 + $0x1c0] sm:$0xff]  ;;  %v1705_v33 = vld [vmem:[#allocation3 + $0x8] sm:$0x7] }
 0x1ba   : > { %v1660_v23 = vsel %vm504_vm13, %v1644_v61, %v1652_v7  ;;  %v1672_v28 = vsel %vm500_vm9, %v1646_v10, %v1654_v18  ;;  %v1674_v8 = vsel %vm504_vm13, %v1646_v10, %v1654_v18  ;;  %v2896_v31 = vrot.slane %v1658_v21, 9  ;;  %v1706_v39 = vld [vmem:[#allocation3 + $0xc] sm:$0x7]  ;;  %v1707_v43 = vld [vmem:[#allocation3 + $0x10] sm:$0x7]  ;;  %v3286_v0 = vld [vmem:[%s4078_s5 + $0x200] sm:$0xff] }
 0x1bb   : > { %2636 = vmatpush.bf16.msra.mxu0 %v3271_v50  ;;  %v1617_v52 = vsel %vm3492_vm1, %v1612_v63, %v1616_v6  ;;  %v1681_v35 = vsel %vm504_vm13, %v1647_v2, %v1655_v20  ;;  %v1716_v40 = vrot.slane %v1708_v27, 2  ;;  %v2900_v41 = vrot.slane %v1672_v28, 9  ;;  %v1702_v21 = vld [vmem:[#allocation3 + $0xc] sm:$0x3] }
 0x1bc   : > { %2660 = vmatpush.bf16.msra.mxu3 %v3291_v53  ;;  %v2901_v42 = vrot.slane %v1674_v8, 9  ;;  %v1713_v44 = vrot.slane %v1705_v33, 2  ;;  %v2903_v46 = vrot.slane %v1681_v35, 9  ;;  %v1714_v48 = vrot.slane %v1706_v39, 2 }
 0x1bd   : > { %2621 = vmatpush.bf16.msra.mxu2 %v3264_v3  ;;  %2648 = vmatpush.bf16.msra.mxu1 %v3281_v51  ;;  %v1603_v3 = vrot.slane %v1601_v54, 7  ;;  %v1715_v51 = vrot.slane %v1707_v43, 2  ;;  %v1737_v53 = vsel %vm500_vm9, %v1708_v27, %v1716_v40  ;;  %v1738_v61 = vsel %vm504_vm13, %v1708_v27, %v1716_v40 }
 0x1be   : > { %v1886_v38 = vld.sshfl [vmem:[#allocation1] sm:$0xff pattern:$0x73625140]  ;;  %v1695_v54 = vsel %vm3518_vm15, %v2900_v41, %v2901_v42  ;;  %v1719_v55 = vsel %vm500_vm9, %v1705_v33, %v1713_v44  ;;  %v1725_v57 = vsel %vm500_vm9, %v1706_v39, %v1714_v48  ;;  %v1783_v63 = vshll.u32 %v1737_v53, 16  ;;  %v1796_v41 = vld [vmem:[#allocation3 + $0x14] sm:$0x6] }
 0x1bf   : > { %1895 = vst [vmem:[#allocation1 + $0x2] ss:$4 sm:$0xff] %v1554_v34  ;;  %2582 = vmatmul.bf16.vlgmr.msrb.gmra.mxu0 %v1886_v38  ;;  %v1604_v11 = vsel %vm3492_vm1, %v1599_v60, %v1603_v3  ;;  %v1679_v34 = vsel %vm500_vm9, %v1647_v2, %v1655_v20  ;;  %v2898_v38 = vrot.slane %v1665_v1, 9  ;;  %v1731_v60 = vsel %vm500_vm9, %v1707_v43, %v1715_v51 }
 0x1c0   : > { %1898 = vst [vmem:[#allocation1 + $0x3] ss:$4 sm:$0xff] %v1555_v37  ;;  %2637 = vmatpush.bf16.msra.mxu0 %v3270_v58  ;;  %2661 = vmatpush.bf16.msra.mxu3 %v3290_v59  ;;  %v2899_v37 = vrot.slane %v1667_v26, 9  ;;  %v3287_v58 = vld [vmem:[%s4078_s5 + $0x208] sm:$0xff]  ;;  %v1780_v59 = vshrl.u32 %v1737_v53, 16  ;;  %v1741_v36 = vshrl.u32 %v1719_v55, 16  ;;  %v1726_v15 = vsel %vm504_vm13, %v1706_v39, %v1714_v48 }
 0x1c1   : > { %2622 = vmatpush.bf16.msra.mxu2 %v3263_v17  ;;  %1889 = vst [vmem:[#allocation1] ss:$4 sm:$0xff] %v1552_v32  ;;  %2649 = vmatpush.bf16.msra.mxu1 %v3280_v62  ;;  %v1630_v17 = vsel %vm3492_vm1, %v1625_v5, %v1629_v12  ;;  %v2897_v32 = vrot.slane %v1660_v23, 9  ;;  %v1744_v62 = vshll.u32 %v1719_v55, 16  ;;  %v1754_v3 = vshrl.u32 %v1725_v57, 16 }
 0x1c2   : > { %1892 = vst [vmem:[#allocation1 + $0x1] ss:$4 sm:$0xff] %v1553_v45  ;;  %v2902_v45 = vrot.slane %v1679_v34, 9  ;;  %v1691_v50 = vsel %vm3518_vm15, %v2898_v38, %v2899_v37  ;;  %v1757_v4 = vshll.u32 %v1725_v57, 16  ;;  %v1720_v5 = vsel %vm504_vm13, %v1705_v33, %v1713_v44  ;;  %v1704_v12 = vld [vmem:[#allocation3 + $0x14] sm:$0x3] }
 0x1c3   : > { %v1687_v47 = vsel %vm3518_vm15, %v2896_v31, %v2897_v32  ;;  %v1767_v6 = vshrl.u32 %v1731_v60, 16  ;;  %v1770_v7 = vshll.u32 %v1731_v60, 16  ;;  %v1740_v9 = vrot.slane %v1738_v61, 2  ;;  %v1793_v37 = vld [vmem:[#allocation3 + $0x8] sm:$0x6] }
 0x1c4   : > { %2662 = vmatpush.bf16.msra.mxu3 %v3289_v25  ;;  %v1699_v56 = vsel %vm3518_vm15, %v2902_v45, %v2903_v46  ;;  %v1782_v10 = vrot.slane %v1780_v59, 6  ;;  %v1743_v2 = vrot.slane %v1741_v36, 6  ;;  %v1722_v16 = vrot.slane %v1720_v5, 2  ;;  %v1703_v25 = vld [vmem:[#allocation3 + $0x10] sm:$0x3] }
 0x1c5   : > { %2623 = vmatpush.bf16.msra.mxu2 %v3262_v30  ;;  %2650 = vmatpush.bf16.msra.mxu1 %v3279_v24  ;;  %v3288_v30 = vld [vmem:[%s4078_s5 + $0x210] sm:$0xff]  ;;  %v1756_v18 = vrot.slane %v1754_v3, 6  ;;  %v1769_v23 = vrot.slane %v1767_v6, 6  ;;  %v1772_v24 = vrot.slane %v1770_v7, 7  ;;  %v1728_v1 = vrot.slane %v1726_v15, 2 }
 0x1c6   : > { %v1789_v8 = vshll.u32 %v1740_v9, 16  ;;  %v1795_v45 = vld [vmem:[#allocation3 + $0x10] sm:$0x6] }
 0x1c7   : > { %v1773_v31 = vor.u32 %v1772_v24, %v1769_v23  ;;  %v1763_v32 = vshll.u32 %v1728_v1, 16 }
 0x1c8   : > { %2663 = vmatpush.bf16.msra.mxu3 %v3288_v30  ;;  %v1750_v30 = vshll.u32 %v1722_v16, 16  ;;  %v1791_v38 = vrot.slane %v1789_v8, 7 }
 0x1c9   : > { %v1899_v14 = vld.sshfl [vmem:[#allocation1] sm:$0xff pattern:$0x73625140]  ;;  %2651 = vmatpush.bf16.msra.mxu1 %v3278_v29  ;;  %v1774_v42 = vrot.slane %v1773_v31, 2  ;;  %v1765_v44 = vrot.slane %v1763_v32, 7 }
 0x1ca   : > { %2596 = vmatmul.bf16.vlgmr.msrb.gmra.mxu1 %v1899_v14  ;;  %1902 = vst [vmem:[#allocation1] ss:$4 sm:$0xff] %v1604_v11  ;;  %v1701_v11 = vld [vmem:[#allocation3 + $0x8] sm:$0x3]  ;;  %v1746_v14 = vrot.slane %v1744_v62, 7  ;;  %v1752_v40 = vrot.slane %v1750_v30, 7 }
 0x1cb   : > { %1905 = vst [vmem:[#allocation1 + $0x1] ss:$4 sm:$0xff] %v1617_v52  ;;  %v1785_v52 = vrot.slane %v1783_v63, 7 }
 0x1cc   : > { %1908 = vst [vmem:[#allocation1 + $0x2] ss:$4 sm:$0xff] %v1630_v17  ;;  %2664 = vmatpush.bf16.msra.mxu3 %v3287_v58  ;;  %v1732_v17 = vsel %vm504_vm13, %v1707_v43, %v1715_v51  ;;  %v1747_v26 = vor.u32 %v1746_v14, %v1743_v2  ;;  %v1794_v43 = vld [vmem:[#allocation3 + $0xc] sm:$0x6]  ;;  %v1804_v51 = vrot.slane %v1796_v41, 2 }
 0x1cd   : > { %1911 = vst [vmem:[#allocation1 + $0x3] ss:$4 sm:$0xff] %v1643_v19  ;;  %v1759_v19 = vrot.slane %v1757_v4, 7  ;;  %v1734_v27 = vrot.slane %v1732_v17, 2  ;;  %v1786_v28 = vor.u32 %v1785_v52, %v1782_v10 }
 0x1ce   : > { %v1748_v33 = vrot.slane %v1747_v26, 2  ;;  %v1828_v59 = vsel %vm500_vm9, %v1796_v41, %v1804_v51  ;;  %v1830_v60 = vsel %vm504_vm13, %v1796_v41, %v1804_v51 }
 0x1cf   : > { %v1760_v29 = vor.u32 %v1759_v19, %v1756_v18  ;;  %v1776_v34 = vshll.u32 %v1734_v27, 16  ;;  %v1787_v35 = vrot.slane %v1786_v28, 2  ;;  %v2910_v3 = vrot.slane %v1828_v59, 9 }
 0x1d0   : > { %2665 = vmatpush.bf16.msra.mxu3 %v3286_v0  ;;  %v1753_v46 = vsel %vm3492_vm1, %v1748_v33, %v1752_v40  ;;  %v2911_v4 = vrot.slane %v1830_v60, 9 }
 0x1d1   : > { %v1761_v39 = vrot.slane %v1760_v29, 2  ;;  %v1778_v48 = vrot.slane %v1776_v34, 7 }
 0x1d3   : > { %v1766_v53 = vsel %vm3492_vm1, %v1761_v39, %v1765_v44  ;;  %v1779_v55 = vsel %vm3492_vm1, %v1774_v42, %v1778_v48 }
 0x1d4   : > { %v1912_v49 = vld.sshfl [vmem:[#allocation1] sm:$0xff pattern:$0x73625140] }
 0x1d5   : > { %2610 = vmatmul.bf16.vlgmr.msrb.gmra.mxu3 %v1912_v49  ;;  %1915 = vst [vmem:[#allocation1] ss:$4 sm:$0xff] %v1687_v47  ;;  %v1801_v47 = vrot.slane %v1793_v37, 2 }
 0x1d6   : > { %1918 = vst [vmem:[#allocation1 + $0x1] ss:$4 sm:$0xff] %v1691_v50  ;;  %v1792_v50 = vsel %vm3492_vm1, %v1787_v35, %v1791_v38 }
 0x1d7   : > { %1921 = vst [vmem:[#allocation1 + $0x2] ss:$4 sm:$0xff] %v1695_v54  ;;  %v1802_v54 = vrot.slane %v1794_v43, 2  ;;  %v1807_v57 = vsel %vm500_vm9, %v1793_v37, %v1801_v47  ;;  %v1809_v58 = vsel %vm504_vm13, %v1793_v37, %v1801_v47 }
 0x1d8   : > { %1924 = vst [vmem:[#allocation1 + $0x3] ss:$4 sm:$0xff] %v1699_v56  ;;  %v1803_v56 = vrot.slane %v1795_v45, 2  ;;  %v2904_v63 = vrot.slane %v1807_v57, 9  ;;  %v2905_v0 = vrot.slane %v1809_v58, 9 }
 0x1d9   : > { %v1814_v61 = vsel %vm500_vm9, %v1794_v43, %v1802_v54  ;;  %v1816_v36 = vsel %vm504_vm13, %v1794_v43, %v1802_v54 }
 0x1da   : > { %v1821_v62 = vsel %vm500_vm9, %v1795_v45, %v1803_v56  ;;  %v1823_v22 = vsel %vm504_vm13, %v1795_v45, %v1803_v56  ;;  %v2906_v5 = vrot.slane %v1814_v61, 9  ;;  %v2907_v6 = vrot.slane %v1816_v36, 9 }
 0x1db   : > { %v2908_v7 = vrot.slane %v1821_v62, 9  ;;  %v2909_v9 = vrot.slane %v1823_v22, 9  ;;  %v1836_v10 = vsel %vm3518_vm15, %v2904_v63, %v2905_v0 }
 0x1dc   : > { %v1840_v2 = vsel %vm3518_vm15, %v2906_v5, %v2907_v6 }
 0x1dd   : > { %v1844_v14 = vsel %vm3518_vm15, %v2908_v7, %v2909_v9 }
 0x1df   : > { %v1925_v20 = vld.sshfl [vmem:[#allocation1] sm:$0xff pattern:$0x73625140] }
 0x1e0   : > { %2624 = vmatmul.bf16.vlgmr.msra.gmra.mxu2 %v1925_v20  ;;  %1928 = vst [vmem:[#allocation1] ss:$4 sm:$0xff] %v1701_v11  ;;  %v3325_v20 = vld [vmem:[%s4079_s6] ss:$0 sm:$0xff] }
 0x1e1   : > { %1931 = vst [vmem:[#allocation1 + $0x1] ss:$4 sm:$0xff] %v1702_v21 }
 0x1e2   : > { %1934 = vst [vmem:[#allocation1 + $0x2] ss:$4 sm:$0xff] %v1703_v25 }
 0x1e3   : > { %1937 = vst [vmem:[#allocation1 + $0x3] ss:$4 sm:$0xff] %v1704_v12  ;;  %v1848_v12 = vsel %vm3518_vm15, %v2910_v3, %v2911_v4 }
 0x1ea   : > { %v1938_v49 = vld.sshfl [vmem:[#allocation1] sm:$0xff pattern:$0x73625140] }
 0x1eb   : > { %2638 = vmatmul.bf16.vlgmr.msra.gmra.mxu0 %v1938_v49  ;;  %1941 = vst [vmem:[#allocation1] ss:$4 sm:$0xff] %v1753_v46 }
 0x1ec   : > { %1944 = vst [vmem:[#allocation1 + $0x1] ss:$4 sm:$0xff] %v1766_v53 }
 0x1ed   : > { %1947 = vst [vmem:[#allocation1 + $0x2] ss:$4 sm:$0xff] %v1779_v55 }
 0x1ee   : > { %1950 = vst [vmem:[#allocation1 + $0x3] ss:$4 sm:$0xff] %v1792_v50 }
 0x1f5   : > { %v1951_v11 = vld.sshfl [vmem:[#allocation1] sm:$0xff pattern:$0x73625140] }
 0x1f6   : > { %2652 = vmatmul.bf16.vlgmr.msra.gmra.mxu1 %v1951_v11  ;;  %1954 = vst [vmem:[#allocation1] ss:$4 sm:$0xff] %v1836_v10 }
 0x1f7   : > { %1957 = vst [vmem:[#allocation1 + $0x1] ss:$4 sm:$0xff] %v1840_v2 }
 0x1f8   : > { %1960 = vst [vmem:[#allocation1 + $0x2] ss:$4 sm:$0xff] %v1844_v14 }
 0x1f9   : > { %1963 = vst [vmem:[#allocation1 + $0x3] ss:$4 sm:$0xff] %v1848_v12 }
 0x200   : > { %v1964_v52 = vld.sshfl [vmem:[#allocation1] sm:$0xff pattern:$0x73625140] }
 0x201   : > { %2666 = vmatmul.bf16.vlgmr.msra.gmra.mxu3 %v1964_v52 }
 0x22c   : > { %v2555_v15 = vpop.f32.mrf.mxu3 }
 0x22d   : > { %v2556_v23 = vadd.f32 %v3325_v20, %v2555_v15 }
 0x234   : > { %v2557_v17 = vpop.f32.mrf.mxu3 }
 0x235   : > { %v2558_v28 = vadd.f32 %v3325_v20, %v2557_v17 }
 0x237   : > { %v2569_v16 = vpop.f32.mrf.mxu2 }
 0x238   : > { %v2570_v25 = vadd.f32 %v2569_v16, %v2556_v23 }
 0x23c   : > { %v2583_v18 = vpop.f32.mrf.mxu0 }
 0x23d   : > { %v2584_v26 = vadd.f32 %v2583_v18, %v2570_v25 }
 0x23f   : > { %v2571_v21 = vpop.f32.mrf.mxu2 }
 0x240   : > { %v2572_v29 = vadd.f32 %v2571_v21, %v2558_v28 }
 0x244   : > { %v2585_v13 = vpop.f32.mrf.mxu0 }
 0x245   : > { %v2586_v35 = vadd.f32 %v2585_v13, %v2572_v29 }
 0x247   : > { %v2597_v19 = vpop.f32.mrf.mxu1 }
 0x248   : > { %v2598_v8 = vadd.f32 %v2597_v19, %v2584_v26 }
 0x24f   : > { %v2599_v1 = vpop.f32.mrf.mxu1 }
 0x250   : > { %v2600_v38 = vadd.f32 %v2599_v1, %v2586_v35 }
 0x258   : > { %v2611_v24 = vpop.f32.mrf.mxu3 }
 0x259   : > { %v2612_v30 = vadd.f32 %v2611_v24, %v2598_v8 }
 0x260   : > { %v2613_v31 = vpop.f32.mrf.mxu3 }
 0x261   : > { %v2614_v40 = vadd.f32 %v2613_v31, %v2600_v38 }
 0x263   : > { %v2625_v27 = vpop.f32.mrf.mxu2 }
 0x264   : > { %v2626_v33 = vadd.f32 %v2625_v27, %v2612_v30 }
 0x268   : > { %v2639_v32 = vpop.f32.mrf.mxu0 }
 0x269   : > { %v2640_v37 = vadd.f32 %v2639_v32, %v2626_v33 }
 0x26b   : > { %v2627_v39 = vpop.f32.mrf.mxu2 }
 0x26c   : > { %v2628_v43 = vadd.f32 %v2627_v39, %v2614_v40 }
 0x270   : > { %v2641_v45 = vpop.f32.mrf.mxu0 }
 0x271   : > { %v2642_v47 = vadd.f32 %v2641_v45, %v2628_v43 }
 0x273   : > { %v2653_v34 = vpop.f32.mrf.mxu1 }
 0x274   : > { %v2654_v41 = vadd.f32 %v2653_v34, %v2640_v37 }
 0x27b   : > { %v2655_v46 = vpop.f32.mrf.mxu1 }
 0x27c   : > { %v2656_v48 = vadd.f32 %v2655_v46, %v2642_v47 }
 0x284   : > { %v2667_v42 = vpop.f32.mrf.mxu3 }
 0x285   : > { %v2668_v44 = vadd.f32 %v2667_v42, %v2654_v41 }
 0x287   : > { %2673 = vst.msk [vmem:[%s329_s22] sm:$0xff] %vm1069_vm3, %v2668_v44 }
 0x28c   : > { %v2669_v49 = vpop.f32.mrf.mxu3 }
 0x28d   : > { %v2670_v50 = vadd.f32 %v2669_v49, %v2656_v48 }
 0x28f   : > { %2674 = vst.msk [vmem:[%s329_s22 + $0x8] sm:$0xff] %vm1069_vm3, %v2670_v50 }
 0x290 PF: > { %s17_s26 = sadd.s32 1, %s3356_s26   ;;  %s4097_s24 = smov %s3352_s25 }
 0x291   : > { %p14_p5 = scmp.ge.s32.totalorder %s17_s26, 4   ;;  %s4098_s25 = smov %s4100_s27 }
 0x293   :  { %16 = sbr.rel (!%p14_p5) target bundleno = 2 (0x2), region = 149 }

</bundles_post_ra>
